<compile_context>
chip_gen: v5e
topology: v5e:2x2
jax: 0.10.0
libtpu: 0.0.40
codegen_flags: <defaults>
</compile_context>

<pallas_src>
import functools

import jax
import jax.numpy as jnp
from jax.experimental import pallas as pl
from jax.experimental.pallas import tpu as pltpu


BLOCK_M = 256   # row tile (multiple of 8 sublanes); whole array when smaller


# ----------------------------- Pallas kernels ------------------------------

def _swish(x):
    # x * sigmoid(x): exp and the (approx) reciprocal both go to the EUP,
    # keeping VALU slots free for the residual add.
    return x * pl.reciprocal(1.0 + jnp.exp(-x), approx=True)


def conv_kernel(col_ref, w_ref, out_ref, *, apply_swish):
    """3x3 conv as ONE matmul over the K = 9*Cin im2col axis (+ fused Swish)."""
    acc = jnp.dot(col_ref[...], w_ref[...], preferred_element_type=jnp.float32)
    if apply_swish:
        acc = _swish(acc)
    out_ref[...] = acc.astype(out_ref.dtype)


def conv_res_kernel(col_ref, w_ref, res_ref, out_ref):
    """Block conv2: matmul + identity residual + Swish, fused."""
    acc = jnp.dot(col_ref[...], w_ref[...], preferred_element_type=jnp.float32)
    acc = acc + res_ref[...].astype(jnp.float32)
    out_ref[...] = _swish(acc).astype(out_ref.dtype)


def conv_dsres_kernel(col_ref, w_ref, xs_ref, wd_ref, bd_ref, out_ref):
    """Block conv2 (subsample): matmul + fused 1x1/stride-2 downsample residual
    (matmul + bias, f32) + Swish, all in one kernel."""
    acc = jnp.dot(col_ref[...], w_ref[...], preferred_element_type=jnp.float32)
    res = jnp.dot(xs_ref[...], wd_ref[...], preferred_element_type=jnp.float32)
    res = res + bd_ref[...].astype(jnp.float32)
    out_ref[...] = _swish(acc + res).astype(out_ref.dtype)


def head_kernel(x_ref, w_ref, b_ref, out_ref):
    """AdaptiveAvgPool2d((1,1)) + Flatten + Linear: one vectorized spatial
    reduction followed by one matmul + bias."""
    pooled = jnp.mean(x_ref[...].astype(jnp.float32), axis=1)           # (N, C)
    acc = jnp.dot(pooled, w_ref[...], preferred_element_type=jnp.float32)
    out_ref[...] = (acc + b_ref[...]).astype(out_ref.dtype)


# --------------------------- pallas_call wrappers ----------------------------

def _conv_pallas_call(kernel, m, cout, args, row_blocked):
    """Gridded over M; args with row_blocked=True are tiled over rows, others
    (weights / bias) get a constant index_map so they stay VMEM-resident."""
    bm = min(m, BLOCK_M)
    if m % bm != 0:                       # fall back to whole-array block
        bm = m
    grid = (m // bm,)
    in_specs = []
    for a, rb in zip(args, row_blocked):
        if rb:
            in_specs.append(pl.BlockSpec((bm, a.shape[1]), lambda i: (i, 0)))
        else:
            in_specs.append(pl.BlockSpec(a.shape, lambda i: (0, 0)))
    return pl.pallas_call(
        kernel,
        out_shape=jax.ShapeDtypeStruct((m, cout), jnp.float32),
        grid=grid,
        in_specs=in_specs,
        out_specs=pl.BlockSpec((bm, cout), lambda i: (i, 0)),
        compiler_params=pltpu.CompilerParams(
            dimension_semantics=("parallel",)),
    )(*args)


# ------------------------------ JAX glue ops --------------------------------

def _im2col_3x3(x, stride):
    """im2col for a 3x3 / padding=1 conv: taps concatenated along channels so
    the kernel does a single (M, 9*Cin) x (9*Cin, Cout) matmul."""
    n, h, w, c = x.shape
    xp = jnp.pad(x, ((0, 0), (1, 1), (1, 1), (0, 0)))
    ho = (h - 1) // stride + 1
    wo = (w - 1) // stride + 1
    cols = []
    for dy in range(3):
        for dx in range(3):
            cols.append(xp[:, dy:dy + stride * (ho - 1) + 1:stride,
                             dx:dx + stride * (wo - 1) + 1:stride, :])
    col = jnp.concatenate(cols, axis=-1)              # (n, ho, wo, 9*c)
    return col.reshape(n * ho * wo, 9 * c), (n, ho, wo)


def conv3x3(x, w_col, *, stride=1, apply_swish=True):
    """3x3 conv, padding=1, bias=False; one MXU matmul inside the kernel."""
    cout = w_col.shape[1]
    col, (n, ho, wo) = _im2col_3x3(x, stride)
    m = n * ho * wo
    out = _conv_pallas_call(
        functools.partial(conv_kernel, apply_swish=apply_swish),
        m, cout,
        [col.astype(jnp.bfloat16), w_col.astype(jnp.bfloat16)],
        [True, False])
    return out.reshape(n, ho, wo, cout)


def input_conv(x, w_in9):
    """Input conv (Cin=1): pad channels to 8 (zero weight rows) then conv3x3."""
    cin, c0 = w_in9.shape[1], w_in9.shape[2]
    pad_c = max(8 - cin, 0)
    if pad_c:
        x = jnp.pad(x, ((0, 0), (0, 0), (0, 0), (0, pad_c)))
        w_in9 = jnp.pad(w_in9, ((0, 0), (0, pad_c), (0, 0)))
    return conv3x3(x, w_in9.reshape(-1, c0), stride=1, apply_swish=True)


def resnet_block(x, bp, subsample):
    n, h, w, c_in = x.shape
    stride = 2 if subsample else 1
    # conv1 + Swish (single matmul kernel)
    h1 = conv3x3(x, bp['w1'], stride=stride, apply_swish=True)
    n_, ho, wo, cout = h1.shape
    m = n_ * ho * wo
    # conv2 + residual (+ downsample) + Swish, fused in one kernel
    col2, _ = _im2col_3x3(h1, 1)
    col2 = col2.astype(jnp.bfloat16)
    w2 = bp['w2'].astype(jnp.bfloat16)
    if subsample:
        xs = x[:, ::2, ::2, :].reshape(m, c_in).astype(jnp.bfloat16)
        out = _conv_pallas_call(
            conv_dsres_kernel, m, cout,
            [col2, w2, xs, bp['wd'].astype(jnp.bfloat16), bp['bd']],
            [True, False, True, False, False])
    else:
        res = x.reshape(m, cout)                      # identity path, f32
        out = _conv_pallas_call(
            conv_res_kernel, m, cout,
            [col2, w2, res],
            [True, False, True])
    return out.reshape(n_, ho, wo, cout)


def head(x, w, b):
    """AdaptiveAvgPool2d((1,1)) + Flatten + Linear (single kernel)."""
    n, h, w_, c = x.shape
    xf = x.reshape(n, h * w_, c)
    num_classes = w.shape[1]
    return pl.pallas_call(
        head_kernel,
        out_shape=jax.ShapeDtypeStruct((n, num_classes), jnp.float32),
        in_specs=[pl.BlockSpec(memory_space=pltpu.MemorySpace.VMEM)] * 3,
        out_specs=pl.BlockSpec(memory_space=pltpu.MemorySpace.VMEM),
    )(xf, w, b)


# --------------------------- parameters & model ------------------------------

def init_params(key, num_classes=10, num_blocks=(3, 3, 3), c_hidden=(16, 32, 64)):
    counter = [0]

    def next_key():
        counter[0] += 1
        return jax.random.fold_in(key, counter[0])

    def conv_w(cin, cout):   # (9, Cin, Cout): tap-major / channel-minor
        fan_in = 9 * cin
        return jax.random.normal(next_key(), (9, cin, cout),
                                 jnp.float32) * jnp.sqrt(2.0 / fan_in)

    params = {'w_in': conv_w(1, c_hidden[0])}   # padded/reshaped in the wrapper
    blocks, cfgs = [], []
    for gi, bcount in enumerate(num_blocks):
        for bi in range(bcount):
            subsample = (bi == 0 and gi > 0)
            c_in = c_hidden[gi - 1] if subsample else c_hidden[gi]
            c_out = c_hidden[gi]
            bp = {'w1': conv_w(c_in, c_out).reshape(9 * c_in, c_out),
                  'w2': conv_w(c_out, c_out).reshape(9 * c_out, c_out)}
            if subsample:
                bp['wd'] = jax.random.normal(next_key(), (c_in, c_out),
                                             jnp.float32) * jnp.sqrt(1.0 / c_in)
                bp['bd'] = jnp.zeros((1, c_out), jnp.float32)
            blocks.append(bp)
            cfgs.append(subsample)
    params['blocks'] = blocks
    params['w_head'] = jax.random.normal(next_key(), (c_hidden[-1], num_classes),
                                         jnp.float32) * jnp.sqrt(1.0 / c_hidden[-1])
    params['b_head'] = jnp.zeros((1, num_classes), jnp.float32)
    return params, tuple(cfgs)


def make_forward(cfgs):
    @jax.jit
    def forward(params, x_nchw):
        x = jnp.transpose(x_nchw, (0, 2, 3, 1))                  # NCHW -> NHWC
        x = input_conv(x, params['w_in'])                        # input_net
        for bp, subsample in zip(params['blocks'], cfgs):
            x = resnet_block(x, bp, subsample)
        return head(x, params['w_head'], params['b_head'])       # output_net
    return forward


# ---------------------------------- main -------------------------------------

if __name__ == "__main__":
    key = jax.random.PRNGKey(0)
    params, cfgs = init_params(jax.random.fold_in(key, 1),
                               num_classes=10,
                               num_blocks=(3, 3, 3),
                               c_hidden=(16, 32, 64))
    # MNIST-like input: batch=2, 1 channel, 16x16 spatial (NCHW, as in PyTorch).
    x = jax.random.normal(jax.random.fold_in(key, 2), (2, 1, 16, 16), jnp.float32)

    forward = make_forward(cfgs)
    out = jax.block_until_ready(forward(params, x))

    assert out.shape == (2, 10), out.shape
    assert out.dtype == jnp.float32
    assert bool(jnp.all(jnp.isfinite(out)))
    print("KERNEL_OK")
</pallas_src>

<mosaic_0001>
module attributes {stable_mosaic.version = 11 : i64} {
  func.func @conv_kernel(%arg0: i32, %arg1: memref<256x72xbf16, #tpu.memory_space<vmem>>, %arg2: memref<72x16xbf16, #tpu.memory_space<vmem>>, %arg3: memref<256x16xf32, #tpu.memory_space<vmem>>) attributes {dimension_semantics = [#tpu.dimension_semantics<parallel>], iteration_bounds = array<i64: 2>, scalar_prefetch = 0 : i64, scratch_operands = 0 : i64, tpu.core_type = #tpu.core_type<tc>, window_params = [{transform_indices = @transform_0, window_bounds = array<i64: 256, 72>}, {pipeline_mode = #tpu.pipeline_mode<synchronous>, transform_indices = @transform_1, window_bounds = array<i64: 72, 16>}, {transform_indices = @transform_2, window_bounds = array<i64: 256, 16>}]} {
    %c0 = arith.constant 0 : index
    %c0_0 = arith.constant 0 : index
    %0 = vector.load %arg1[%c0, %c0_0] : memref<256x72xbf16, #tpu.memory_space<vmem>>, vector<256x72xbf16>
    %c0_1 = arith.constant 0 : index
    %c0_2 = arith.constant 0 : index
    %1 = vector.load %arg2[%c0_1, %c0_2] : memref<72x16xbf16, #tpu.memory_space<vmem>>, vector<72x16xbf16>
    %cst = arith.constant dense<0.000000e+00> : vector<256x16xf32>
    %2 = tpu.matmul %0, %1, %cst {dimension_numbers = #tpu.dot_dimension_numbers<[1], [0], [0], [1], [0, 0, 1, 1], [], []>} : vector<256x72xbf16>, vector<72x16xbf16>, vector<256x16xf32> -> vector<256x16xf32>
    %cst_3 = arith.constant 0.000000e+00 : f32
    %3 = vector.broadcast %cst_3 : f32 to vector<256x16xf32>
    %4 = arith.subf %3, %2 : vector<256x16xf32>
    %5 = math.exp %4 : vector<256x16xf32>
    %cst_4 = arith.constant 1.000000e+00 : f32
    %6 = vector.broadcast %cst_4 : f32 to vector<256x16xf32>
    %7 = arith.addf %6, %5 : vector<256x16xf32>
    %8 = tpu.reciprocal %7 {approx = true} : vector<256x16xf32> -> vector<256x16xf32>
    %9 = arith.mulf %2, %8 : vector<256x16xf32>
    %c0_5 = arith.constant 0 : index
    %c0_6 = arith.constant 0 : index
    %10 = vector.load %arg3[%c0_5, %c0_6] : memref<256x16xf32, #tpu.memory_space<vmem>>, vector<256x16xf32>
    tpu.vector_store %arg3[%c0_5, %c0_6], %9 {strides = array<i32>} : memref<256x16xf32, #tpu.memory_space<vmem>>, vector<256x16xf32>,
    return
  }
  func.func @transform_0(%arg0: i32) -> (i32, i32) {
    %c0_i32 = arith.constant 0 : i32
    %c0_i32_0 = arith.constant 0 : i32
    return %arg0, %c0_i32 : i32, i32
  }
  func.func @transform_1(%arg0: i32) -> (i32, i32) {
    %c0_i32 = arith.constant 0 : i32
    %c0_i32_0 = arith.constant 0 : i32
    %c0_i32_1 = arith.constant 0 : i32
    return %c0_i32, %c0_i32_0 : i32, i32
  }
  func.func @transform_2(%arg0: i32) -> (i32, i32) {
    %c0_i32 = arith.constant 0 : i32
    %c0_i32_0 = arith.constant 0 : i32
    return %arg0, %c0_i32 : i32, i32
  }
}

module attributes {stable_mosaic.version = 11 : i64} {
  func.func @conv_res_kernel(%arg0: i32, %arg1: memref<256x144xbf16, #tpu.memory_space<vmem>>, %arg2: memref<144x16xbf16, #tpu.memory_space<vmem>>, %arg3: memref<256x16xf32, #tpu.memory_space<vmem>>, %arg4: memref<256x16xf32, #tpu.memory_space<vmem>>) attributes {dimension_semantics = [#tpu.dimension_semantics<parallel>], iteration_bounds = array<i64: 2>, scalar_prefetch = 0 : i64, scratch_operands = 0 : i64, tpu.core_type = #tpu.core_type<tc>, window_params = [{transform_indices = @transform_0, window_bounds = array<i64: 256, 144>}, {pipeline_mode = #tpu.pipeline_mode<synchronous>, transform_indices = @transform_1, window_bounds = array<i64: 144, 16>}, {transform_indices = @transform_2, window_bounds = array<i64: 256, 16>}, {transform_indices = @transform_3, window_bounds = array<i64: 256, 16>}]} {
    %c0 = arith.constant 0 : index
    %c0_0 = arith.constant 0 : index
    %0 = vector.load %arg1[%c0, %c0_0] : memref<256x144xbf16, #tpu.memory_space<vmem>>, vector<256x144xbf16>
    %c0_1 = arith.constant 0 : index
    %c0_2 = arith.constant 0 : index
    %1 = vector.load %arg2[%c0_1, %c0_2] : memref<144x16xbf16, #tpu.memory_space<vmem>>, vector<144x16xbf16>
    %cst = arith.constant dense<0.000000e+00> : vector<256x16xf32>
    %2 = tpu.matmul %0, %1, %cst {dimension_numbers = #tpu.dot_dimension_numbers<[1], [0], [0], [1], [0, 0, 1, 1], [], []>} : vector<256x144xbf16>, vector<144x16xbf16>, vector<256x16xf32> -> vector<256x16xf32>
    %c0_3 = arith.constant 0 : index
    %c0_4 = arith.constant 0 : index
    %3 = vector.load %arg3[%c0_3, %c0_4] : memref<256x16xf32, #tpu.memory_space<vmem>>, vector<256x16xf32>
    %4 = arith.addf %2, %3 : vector<256x16xf32>
    %cst_5 = arith.constant 0.000000e+00 : f32
    %5 = vector.broadcast %cst_5 : f32 to vector<256x16xf32>
    %6 = arith.subf %5, %4 : vector<256x16xf32>
    %7 = math.exp %6 : vector<256x16xf32>
    %cst_6 = arith.constant 1.000000e+00 : f32
    %8 = vector.broadcast %cst_6 : f32 to vector<256x16xf32>
    %9 = arith.addf %8, %7 : vector<256x16xf32>
    %10 = tpu.reciprocal %9 {approx = true} : vector<256x16xf32> -> vector<256x16xf32>
    %11 = arith.mulf %4, %10 : vector<256x16xf32>
    %c0_7 = arith.constant 0 : index
    %c0_8 = arith.constant 0 : index
    %12 = vector.load %arg4[%c0_7, %c0_8] : memref<256x16xf32, #tpu.memory_space<vmem>>, vector<256x16xf32>
    tpu.vector_store %arg4[%c0_7, %c0_8], %11 {strides = array<i32>} : memref<256x16xf32, #tpu.memory_space<vmem>>, vector<256x16xf32>,
    return
  }
  func.func @transform_0(%arg0: i32) -> (i32, i32) {
    %c0_i32 = arith.constant 0 : i32
    %c0_i32_0 = arith.constant 0 : i32
    return %arg0, %c0_i32 : i32, i32
  }
  func.func @transform_1(%arg0: i32) -> (i32, i32) {
    %c0_i32 = arith.constant 0 : i32
    %c0_i32_0 = arith.constant 0 : i32
    %c0_i32_1 = arith.constant 0 : i32
    return %c0_i32, %c0_i32_0 : i32, i32
  }
  func.func @transform_2(%arg0: i32) -> (i32, i32) {
    %c0_i32 = arith.constant 0 : i32
    %c0_i32_0 = arith.constant 0 : i32
    return %arg0, %c0_i32 : i32, i32
  }
  func.func @transform_3(%arg0: i32) -> (i32, i32) {
    %c0_i32 = arith.constant 0 : i32
    %c0_i32_0 = arith.constant 0 : i32
    return %arg0, %c0_i32 : i32, i32
  }
}

module attributes {stable_mosaic.version = 11 : i64} {
  func.func @conv_kernel(%arg0: i32, %arg1: memref<256x144xbf16, #tpu.memory_space<vmem>>, %arg2: memref<144x16xbf16, #tpu.memory_space<vmem>>, %arg3: memref<256x16xf32, #tpu.memory_space<vmem>>) attributes {dimension_semantics = [#tpu.dimension_semantics<parallel>], iteration_bounds = array<i64: 2>, scalar_prefetch = 0 : i64, scratch_operands = 0 : i64, tpu.core_type = #tpu.core_type<tc>, window_params = [{transform_indices = @transform_0, window_bounds = array<i64: 256, 144>}, {pipeline_mode = #tpu.pipeline_mode<synchronous>, transform_indices = @transform_1, window_bounds = array<i64: 144, 16>}, {transform_indices = @transform_2, window_bounds = array<i64: 256, 16>}]} {
    %c0 = arith.constant 0 : index
    %c0_0 = arith.constant 0 : index
    %0 = vector.load %arg1[%c0, %c0_0] : memref<256x144xbf16, #tpu.memory_space<vmem>>, vector<256x144xbf16>
    %c0_1 = arith.constant 0 : index
    %c0_2 = arith.constant 0 : index
    %1 = vector.load %arg2[%c0_1, %c0_2] : memref<144x16xbf16, #tpu.memory_space<vmem>>, vector<144x16xbf16>
    %cst = arith.constant dense<0.000000e+00> : vector<256x16xf32>
    %2 = tpu.matmul %0, %1, %cst {dimension_numbers = #tpu.dot_dimension_numbers<[1], [0], [0], [1], [0, 0, 1, 1], [], []>} : vector<256x144xbf16>, vector<144x16xbf16>, vector<256x16xf32> -> vector<256x16xf32>
    %cst_3 = arith.constant 0.000000e+00 : f32
    %3 = vector.broadcast %cst_3 : f32 to vector<256x16xf32>
    %4 = arith.subf %3, %2 : vector<256x16xf32>
    %5 = math.exp %4 : vector<256x16xf32>
    %cst_4 = arith.constant 1.000000e+00 : f32
    %6 = vector.broadcast %cst_4 : f32 to vector<256x16xf32>
    %7 = arith.addf %6, %5 : vector<256x16xf32>
    %8 = tpu.reciprocal %7 {approx = true} : vector<256x16xf32> -> vector<256x16xf32>
    %9 = arith.mulf %2, %8 : vector<256x16xf32>
    %c0_5 = arith.constant 0 : index
    %c0_6 = arith.constant 0 : index
    %10 = vector.load %arg3[%c0_5, %c0_6] : memref<256x16xf32, #tpu.memory_space<vmem>>, vector<256x16xf32>
    tpu.vector_store %arg3[%c0_5, %c0_6], %9 {strides = array<i32>} : memref<256x16xf32, #tpu.memory_space<vmem>>, vector<256x16xf32>,
    return
  }
  func.func @transform_0(%arg0: i32) -> (i32, i32) {
    %c0_i32 = arith.constant 0 : i32
    %c0_i32_0 = arith.constant 0 : i32
    return %arg0, %c0_i32 : i32, i32
  }
  func.func @transform_1(%arg0: i32) -> (i32, i32) {
    %c0_i32 = arith.constant 0 : i32
    %c0_i32_0 = arith.constant 0 : i32
    %c0_i32_1 = arith.constant 0 : i32
    return %c0_i32, %c0_i32_0 : i32, i32
  }
  func.func @transform_2(%arg0: i32) -> (i32, i32) {
    %c0_i32 = arith.constant 0 : i32
    %c0_i32_0 = arith.constant 0 : i32
    return %arg0, %c0_i32 : i32, i32
  }
}

module attributes {stable_mosaic.version = 11 : i64} {
  func.func @conv_kernel(%arg0: i32, %arg1: memref<128x144xbf16, #tpu.memory_space<vmem>>, %arg2: memref<144x32xbf16, #tpu.memory_space<vmem>>, %arg3: memref<128x32xf32, #tpu.memory_space<vmem>>) attributes {dimension_semantics = [#tpu.dimension_semantics<parallel>], iteration_bounds = array<i64: 1>, scalar_prefetch = 0 : i64, scratch_operands = 0 : i64, tpu.core_type = #tpu.core_type<tc>, window_params = [{transform_indices = @transform_0, window_bounds = array<i64: 128, 144>}, {pipeline_mode = #tpu.pipeline_mode<synchronous>, transform_indices = @transform_1, window_bounds = array<i64: 144, 32>}, {transform_indices = @transform_2, window_bounds = array<i64: 128, 32>}]} {
    %c0 = arith.constant 0 : index
    %c0_0 = arith.constant 0 : index
    %0 = vector.load %arg1[%c0, %c0_0] : memref<128x144xbf16, #tpu.memory_space<vmem>>, vector<128x144xbf16>
    %c0_1 = arith.constant 0 : index
    %c0_2 = arith.constant 0 : index
    %1 = vector.load %arg2[%c0_1, %c0_2] : memref<144x32xbf16, #tpu.memory_space<vmem>>, vector<144x32xbf16>
    %cst = arith.constant dense<0.000000e+00> : vector<128x32xf32>
    %2 = tpu.matmul %0, %1, %cst {dimension_numbers = #tpu.dot_dimension_numbers<[1], [0], [0], [1], [0, 0, 1, 1], [], []>} : vector<128x144xbf16>, vector<144x32xbf16>, vector<128x32xf32> -> vector<128x32xf32>
    %cst_3 = arith.constant 0.000000e+00 : f32
    %3 = vector.broadcast %cst_3 : f32 to vector<128x32xf32>
    %4 = arith.subf %3, %2 : vector<128x32xf32>
    %5 = math.exp %4 : vector<128x32xf32>
    %cst_4 = arith.constant 1.000000e+00 : f32
    %6 = vector.broadcast %cst_4 : f32 to vector<128x32xf32>
    %7 = arith.addf %6, %5 : vector<128x32xf32>
    %8 = tpu.reciprocal %7 {approx = true} : vector<128x32xf32> -> vector<128x32xf32>
    %9 = arith.mulf %2, %8 : vector<128x32xf32>
    %c0_5 = arith.constant 0 : index
    %c0_6 = arith.constant 0 : index
    %10 = vector.load %arg3[%c0_5, %c0_6] : memref<128x32xf32, #tpu.memory_space<vmem>>, vector<128x32xf32>
    tpu.vector_store %arg3[%c0_5, %c0_6], %9 {strides = array<i32>} : memref<128x32xf32, #tpu.memory_space<vmem>>, vector<128x32xf32>,
    return
  }
  func.func @transform_0(%arg0: i32) -> (i32, i32) {
    %c0_i32 = arith.constant 0 : i32
    %c0_i32_0 = arith.constant 0 : i32
    return %arg0, %c0_i32 : i32, i32
  }
  func.func @transform_1(%arg0: i32) -> (i32, i32) {
    %c0_i32 = arith.constant 0 : i32
    %c0_i32_0 = arith.constant 0 : i32
    %c0_i32_1 = arith.constant 0 : i32
    return %c0_i32, %c0_i32_0 : i32, i32
  }
  func.func @transform_2(%arg0: i32) -> (i32, i32) {
    %c0_i32 = arith.constant 0 : i32
    %c0_i32_0 = arith.constant 0 : i32
    return %arg0, %c0_i32 : i32, i32
  }
}

module attributes {stable_mosaic.version = 11 : i64} {
  func.func @conv_kernel(%arg0: i32, %arg1: memref<128x288xbf16, #tpu.memory_space<vmem>>, %arg2: memref<288x32xbf16, #tpu.memory_space<vmem>>, %arg3: memref<128x32xf32, #tpu.memory_space<vmem>>) attributes {dimension_semantics = [#tpu.dimension_semantics<parallel>], iteration_bounds = array<i64: 1>, scalar_prefetch = 0 : i64, scratch_operands = 0 : i64, tpu.core_type = #tpu.core_type<tc>, window_params = [{transform_indices = @transform_0, window_bounds = array<i64: 128, 288>}, {pipeline_mode = #tpu.pipeline_mode<synchronous>, transform_indices = @transform_1, window_bounds = array<i64: 288, 32>}, {transform_indices = @transform_2, window_bounds = array<i64: 128, 32>}]} {
    %c0 = arith.constant 0 : index
    %c0_0 = arith.constant 0 : index
    %0 = vector.load %arg1[%c0, %c0_0] : memref<128x288xbf16, #tpu.memory_space<vmem>>, vector<128x288xbf16>
    %c0_1 = arith.constant 0 : index
    %c0_2 = arith.constant 0 : index
    %1 = vector.load %arg2[%c0_1, %c0_2] : memref<288x32xbf16, #tpu.memory_space<vmem>>, vector<288x32xbf16>
    %cst = arith.constant dense<0.000000e+00> : vector<128x32xf32>
    %2 = tpu.matmul %0, %1, %cst {dimension_numbers = #tpu.dot_dimension_numbers<[1], [0], [0], [1], [0, 0, 1, 1], [], []>} : vector<128x288xbf16>, vector<288x32xbf16>, vector<128x32xf32> -> vector<128x32xf32>
    %cst_3 = arith.constant 0.000000e+00 : f32
    %3 = vector.broadcast %cst_3 : f32 to vector<128x32xf32>
    %4 = arith.subf %3, %2 : vector<128x32xf32>
    %5 = math.exp %4 : vector<128x32xf32>
    %cst_4 = arith.constant 1.000000e+00 : f32
    %6 = vector.broadcast %cst_4 : f32 to vector<128x32xf32>
    %7 = arith.addf %6, %5 : vector<128x32xf32>
    %8 = tpu.reciprocal %7 {approx = true} : vector<128x32xf32> -> vector<128x32xf32>
    %9 = arith.mulf %2, %8 : vector<128x32xf32>
    %c0_5 = arith.constant 0 : index
    %c0_6 = arith.constant 0 : index
    %10 = vector.load %arg3[%c0_5, %c0_6] : memref<128x32xf32, #tpu.memory_space<vmem>>, vector<128x32xf32>
    tpu.vector_store %arg3[%c0_5, %c0_6], %9 {strides = array<i32>} : memref<128x32xf32, #tpu.memory_space<vmem>>, vector<128x32xf32>,
    return
  }
  func.func @transform_0(%arg0: i32) -> (i32, i32) {
    %c0_i32 = arith.constant 0 : i32
    %c0_i32_0 = arith.constant 0 : i32
    return %arg0, %c0_i32 : i32, i32
  }
  func.func @transform_1(%arg0: i32) -> (i32, i32) {
    %c0_i32 = arith.constant 0 : i32
    %c0_i32_0 = arith.constant 0 : i32
    %c0_i32_1 = arith.constant 0 : i32
    return %c0_i32, %c0_i32_0 : i32, i32
  }
  func.func @transform_2(%arg0: i32) -> (i32, i32) {
    %c0_i32 = arith.constant 0 : i32
    %c0_i32_0 = arith.constant 0 : i32
    return %arg0, %c0_i32 : i32, i32
  }
}

module attributes {stable_mosaic.version = 11 : i64} {
  func.func @conv_dsres_kernel(%arg0: i32, %arg1: memref<128x288xbf16, #tpu.memory_space<vmem>>, %arg2: memref<288x32xbf16, #tpu.memory_space<vmem>>, %arg3: memref<128x16xbf16, #tpu.memory_space<vmem>>, %arg4: memref<16x32xbf16, #tpu.memory_space<vmem>>, %arg5: memref<1x32xf32, #tpu.memory_space<vmem>>, %arg6: memref<128x32xf32, #tpu.memory_space<vmem>>) attributes {dimension_semantics = [#tpu.dimension_semantics<parallel>], iteration_bounds = array<i64: 1>, scalar_prefetch = 0 : i64, scratch_operands = 0 : i64, tpu.core_type = #tpu.core_type<tc>, window_params = [{transform_indices = @transform_0, window_bounds = array<i64: 128, 288>}, {pipeline_mode = #tpu.pipeline_mode<synchronous>, transform_indices = @transform_1, window_bounds = array<i64: 288, 32>}, {transform_indices = @transform_2, window_bounds = array<i64: 128, 16>}, {pipeline_mode = #tpu.pipeline_mode<synchronous>, transform_indices = @transform_3, window_bounds = array<i64: 16, 32>}, {pipeline_mode = #tpu.pipeline_mode<synchronous>, transform_indices = @transform_4, window_bounds = array<i64: 1, 32>}, {transform_indices = @transform_5, window_bounds = array<i64: 128, 32>}]} {
    %c0 = arith.constant 0 : index
    %c0_0 = arith.constant 0 : index
    %0 = vector.load %arg1[%c0, %c0_0] : memref<128x288xbf16, #tpu.memory_space<vmem>>, vector<128x288xbf16>
    %c0_1 = arith.constant 0 : index
    %c0_2 = arith.constant 0 : index
    %1 = vector.load %arg2[%c0_1, %c0_2] : memref<288x32xbf16, #tpu.memory_space<vmem>>, vector<288x32xbf16>
    %cst = arith.constant dense<0.000000e+00> : vector<128x32xf32>
    %2 = tpu.matmul %0, %1, %cst {dimension_numbers = #tpu.dot_dimension_numbers<[1], [0], [0], [1], [0, 0, 1, 1], [], []>} : vector<128x288xbf16>, vector<288x32xbf16>, vector<128x32xf32> -> vector<128x32xf32>
    %c0_3 = arith.constant 0 : index
    %c0_4 = arith.constant 0 : index
    %3 = vector.load %arg3[%c0_3, %c0_4] : memref<128x16xbf16, #tpu.memory_space<vmem>>, vector<128x16xbf16>
    %c0_5 = arith.constant 0 : index
    %c0_6 = arith.constant 0 : index
    %4 = vector.load %arg4[%c0_5, %c0_6] : memref<16x32xbf16, #tpu.memory_space<vmem>>, vector<16x32xbf16>
    %cst_7 = arith.constant dense<0.000000e+00> : vector<128x32xf32>
    %5 = tpu.matmul %3, %4, %cst_7 {dimension_numbers = #tpu.dot_dimension_numbers<[1], [0], [0], [1], [0, 0, 1, 1], [], []>} : vector<128x16xbf16>, vector<16x32xbf16>, vector<128x32xf32> -> vector<128x32xf32>
    %c0_8 = arith.constant 0 : index
    %c0_9 = arith.constant 0 : index
    %6 = vector.load %arg5[%c0_8, %c0_9] : memref<1x32xf32, #tpu.memory_space<vmem>>, vector<1x32xf32>
    %7 = vector.broadcast %6 : vector<1x32xf32> to vector<128x32xf32>
    %8 = arith.addf %5, %7 : vector<128x32xf32>
    %9 = arith.addf %2, %8 : vector<128x32xf32>
    %cst_10 = arith.constant 0.000000e+00 : f32
    %10 = vector.broadcast %cst_10 : f32 to vector<128x32xf32>
    %11 = arith.subf %10, %9 : vector<128x32xf32>
    %12 = math.exp %11 : vector<128x32xf32>
    %cst_11 = arith.constant 1.000000e+00 : f32
    %13 = vector.broadcast %cst_11 : f32 to vector<128x32xf32>
    %14 = arith.addf %13, %12 : vector<128x32xf32>
    %15 = tpu.reciprocal %14 {approx = true} : vector<128x32xf32> -> vector<128x32xf32>
    %16 = arith.mulf %9, %15 : vector<128x32xf32>
    %c0_12 = arith.constant 0 : index
    %c0_13 = arith.constant 0 : index
    %17 = vector.load %arg6[%c0_12, %c0_13] : memref<128x32xf32, #tpu.memory_space<vmem>>, vector<128x32xf32>
    tpu.vector_store %arg6[%c0_12, %c0_13], %16 {strides = array<i32>} : memref<128x32xf32, #tpu.memory_space<vmem>>, vector<128x32xf32>,
    return
  }
  func.func @transform_0(%arg0: i32) -> (i32, i32) {
    %c0_i32 = arith.constant 0 : i32
    %c0_i32_0 = arith.constant 0 : i32
    return %arg0, %c0_i32 : i32, i32
  }
  func.func @transform_1(%arg0: i32) -> (i32, i32) {
    %c0_i32 = arith.constant 0 : i32
    %c0_i32_0 = arith.constant 0 : i32
    %c0_i32_1 = arith.constant 0 : i32
    return %c0_i32, %c0_i32_0 : i32, i32
  }
  func.func @transform_2(%arg0: i32) -> (i32, i32) {
    %c0_i32 = arith.constant 0 : i32
    %c0_i32_0 = arith.constant 0 : i32
    return %arg0, %c0_i32 : i32, i32
  }
  func.func @transform_3(%arg0: i32) -> (i32, i32) {
    %c0_i32 = arith.constant 0 : i32
    %c0_i32_0 = arith.constant 0 : i32
    %c0_i32_1 = arith.constant 0 : i32
    return %c0_i32, %c0_i32_0 : i32, i32
  }
  func.func @transform_4(%arg0: i32) -> (i32, i32) {
    %c0_i32 = arith.constant 0 : i32
    %c0_i32_0 = arith.constant 0 : i32
    %c0_i32_1 = arith.constant 0 : i32
    return %c0_i32, %c0_i32_0 : i32, i32
  }
  func.func @transform_5(%arg0: i32) -> (i32, i32) {
    %c0_i32 = arith.constant 0 : i32
    %c0_i32_0 = arith.constant 0 : i32
    return %arg0, %c0_i32 : i32, i32
  }
}

module attributes {stable_mosaic.version = 11 : i64} {
  func.func @conv_res_kernel(%arg0: i32, %arg1: memref<128x288xbf16, #tpu.memory_space<vmem>>, %arg2: memref<288x32xbf16, #tpu.memory_space<vmem>>, %arg3: memref<128x32xf32, #tpu.memory_space<vmem>>, %arg4: memref<128x32xf32, #tpu.memory_space<vmem>>) attributes {dimension_semantics = [#tpu.dimension_semantics<parallel>], iteration_bounds = array<i64: 1>, scalar_prefetch = 0 : i64, scratch_operands = 0 : i64, tpu.core_type = #tpu.core_type<tc>, window_params = [{transform_indices = @transform_0, window_bounds = array<i64: 128, 288>}, {pipeline_mode = #tpu.pipeline_mode<synchronous>, transform_indices = @transform_1, window_bounds = array<i64: 288, 32>}, {transform_indices = @transform_2, window_bounds = array<i64: 128, 32>}, {transform_indices = @transform_3, window_bounds = array<i64: 128, 32>}]} {
    %c0 = arith.constant 0 : index
    %c0_0 = arith.constant 0 : index
    %0 = vector.load %arg1[%c0, %c0_0] : memref<128x288xbf16, #tpu.memory_space<vmem>>, vector<128x288xbf16>
    %c0_1 = arith.constant 0 : index
    %c0_2 = arith.constant 0 : index
    %1 = vector.load %arg2[%c0_1, %c0_2] : memref<288x32xbf16, #tpu.memory_space<vmem>>, vector<288x32xbf16>
    %cst = arith.constant dense<0.000000e+00> : vector<128x32xf32>
    %2 = tpu.matmul %0, %1, %cst {dimension_numbers = #tpu.dot_dimension_numbers<[1], [0], [0], [1], [0, 0, 1, 1], [], []>} : vector<128x288xbf16>, vector<288x32xbf16>, vector<128x32xf32> -> vector<128x32xf32>
    %c0_3 = arith.constant 0 : index
    %c0_4 = arith.constant 0 : index
    %3 = vector.load %arg3[%c0_3, %c0_4] : memref<128x32xf32, #tpu.memory_space<vmem>>, vector<128x32xf32>
    %4 = arith.addf %2, %3 : vector<128x32xf32>
    %cst_5 = arith.constant 0.000000e+00 : f32
    %5 = vector.broadcast %cst_5 : f32 to vector<128x32xf32>
    %6 = arith.subf %5, %4 : vector<128x32xf32>
    %7 = math.exp %6 : vector<128x32xf32>
    %cst_6 = arith.constant 1.000000e+00 : f32
    %8 = vector.broadcast %cst_6 : f32 to vector<128x32xf32>
    %9 = arith.addf %8, %7 : vector<128x32xf32>
    %10 = tpu.reciprocal %9 {approx = true} : vector<128x32xf32> -> vector<128x32xf32>
    %11 = arith.mulf %4, %10 : vector<128x32xf32>
    %c0_7 = arith.constant 0 : index
    %c0_8 = arith.constant 0 : index
    %12 = vector.load %arg4[%c0_7, %c0_8] : memref<128x32xf32, #tpu.memory_space<vmem>>, vector<128x32xf32>
    tpu.vector_store %arg4[%c0_7, %c0_8], %11 {strides = array<i32>} : memref<128x32xf32, #tpu.memory_space<vmem>>, vector<128x32xf32>,
    return
  }
  func.func @transform_0(%arg0: i32) -> (i32, i32) {
    %c0_i32 = arith.constant 0 : i32
    %c0_i32_0 = arith.constant 0 : i32
    return %arg0, %c0_i32 : i32, i32
  }
  func.func @transform_1(%arg0: i32) -> (i32, i32) {
    %c0_i32 = arith.constant 0 : i32
    %c0_i32_0 = arith.constant 0 : i32
    %c0_i32_1 = arith.constant 0 : i32
    return %c0_i32, %c0_i32_0 : i32, i32
  }
  func.func @transform_2(%arg0: i32) -> (i32, i32) {
    %c0_i32 = arith.constant 0 : i32
    %c0_i32_0 = arith.constant 0 : i32
    return %arg0, %c0_i32 : i32, i32
  }
  func.func @transform_3(%arg0: i32) -> (i32, i32) {
    %c0_i32 = arith.constant 0 : i32
    %c0_i32_0 = arith.constant 0 : i32
    return %arg0, %c0_i32 : i32, i32
  }
}

module attributes {stable_mosaic.version = 11 : i64} {
  func.func @conv_kernel(%arg0: i32, %arg1: memref<32x288xbf16, #tpu.memory_space<vmem>>, %arg2: memref<288x64xbf16, #tpu.memory_space<vmem>>, %arg3: memref<32x64xf32, #tpu.memory_space<vmem>>) attributes {dimension_semantics = [#tpu.dimension_semantics<parallel>], iteration_bounds = array<i64: 1>, scalar_prefetch = 0 : i64, scratch_operands = 0 : i64, tpu.core_type = #tpu.core_type<tc>, window_params = [{transform_indices = @transform_0, window_bounds = array<i64: 32, 288>}, {pipeline_mode = #tpu.pipeline_mode<synchronous>, transform_indices = @transform_1, window_bounds = array<i64: 288, 64>}, {transform_indices = @transform_2, window_bounds = array<i64: 32, 64>}]} {
    %c0 = arith.constant 0 : index
    %c0_0 = arith.constant 0 : index
    %0 = vector.load %arg1[%c0, %c0_0] : memref<32x288xbf16, #tpu.memory_space<vmem>>, vector<32x288xbf16>
    %c0_1 = arith.constant 0 : index
    %c0_2 = arith.constant 0 : index
    %1 = vector.load %arg2[%c0_1, %c0_2] : memref<288x64xbf16, #tpu.memory_space<vmem>>, vector<288x64xbf16>
    %cst = arith.constant dense<0.000000e+00> : vector<32x64xf32>
    %2 = tpu.matmul %0, %1, %cst {dimension_numbers = #tpu.dot_dimension_numbers<[1], [0], [0], [1], [0, 0, 1, 1], [], []>} : vector<32x288xbf16>, vector<288x64xbf16>, vector<32x64xf32> -> vector<32x64xf32>
    %cst_3 = arith.constant 0.000000e+00 : f32
    %3 = vector.broadcast %cst_3 : f32 to vector<32x64xf32>
    %4 = arith.subf %3, %2 : vector<32x64xf32>
    %5 = math.exp %4 : vector<32x64xf32>
    %cst_4 = arith.constant 1.000000e+00 : f32
    %6 = vector.broadcast %cst_4 : f32 to vector<32x64xf32>
    %7 = arith.addf %6, %5 : vector<32x64xf32>
    %8 = tpu.reciprocal %7 {approx = true} : vector<32x64xf32> -> vector<32x64xf32>
    %9 = arith.mulf %2, %8 : vector<32x64xf32>
    %c0_5 = arith.constant 0 : index
    %c0_6 = arith.constant 0 : index
    %10 = vector.load %arg3[%c0_5, %c0_6] : memref<32x64xf32, #tpu.memory_space<vmem>>, vector<32x64xf32>
    tpu.vector_store %arg3[%c0_5, %c0_6], %9 {strides = array<i32>} : memref<32x64xf32, #tpu.memory_space<vmem>>, vector<32x64xf32>,
    return
  }
  func.func @transform_0(%arg0: i32) -> (i32, i32) {
    %c0_i32 = arith.constant 0 : i32
    %c0_i32_0 = arith.constant 0 : i32
    return %arg0, %c0_i32 : i32, i32
  }
  func.func @transform_1(%arg0: i32) -> (i32, i32) {
    %c0_i32 = arith.constant 0 : i32
    %c0_i32_0 = arith.constant 0 : i32
    %c0_i32_1 = arith.constant 0 : i32
    return %c0_i32, %c0_i32_0 : i32, i32
  }
  func.func @transform_2(%arg0: i32) -> (i32, i32) {
    %c0_i32 = arith.constant 0 : i32
    %c0_i32_0 = arith.constant 0 : i32
    return %arg0, %c0_i32 : i32, i32
  }
}

module attributes {stable_mosaic.version = 11 : i64} {
  func.func @conv_dsres_kernel(%arg0: i32, %arg1: memref<32x576xbf16, #tpu.memory_space<vmem>>, %arg2: memref<576x64xbf16, #tpu.memory_space<vmem>>, %arg3: memref<32x32xbf16, #tpu.memory_space<vmem>>, %arg4: memref<32x64xbf16, #tpu.memory_space<vmem>>, %arg5: memref<1x64xf32, #tpu.memory_space<vmem>>, %arg6: memref<32x64xf32, #tpu.memory_space<vmem>>) attributes {dimension_semantics = [#tpu.dimension_semantics<parallel>], iteration_bounds = array<i64: 1>, scalar_prefetch = 0 : i64, scratch_operands = 0 : i64, tpu.core_type = #tpu.core_type<tc>, window_params = [{transform_indices = @transform_0, window_bounds = array<i64: 32, 576>}, {pipeline_mode = #tpu.pipeline_mode<synchronous>, transform_indices = @transform_1, window_bounds = array<i64: 576, 64>}, {transform_indices = @transform_2, window_bounds = array<i64: 32, 32>}, {pipeline_mode = #tpu.pipeline_mode<synchronous>, transform_indices = @transform_3, window_bounds = array<i64: 32, 64>}, {pipeline_mode = #tpu.pipeline_mode<synchronous>, transform_indices = @transform_4, window_bounds = array<i64: 1, 64>}, {transform_indices = @transform_5, window_bounds = array<i64: 32, 64>}]} {
    %c0 = arith.constant 0 : index
    %c0_0 = arith.constant 0 : index
    %0 = vector.load %arg1[%c0, %c0_0] : memref<32x576xbf16, #tpu.memory_space<vmem>>, vector<32x576xbf16>
    %c0_1 = arith.constant 0 : index
    %c0_2 = arith.constant 0 : index
    %1 = vector.load %arg2[%c0_1, %c0_2] : memref<576x64xbf16, #tpu.memory_space<vmem>>, vector<576x64xbf16>
    %cst = arith.constant dense<0.000000e+00> : vector<32x64xf32>
    %2 = tpu.matmul %0, %1, %cst {dimension_numbers = #tpu.dot_dimension_numbers<[1], [0], [0], [1], [0, 0, 1, 1], [], []>} : vector<32x576xbf16>, vector<576x64xbf16>, vector<32x64xf32> -> vector<32x64xf32>
    %c0_3 = arith.constant 0 : index
    %c0_4 = arith.constant 0 : index
    %3 = vector.load %arg3[%c0_3, %c0_4] : memref<32x32xbf16, #tpu.memory_space<vmem>>, vector<32x32xbf16>
    %c0_5 = arith.constant 0 : index
    %c0_6 = arith.constant 0 : index
    %4 = vector.load %arg4[%c0_5, %c0_6] : memref<32x64xbf16, #tpu.memory_space<vmem>>, vector<32x64xbf16>
    %cst_7 = arith.constant dense<0.000000e+00> : vector<32x64xf32>
    %5 = tpu.matmul %3, %4, %cst_7 {dimension_numbers = #tpu.dot_dimension_numbers<[1], [0], [0], [1], [0, 0, 1, 1], [], []>} : vector<32x32xbf16>, vector<32x64xbf16>, vector<32x64xf32> -> vector<32x64xf32>
    %c0_8 = arith.constant 0 : index
    %c0_9 = arith.constant 0 : index
    %6 = vector.load %arg5[%c0_8, %c0_9] : memref<1x64xf32, #tpu.memory_space<vmem>>, vector<1x64xf32>
    %7 = vector.broadcast %6 : vector<1x64xf32> to vector<32x64xf32>
    %8 = arith.addf %5, %7 : vector<32x64xf32>
    %9 = arith.addf %2, %8 : vector<32x64xf32>
    %cst_10 = arith.constant 0.000000e+00 : f32
    %10 = vector.broadcast %cst_10 : f32 to vector<32x64xf32>
    %11 = arith.subf %10, %9 : vector<32x64xf32>
    %12 = math.exp %11 : vector<32x64xf32>
    %cst_11 = arith.constant 1.000000e+00 : f32
    %13 = vector.broadcast %cst_11 : f32 to vector<32x64xf32>
    %14 = arith.addf %13, %12 : vector<32x64xf32>
    %15 = tpu.reciprocal %14 {approx = true} : vector<32x64xf32> -> vector<32x64xf32>
    %16 = arith.mulf %9, %15 : vector<32x64xf32>
    %c0_12 = arith.constant 0 : index
    %c0_13 = arith.constant 0 : index
    %17 = vector.load %arg6[%c0_12, %c0_13] : memref<32x64xf32, #tpu.memory_space<vmem>>, vector<32x64xf32>
    tpu.vector_store %arg6[%c0_12, %c0_13], %16 {strides = array<i32>} : memref<32x64xf32, #tpu.memory_space<vmem>>, vector<32x64xf32>,
    return
  }
  func.func @transform_0(%arg0: i32) -> (i32, i32) {
    %c0_i32 = arith.constant 0 : i32
    %c0_i32_0 = arith.constant 0 : i32
    return %arg0, %c0_i32 : i32, i32
  }
  func.func @transform_1(%arg0: i32) -> (i32, i32) {
    %c0_i32 = arith.constant 0 : i32
    %c0_i32_0 = arith.constant 0 : i32
    %c0_i32_1 = arith.constant 0 : i32
    return %c0_i32, %c0_i32_0 : i32, i32
  }
  func.func @transform_2(%arg0: i32) -> (i32, i32) {
    %c0_i32 = arith.constant 0 : i32
    %c0_i32_0 = arith.constant 0 : i32
    return %arg0, %c0_i32 : i32, i32
  }
  func.func @transform_3(%arg0: i32) -> (i32, i32) {
    %c0_i32 = arith.constant 0 : i32
    %c0_i32_0 = arith.constant 0 : i32
    %c0_i32_1 = arith.constant 0 : i32
    return %c0_i32, %c0_i32_0 : i32, i32
  }
  func.func @transform_4(%arg0: i32) -> (i32, i32) {
    %c0_i32 = arith.constant 0 : i32
    %c0_i32_0 = arith.constant 0 : i32
    %c0_i32_1 = arith.constant 0 : i32
    return %c0_i32, %c0_i32_0 : i32, i32
  }
  func.func @transform_5(%arg0: i32) -> (i32, i32) {
    %c0_i32 = arith.constant 0 : i32
    %c0_i32_0 = arith.constant 0 : i32
    return %arg0, %c0_i32 : i32, i32
  }
}

module attributes {stable_mosaic.version = 11 : i64} {
  func.func @conv_kernel(%arg0: i32, %arg1: memref<32x576xbf16, #tpu.memory_space<vmem>>, %arg2: memref<576x64xbf16, #tpu.memory_space<vmem>>, %arg3: memref<32x64xf32, #tpu.memory_space<vmem>>) attributes {dimension_semantics = [#tpu.dimension_semantics<parallel>], iteration_bounds = array<i64: 1>, scalar_prefetch = 0 : i64, scratch_operands = 0 : i64, tpu.core_type = #tpu.core_type<tc>, window_params = [{transform_indices = @transform_0, window_bounds = array<i64: 32, 576>}, {pipeline_mode = #tpu.pipeline_mode<synchronous>, transform_indices = @transform_1, window_bounds = array<i64: 576, 64>}, {transform_indices = @transform_2, window_bounds = array<i64: 32, 64>}]} {
    %c0 = arith.constant 0 : index
    %c0_0 = arith.constant 0 : index
    %0 = vector.load %arg1[%c0, %c0_0] : memref<32x576xbf16, #tpu.memory_space<vmem>>, vector<32x576xbf16>
    %c0_1 = arith.constant 0 : index
    %c0_2 = arith.constant 0 : index
    %1 = vector.load %arg2[%c0_1, %c0_2] : memref<576x64xbf16, #tpu.memory_space<vmem>>, vector<576x64xbf16>
    %cst = arith.constant dense<0.000000e+00> : vector<32x64xf32>
    %2 = tpu.matmul %0, %1, %cst {dimension_numbers = #tpu.dot_dimension_numbers<[1], [0], [0], [1], [0, 0, 1, 1], [], []>} : vector<32x576xbf16>, vector<576x64xbf16>, vector<32x64xf32> -> vector<32x64xf32>
    %cst_3 = arith.constant 0.000000e+00 : f32
    %3 = vector.broadcast %cst_3 : f32 to vector<32x64xf32>
    %4 = arith.subf %3, %2 : vector<32x64xf32>
    %5 = math.exp %4 : vector<32x64xf32>
    %cst_4 = arith.constant 1.000000e+00 : f32
    %6 = vector.broadcast %cst_4 : f32 to vector<32x64xf32>
    %7 = arith.addf %6, %5 : vector<32x64xf32>
    %8 = tpu.reciprocal %7 {approx = true} : vector<32x64xf32> -> vector<32x64xf32>
    %9 = arith.mulf %2, %8 : vector<32x64xf32>
    %c0_5 = arith.constant 0 : index
    %c0_6 = arith.constant 0 : index
    %10 = vector.load %arg3[%c0_5, %c0_6] : memref<32x64xf32, #tpu.memory_space<vmem>>, vector<32x64xf32>
    tpu.vector_store %arg3[%c0_5, %c0_6], %9 {strides = array<i32>} : memref<32x64xf32, #tpu.memory_space<vmem>>, vector<32x64xf32>,
    return
  }
  func.func @transform_0(%arg0: i32) -> (i32, i32) {
    %c0_i32 = arith.constant 0 : i32
    %c0_i32_0 = arith.constant 0 : i32
    return %arg0, %c0_i32 : i32, i32
  }
  func.func @transform_1(%arg0: i32) -> (i32, i32) {
    %c0_i32 = arith.constant 0 : i32
    %c0_i32_0 = arith.constant 0 : i32
    %c0_i32_1 = arith.constant 0 : i32
    return %c0_i32, %c0_i32_0 : i32, i32
  }
  func.func @transform_2(%arg0: i32) -> (i32, i32) {
    %c0_i32 = arith.constant 0 : i32
    %c0_i32_0 = arith.constant 0 : i32
    return %arg0, %c0_i32 : i32, i32
  }
}

module attributes {stable_mosaic.version = 11 : i64} {
  func.func @conv_res_kernel(%arg0: i32, %arg1: memref<32x576xbf16, #tpu.memory_space<vmem>>, %arg2: memref<576x64xbf16, #tpu.memory_space<vmem>>, %arg3: memref<32x64xf32, #tpu.memory_space<vmem>>, %arg4: memref<32x64xf32, #tpu.memory_space<vmem>>) attributes {dimension_semantics = [#tpu.dimension_semantics<parallel>], iteration_bounds = array<i64: 1>, scalar_prefetch = 0 : i64, scratch_operands = 0 : i64, tpu.core_type = #tpu.core_type<tc>, window_params = [{transform_indices = @transform_0, window_bounds = array<i64: 32, 576>}, {pipeline_mode = #tpu.pipeline_mode<synchronous>, transform_indices = @transform_1, window_bounds = array<i64: 576, 64>}, {transform_indices = @transform_2, window_bounds = array<i64: 32, 64>}, {transform_indices = @transform_3, window_bounds = array<i64: 32, 64>}]} {
    %c0 = arith.constant 0 : index
    %c0_0 = arith.constant 0 : index
    %0 = vector.load %arg1[%c0, %c0_0] : memref<32x576xbf16, #tpu.memory_space<vmem>>, vector<32x576xbf16>
    %c0_1 = arith.constant 0 : index
    %c0_2 = arith.constant 0 : index
    %1 = vector.load %arg2[%c0_1, %c0_2] : memref<576x64xbf16, #tpu.memory_space<vmem>>, vector<576x64xbf16>
    %cst = arith.constant dense<0.000000e+00> : vector<32x64xf32>
    %2 = tpu.matmul %0, %1, %cst {dimension_numbers = #tpu.dot_dimension_numbers<[1], [0], [0], [1], [0, 0, 1, 1], [], []>} : vector<32x576xbf16>, vector<576x64xbf16>, vector<32x64xf32> -> vector<32x64xf32>
    %c0_3 = arith.constant 0 : index
    %c0_4 = arith.constant 0 : index
    %3 = vector.load %arg3[%c0_3, %c0_4] : memref<32x64xf32, #tpu.memory_space<vmem>>, vector<32x64xf32>
    %4 = arith.addf %2, %3 : vector<32x64xf32>
    %cst_5 = arith.constant 0.000000e+00 : f32
    %5 = vector.broadcast %cst_5 : f32 to vector<32x64xf32>
    %6 = arith.subf %5, %4 : vector<32x64xf32>
    %7 = math.exp %6 : vector<32x64xf32>
    %cst_6 = arith.constant 1.000000e+00 : f32
    %8 = vector.broadcast %cst_6 : f32 to vector<32x64xf32>
    %9 = arith.addf %8, %7 : vector<32x64xf32>
    %10 = tpu.reciprocal %9 {approx = true} : vector<32x64xf32> -> vector<32x64xf32>
    %11 = arith.mulf %4, %10 : vector<32x64xf32>
    %c0_7 = arith.constant 0 : index
    %c0_8 = arith.constant 0 : index
    %12 = vector.load %arg4[%c0_7, %c0_8] : memref<32x64xf32, #tpu.memory_space<vmem>>, vector<32x64xf32>
    tpu.vector_store %arg4[%c0_7, %c0_8], %11 {strides = array<i32>} : memref<32x64xf32, #tpu.memory_space<vmem>>, vector<32x64xf32>,
    return
  }
  func.func @transform_0(%arg0: i32) -> (i32, i32) {
    %c0_i32 = arith.constant 0 : i32
    %c0_i32_0 = arith.constant 0 : i32
    return %arg0, %c0_i32 : i32, i32
  }
  func.func @transform_1(%arg0: i32) -> (i32, i32) {
    %c0_i32 = arith.constant 0 : i32
    %c0_i32_0 = arith.constant 0 : i32
    %c0_i32_1 = arith.constant 0 : i32
    return %c0_i32, %c0_i32_0 : i32, i32
  }
  func.func @transform_2(%arg0: i32) -> (i32, i32) {
    %c0_i32 = arith.constant 0 : i32
    %c0_i32_0 = arith.constant 0 : i32
    return %arg0, %c0_i32 : i32, i32
  }
  func.func @transform_3(%arg0: i32) -> (i32, i32) {
    %c0_i32 = arith.constant 0 : i32
    %c0_i32_0 = arith.constant 0 : i32
    return %arg0, %c0_i32 : i32, i32
  }
}

module attributes {stable_mosaic.version = 11 : i64} {
  func.func @head_kernel(%arg0: memref<2x16x64xf32, #tpu.memory_space<vmem>>, %arg1: memref<64x10xf32, #tpu.memory_space<vmem>>, %arg2: memref<1x10xf32, #tpu.memory_space<vmem>>, %arg3: memref<2x10xf32, #tpu.memory_space<vmem>>) attributes {dimension_semantics = [], scalar_prefetch = 0 : i64, scratch_operands = 0 : i64, tpu.core_type = #tpu.core_type<tc>} {
    %c0 = arith.constant 0 : index
    %c0_0 = arith.constant 0 : index
    %c0_1 = arith.constant 0 : index
    %0 = vector.load %arg0[%c0, %c0_0, %c0_1] : memref<2x16x64xf32, #tpu.memory_space<vmem>>, vector<2x16x64xf32>
    %cst = arith.constant dense<0.000000e+00> : vector<2x64xf32>
    %1 = vector.multi_reduction <add>, %0, %cst [1] : vector<2x16x64xf32> to vector<2x64xf32>
    %cst_2 = arith.constant 1.600000e+01 : f32
    %2 = vector.broadcast %cst_2 : f32 to vector<2x64xf32>
    %3 = arith.divf %1, %2 : vector<2x64xf32>
    %c0_3 = arith.constant 0 : index
    %c0_4 = arith.constant 0 : index
    %4 = vector.load %arg1[%c0_3, %c0_4] : memref<64x10xf32, #tpu.memory_space<vmem>>, vector<64x10xf32>
    %cst_5 = arith.constant dense<0.000000e+00> : vector<2x10xf32>
    %5 = tpu.matmul %3, %4, %cst_5 {dimension_numbers = #tpu.dot_dimension_numbers<[1], [0], [0], [1], [0, 0, 1, 1], [], []>} : vector<2x64xf32>, vector<64x10xf32>, vector<2x10xf32> -> vector<2x10xf32>
    %c0_6 = arith.constant 0 : index
    %c0_7 = arith.constant 0 : index
    %6 = vector.load %arg2[%c0_6, %c0_7] : memref<1x10xf32, #tpu.memory_space<vmem>>, vector<1x10xf32>
    %7 = vector.broadcast %6 : vector<1x10xf32> to vector<2x10xf32>
    %8 = arith.addf %5, %7 : vector<2x10xf32>
    %c0_8 = arith.constant 0 : index
    %c0_9 = arith.constant 0 : index
    %9 = vector.load %arg3[%c0_8, %c0_9] : memref<2x10xf32, #tpu.memory_space<vmem>>, vector<2x10xf32>
    tpu.vector_store %arg3[%c0_8, %c0_9], %8 {strides = array<i32>} : memref<2x10xf32, #tpu.memory_space<vmem>>, vector<2x10xf32>,
    return
  }
}

</mosaic_0001>

<bundles_post_ra>
// kernel: forward.20
= control target key start
LH: loop header
LB: loop body
LE: loop exit
PB: predicated region body
PF: predicated region fallthrough
CT: control target
= control target key end

     0   :  { %s1020_s9 = smov 0   ;;  %s1276_s0 = inlined_call_operand.vmem [shape: bf16[512,72], index: 0, kind: input, shape index: {}]   ;;  %s1277_s1 = inlined_call_operand.vmem [shape: bf16[72,16], index: 1, kind: input, shape index: {}]   ;;  %s1278_s2 = inlined_call_operand.vmem [shape: f32[512,16], index: 2, kind: output, shape index: {}]  }
   0x1 LB: > { %s719_s10 = sadd.s32 4294967295, %s1003_s9   ;;  %p723_p0 = scmp.ge.s32.totalorder %s1003_s9, 1  ;;  %s1003_s9 = sphi %s1020_s9, %s12_s9  }
   0x2   : > { %p113_p1 = scmp.lt.s32.totalorder %s1003_s9, 3 }
   0x4   : > { %p114_p2 = pnand %p723_p0, %p113_p1 }
   0x5   : > { %s724_s13 = sshll.u32 (!%p114_p2), %s719_s10, 5 }
   0x6   : > { %117 = sbr.rel (%p114_p2) target bundleno = 255 (0xff), region = 28  ;;  %p136_p3 = scmp.lt.s32.totalorder (!%p114_p2), %s724_s13, 63 }
   0xb   : > { %v188_v0 = vld [vmem:[%s1277_s1 + $0x20] sm:$0xf]  ;;  %vm345_vm0 = vcmask 1043456   ;;  %v845_v4 = vld [vmem:[%s1277_s1 + $0x18] sm:$0xff]  ;;  %v844_v5 = vld [vmem:[%s1277_s1 + $0x10] sm:$0xff]  ;;  %s1280_s13 = smov (!%p136_p3, %s724_s13), 63 }
   0xc   : > { %v286_v1 = vunpack.c.l.b16 %v188_v0  ;;  %v843_v6 = vld [vmem:[%s1277_s1 + $0x8] sm:$0xff]  ;;  %s725_s20 = sshll.u32 %s1280_s13, 2  ;;  %v842_v7 = vld [vmem:[%s1277_s1] sm:$0xff]  ;;  %vm296_vm1 = vcmask 588800   ;;  %s727_s26 = sshll.u32 %s1280_s13, 3  ;;  %vm630_vm2 = vcmask 130048  }
   0xd   : > { %s1049_s25 = scalar_lea.vmem %s1276_s0, %s725_s20  ;;  %s1111_s29 = scalar_lea.vmem %s1278_s2, %s727_s26 }
   0xe   : > { %v291_v2 = vpack.c.b16 %v286_v1, %v286_v1  ;;  %v826_v8 = vld [vmem:[%s1049_s25] sm:$0xff]  ;;  %v827_v12 = vld [vmem:[%s1049_s25 + $0x8] sm:$0xff]  ;;  %v828_v16 = vld [vmem:[%s1049_s25 + $0x10] sm:$0xff] }
   0xf   : > { %v830_v9 = vld [vmem:[%s1049_s25 + $0x20] sm:$0xff]  ;;  %v831_v13 = vld [vmem:[%s1049_s25 + $0x28] sm:$0xff]  ;;  %v832_v17 = vld [vmem:[%s1049_s25 + $0x30] sm:$0xff] }
  0x10   : > { %v347_v3 = vsel %vm345_vm0, %v291_v2, 0  ;;  %v834_v10 = vld [vmem:[%s1049_s25 + $0x40] sm:$0xff]  ;;  %v835_v14 = vld [vmem:[%s1049_s25 + $0x48] sm:$0xff]  ;;  %v836_v18 = vld [vmem:[%s1049_s25 + $0x50] sm:$0xff] }
  0x11   : > { %352 = vmatpush.bf16.msra.mxu0 %v347_v3  ;;  %846 = vmatpush.bf16.msra.mxu1 %v347_v3  ;;  %v838_v11 = vld [vmem:[%s1049_s25 + $0x60] sm:$0xff]  ;;  %v839_v15 = vld [vmem:[%s1049_s25 + $0x68] sm:$0xff]  ;;  %v840_v19 = vld [vmem:[%s1049_s25 + $0x70] sm:$0xff] }
  0x12   : > { %847 = vmatpush.bf16.msra.mxu2 %v347_v3  ;;  %848 = vmatpush.bf16.msra.mxu3 %v347_v3  ;;  %v829_v20 = vld [vmem:[%s1049_s25 + $0x18] sm:$0xff] }
  0x13   : > { %v833_v21 = vld [vmem:[%s1049_s25 + $0x38] sm:$0xff] }
  0x14   : > { %v837_v22 = vld [vmem:[%s1049_s25 + $0x58] sm:$0xff] }
  0x15   : > { %353 = vmatpush.bf16.msra.mxu0 %v845_v4  ;;  %849 = vmatpush.bf16.msra.mxu1 %v845_v4  ;;  %v841_v23 = vld [vmem:[%s1049_s25 + $0x78] sm:$0xff] }
  0x16   : > { %850 = vmatpush.bf16.msra.mxu2 %v845_v4  ;;  %851 = vmatpush.bf16.msra.mxu3 %v845_v4 }
  0x19   : > { %354 = vmatpush.bf16.msra.mxu0 %v844_v5  ;;  %852 = vmatpush.bf16.msra.mxu1 %v844_v5 }
  0x1a   : > { %853 = vmatpush.bf16.msra.mxu2 %v844_v5  ;;  %854 = vmatpush.bf16.msra.mxu3 %v844_v5 }
  0x1d   : > { %355 = vmatpush.bf16.msra.mxu0 %v843_v6  ;;  %855 = vmatpush.bf16.msra.mxu1 %v843_v6 }
  0x1e   : > { %856 = vmatpush.bf16.msra.mxu2 %v843_v6  ;;  %857 = vmatpush.bf16.msra.mxu3 %v843_v6 }
  0x21   : > { %356 = vmatpush.bf16.msra.mxu0 %v842_v7  ;;  %858 = vmatpush.bf16.msra.mxu1 %v842_v7 }
  0x22   : > { %859 = vmatpush.bf16.msra.mxu2 %v842_v7  ;;  %860 = vmatpush.bf16.msra.mxu3 %v842_v7 }
  0x24   : > { %808 = vmatmul.msk.bf16.vlgmr.msra.gmra.mxu0 %vm296_vm1, %v826_v8  ;;  %812 = vmatmul.msk.bf16.vlgmr.msra.gmra.mxu1 %vm296_vm1, %v830_v9 }
  0x25   : > { %816 = vmatmul.msk.bf16.vlgmr.msra.gmra.mxu2 %vm296_vm1, %v834_v10  ;;  %820 = vmatmul.msk.bf16.vlgmr.msra.gmra.mxu3 %vm296_vm1, %v838_v11 }
  0x34   : > { %809 = vmatmul.msk.bf16.gmra.mxu0 %vm296_vm1, %v827_v12  ;;  %813 = vmatmul.msk.bf16.gmra.mxu1 %vm296_vm1, %v831_v13 }
  0x35   : > { %817 = vmatmul.msk.bf16.gmra.mxu2 %vm296_vm1, %v835_v14  ;;  %821 = vmatmul.msk.bf16.gmra.mxu3 %vm296_vm1, %v839_v15 }
  0x44   : > { %810 = vmatmul.msk.bf16.gmra.mxu0 %vm296_vm1, %v828_v16  ;;  %814 = vmatmul.msk.bf16.gmra.mxu1 %vm296_vm1, %v832_v17 }
  0x45   : > { %818 = vmatmul.msk.bf16.gmra.mxu2 %vm296_vm1, %v836_v18  ;;  %822 = vmatmul.msk.bf16.gmra.mxu3 %vm296_vm1, %v840_v19 }
  0x54   : > { %811 = vmatmul.msk.bf16.gmra.mxu0 %vm296_vm1, %v829_v20  ;;  %815 = vmatmul.msk.bf16.gmra.mxu1 %vm296_vm1, %v833_v21 }
  0x55   : > { %819 = vmatmul.msk.bf16.gmra.mxu2 %vm296_vm1, %v837_v22  ;;  %823 = vmatmul.msk.bf16.gmra.mxu3 %vm296_vm1, %v841_v23 }
  0xa1   : > { %v358_v24 = vpop.f32.mrf.mxu0  ;;  %v378_v25 = vpop.f32.mrf.mxu1 }
  0xa2   : > { %v438_v26 = vsub.f32 0.0, %v358_v24  ;;  %v446_v27 = vsub.f32 0.0, %v378_v25 }
  0xa4   : > { %v470_v28 = vmul.f32 1.442695, %v438_v26  ;;  %v486_v29 = vmul.f32 1.442695, %v446_v27 }
  0xa6   : > { %869 = vpow2.f32 %v470_v28 }
  0xa7   : > { %871 = vpow2.f32 %v486_v29 }
  0xa8   : > { %v1083_v30 = vpop.f32.mrf.mxu2  ;;  %v1085_v31 = vpop.f32.mrf.mxu3 }
  0xa9   : > { %v454_v32 = vsub.f32 0.0, %v1083_v30  ;;  %v462_v33 = vsub.f32 0.0, %v1085_v31  ;;  %v1089_v34 = vpop.f32.mrf.mxu0  ;;  %v1091_v35 = vpop.f32.mrf.mxu1 }
  0xaa   : > { %v439_v36 = vsub.f32 0.0, %v1089_v34  ;;  %v447_v37 = vsub.f32 0.0, %v1091_v35 }
  0xab   : > { %v502_v38 = vmul.f32 1.442695, %v454_v32  ;;  %v518_v39 = vmul.f32 1.442695, %v462_v33 }
  0xac   : > { %v870_v40 = vpop.eup %869  ;;  %v472_v43 = vmul.f32 1.442695, %v439_v36  ;;  %v488_v45 = vmul.f32 1.442695, %v447_v37 }
  0xad   : > { %v872_v41 = vpop.eup %871  ;;  %v534_v42 = vadd.f32 1.0, %v870_v40  ;;  %873 = vpow2.f32 %v502_v38 }
  0xae   : > { %v542_v44 = vadd.f32 1.0, %v872_v41  ;;  %875 = vpow2.f32 %v518_v39 }
  0xaf   : > { %877 = vrcp.f32 %v534_v42 }
  0xb0   : > { %879 = vrcp.f32 %v542_v44  ;;  %v1095_v46 = vpop.f32.mrf.mxu2  ;;  %v1097_v47 = vpop.f32.mrf.mxu3 }
  0xb1   : > { %881 = vpow2.f32 %v472_v43  ;;  %v455_v48 = vsub.f32 0.0, %v1095_v46  ;;  %v463_v49 = vsub.f32 0.0, %v1097_v47  ;;  %v1101_v50 = vpop.f32.mrf.mxu0  ;;  %v1103_v51 = vpop.f32.mrf.mxu1 }
  0xb2   : > { %883 = vpow2.f32 %v488_v45  ;;  %v440_v52 = vsub.f32 0.0, %v1101_v50  ;;  %v448_v58 = vsub.f32 0.0, %v1103_v51 }
  0xb3   : > { %v874_v53 = vpop.eup %873  ;;  %v504_v54 = vmul.f32 1.442695, %v455_v48  ;;  %v520_v57 = vmul.f32 1.442695, %v463_v49 }
  0xb4   : > { %v876_v55 = vpop.eup %875  ;;  %v550_v56 = vadd.f32 1.0, %v874_v53  ;;  %v474_v61 = vmul.f32 1.442695, %v440_v52  ;;  %v490_v4 = vmul.f32 1.442695, %v448_v58 }
  0xb5   : > { %v878_v59 = vpop.eup %877  ;;  %v558_v60 = vadd.f32 1.0, %v876_v55  ;;  %885 = vpow2.f32 %v504_v54 }
  0xb6   : > { %v880_v62 = vpop.eup %879  ;;  %v598_v63 = vmul.f32 %v878_v59, %v358_v24  ;;  %887 = vrcp.f32 %v550_v56 }
  0xb7   : > { %v882_v0 = vpop.eup %881  ;;  %v606_v1 = vmul.f32 %v880_v62, %v378_v25  ;;  %889 = vrcp.f32 %v558_v60 }
  0xb8   : > { %v884_v2 = vpop.eup %883  ;;  %631 = vst.msk [vmem:[%s1111_s29] sm:$0xff] %vm630_vm2, %v598_v63  ;;  %v535_v3 = vadd.f32 1.0, %v882_v0  ;;  %891 = vpow2.f32 %v520_v57  ;;  %v1115_v5 = vpop.f32.mrf.mxu2 }
  0xb9   : > { %v1117_v6 = vpop.f32.mrf.mxu3  ;;  %639 = vst.msk [vmem:[%s1111_s29 + $0x40] sm:$0xff] %vm630_vm2, %v606_v1  ;;  %v543_v7 = vadd.f32 1.0, %v884_v2  ;;  %893 = vpow2.f32 %v474_v61  ;;  %v456_v8 = vsub.f32 0.0, %v1115_v5  ;;  %v1123_v10 = vpop.f32.mrf.mxu0 }
  0xba   : > { %v464_v9 = vsub.f32 0.0, %v1117_v6  ;;  %v1125_v11 = vpop.f32.mrf.mxu1  ;;  %895 = vrcp.f32 %v535_v3  ;;  %v441_v12 = vsub.f32 0.0, %v1123_v10 }
  0xbb   : > { %v886_v13 = vpop.eup %885  ;;  %897 = vrcp.f32 %v543_v7  ;;  %v506_v14 = vmul.f32 1.442695, %v456_v8  ;;  %v449_v16 = vsub.f32 0.0, %v1125_v11 }
  0xbc   : > { %v522_v15 = vmul.f32 1.442695, %v464_v9  ;;  %v888_v17 = vpop.eup %887  ;;  %v551_v18 = vadd.f32 1.0, %v886_v13  ;;  %899 = vpow2.f32 %v490_v4  ;;  %v476_v19 = vmul.f32 1.442695, %v441_v12 }
  0xbd   : > { %v890_v20 = vpop.eup %889  ;;  %v614_v21 = vmul.f32 %v888_v17, %v1083_v30  ;;  %901 = vpow2.f32 %v506_v14  ;;  %v492_v26 = vmul.f32 1.442695, %v449_v16 }
  0xbe   : > { %v892_v22 = vpop.eup %891  ;;  %v622_v23 = vmul.f32 %v890_v20, %v1085_v31  ;;  %903 = vrcp.f32 %v551_v18 }
  0xbf   : > { %v894_v24 = vpop.eup %893  ;;  %647 = vst.msk [vmem:[%s1111_s29 + $0x80] sm:$0xff] %vm630_vm2, %v614_v21  ;;  %v559_v25 = vadd.f32 1.0, %v892_v22  ;;  %905 = vpow2.f32 %v522_v15 }
  0xc0   : > { %v896_v27 = vpop.eup %895  ;;  %655 = vst.msk [vmem:[%s1111_s29 + $0xc0] sm:$0xff] %vm630_vm2, %v622_v23  ;;  %v536_v28 = vadd.f32 1.0, %v894_v24  ;;  %907 = vpow2.f32 %v476_v19  ;;  %v1135_v29 = vpop.f32.mrf.mxu2 }
  0xc1   : > { %v1137_v30 = vpop.f32.mrf.mxu3  ;;  %v898_v32 = vpop.eup %897  ;;  %v599_v31 = vmul.f32 %v896_v27, %v1089_v34  ;;  %909 = vrcp.f32 %v559_v25  ;;  %v457_v33 = vsub.f32 0.0, %v1135_v29 }
  0xc2   : > { %v1141_v36 = vpop.f32.mrf.mxu0  ;;  %v1143_v37 = vpop.f32.mrf.mxu1  ;;  %v607_v39 = vmul.f32 %v898_v32, %v1091_v35  ;;  %911 = vrcp.f32 %v536_v28  ;;  %v465_v40 = vsub.f32 0.0, %v1137_v30 }
  0xc3   : > { %v900_v38 = vpop.eup %899  ;;  %632 = vst.msk [vmem:[%s1111_s29 + $0x8] sm:$0xff] %vm630_vm2, %v599_v31  ;;  %913 = vpow2.f32 %v492_v26  ;;  %v508_v34 = vmul.f32 1.442695, %v457_v33  ;;  %v442_v43 = vsub.f32 0.0, %v1141_v36  ;;  %v450_v48 = vsub.f32 0.0, %v1143_v37 }
  0xc4   : > { %v902_v41 = vpop.eup %901  ;;  %v544_v42 = vadd.f32 1.0, %v900_v38  ;;  %640 = vst.msk [vmem:[%s1111_s29 + $0x48] sm:$0xff] %vm630_vm2, %v607_v39  ;;  %v524_v54 = vmul.f32 1.442695, %v465_v40 }
  0xc5   : > { %v904_v44 = vpop.eup %903  ;;  %v552_v45 = vadd.f32 1.0, %v902_v41  ;;  %v478_v57 = vmul.f32 1.442695, %v442_v43  ;;  %v494_v60 = vmul.f32 1.442695, %v450_v48 }
  0xc6   : > { %v906_v49 = vpop.eup %905  ;;  %v615_v35 = vmul.f32 %v904_v44, %v1095_v46  ;;  %915 = vrcp.f32 %v544_v42 }
  0xc7   : > { %v908_v52 = vpop.eup %907  ;;  %917 = vrcp.f32 %v552_v45  ;;  %v560_v53 = vadd.f32 1.0, %v906_v49 }
  0xc8   : > { %v910_v55 = vpop.eup %909  ;;  %648 = vst.msk [vmem:[%s1111_s29 + $0x88] sm:$0xff] %vm630_vm2, %v615_v35  ;;  %v537_v56 = vadd.f32 1.0, %v908_v52  ;;  %919 = vpow2.f32 %v508_v34  ;;  %v1157_v61 = vpop.f32.mrf.mxu2 }
  0xc9   : > { %v912_v58 = vpop.eup %911  ;;  %v623_v59 = vmul.f32 %v910_v55, %v1097_v47  ;;  %921 = vrcp.f32 %v560_v53  ;;  %v1159_v46 = vpop.f32.mrf.mxu3  ;;  %v458_v0 = vsub.f32 0.0, %v1157_v61 }
  0xca   : > { %v914_v62 = vpop.eup %913  ;;  %v600_v63 = vmul.f32 %v912_v58, %v1101_v50  ;;  %923 = vrcp.f32 %v537_v56  ;;  %v466_v1 = vsub.f32 0.0, %v1159_v46  ;;  %v1164_v2 = vpop.f32.mrf.mxu0 }
  0xcb   : > { %v1166_v3 = vpop.f32.mrf.mxu1  ;;  %656 = vst.msk [vmem:[%s1111_s29 + $0xc8] sm:$0xff] %vm630_vm2, %v623_v59  ;;  %v545_v47 = vadd.f32 1.0, %v914_v62  ;;  %925 = vpow2.f32 %v524_v54  ;;  %v443_v4 = vsub.f32 0.0, %v1164_v2  ;;  %v510_v50 = vmul.f32 1.442695, %v458_v0 }
  0xcc   : > { %v451_v7 = vsub.f32 0.0, %v1166_v3  ;;  %v916_v8 = vpop.eup %915  ;;  %633 = vst.msk [vmem:[%s1111_s29 + $0x10] sm:$0xff] %vm630_vm2, %v600_v63  ;;  %927 = vpow2.f32 %v478_v57  ;;  %v526_v9 = vmul.f32 1.442695, %v466_v1 }
  0xcd   : > { %v918_v12 = vpop.eup %917  ;;  %v608_v13 = vmul.f32 %v916_v8, %v1103_v51  ;;  %929 = vrcp.f32 %v545_v47  ;;  %v480_v16 = vmul.f32 1.442695, %v443_v4 }
  0xce   : > { %v920_v14 = vpop.eup %919  ;;  %v616_v15 = vmul.f32 %v918_v12, %v1115_v5  ;;  %931 = vpow2.f32 %v494_v60  ;;  %v496_v19 = vmul.f32 1.442695, %v451_v7 }
  0xcf   : > { %v922_v17 = vpop.eup %921  ;;  %641 = vst.msk [vmem:[%s1111_s29 + $0x50] sm:$0xff] %vm630_vm2, %v608_v13  ;;  %v553_v18 = vadd.f32 1.0, %v920_v14  ;;  %933 = vpow2.f32 %v510_v50 }
  0xd0   : > { %v924_v20 = vpop.eup %923  ;;  %649 = vst.msk [vmem:[%s1111_s29 + $0x90] sm:$0xff] %vm630_vm2, %v616_v15  ;;  %v624_v21 = vmul.f32 %v922_v17, %v1117_v6  ;;  %935 = vpow2.f32 %v526_v9  ;;  %v1182_v5 = vpop.f32.mrf.mxu2 }
  0xd1   : > { %v926_v51 = vpop.eup %925  ;;  %v601_v22 = vmul.f32 %v924_v20, %v1123_v10  ;;  %937 = vrcp.f32 %v553_v18  ;;  %v1184_v23 = vpop.f32.mrf.mxu3  ;;  %v459_v26 = vsub.f32 0.0, %v1182_v5 }
  0xd2   : > { %v928_v24 = vpop.eup %927  ;;  %657 = vst.msk [vmem:[%s1111_s29 + $0xd0] sm:$0xff] %vm630_vm2, %v624_v21  ;;  %v561_v25 = vadd.f32 1.0, %v926_v51  ;;  %939 = vpow2.f32 %v480_v16  ;;  %v467_v27 = vsub.f32 0.0, %v1184_v23  ;;  %v1190_v6 = vpop.f32.mrf.mxu0 }
  0xd3   : > { %v1192_v28 = vpop.f32.mrf.mxu1  ;;  %v930_v10 = vpop.eup %929  ;;  %634 = vst.msk [vmem:[%s1111_s29 + $0x18] sm:$0xff] %vm630_vm2, %v601_v22  ;;  %v538_v32 = vadd.f32 1.0, %v928_v24  ;;  %941 = vpow2.f32 %v496_v19  ;;  %v512_v38 = vmul.f32 1.442695, %v459_v26  ;;  %v444_v41 = vsub.f32 0.0, %v1190_v6 }
  0xd4   : > { %v932_v31 = vpop.eup %931  ;;  %v609_v33 = vmul.f32 %v930_v10, %v1125_v11  ;;  %943 = vrcp.f32 %v561_v25  ;;  %v452_v42 = vsub.f32 0.0, %v1192_v28  ;;  %v528_v44 = vmul.f32 1.442695, %v467_v27 }
  0xd5   : > { %v934_v39 = vpop.eup %933  ;;  %945 = vrcp.f32 %v538_v32  ;;  %v546_v40 = vadd.f32 1.0, %v932_v31  ;;  %v482_v53 = vmul.f32 1.442695, %v444_v41 }
  0xd6   : > { %v936_v34 = vpop.eup %935  ;;  %642 = vst.msk [vmem:[%s1111_s29 + $0x58] sm:$0xff] %vm630_vm2, %v609_v33  ;;  %v554_v43 = vadd.f32 1.0, %v934_v39  ;;  %947 = vpow2.f32 %v512_v38  ;;  %v498_v54 = vmul.f32 1.442695, %v452_v42 }
  0xd7   : > { %v938_v45 = vpop.eup %937  ;;  %949 = vrcp.f32 %v546_v40  ;;  %v562_v48 = vadd.f32 1.0, %v936_v34 }
  0xd8   : > { %v940_v11 = vpop.eup %939  ;;  %v617_v49 = vmul.f32 %v938_v45, %v1135_v29  ;;  %951 = vrcp.f32 %v554_v43  ;;  %v1202_v55 = vpop.f32.mrf.mxu2 }
  0xd9   : > { %v942_v35 = vpop.eup %941  ;;  %953 = vrcp.f32 %v562_v48  ;;  %v539_v52 = vadd.f32 1.0, %v940_v11  ;;  %v1204_v56 = vpop.f32.mrf.mxu3  ;;  %v460_v59 = vsub.f32 0.0, %v1202_v55 }
  0xda   : > { %v944_v57 = vpop.eup %943  ;;  %650 = vst.msk [vmem:[%s1111_s29 + $0x98] sm:$0xff] %vm630_vm2, %v617_v49  ;;  %v547_v58 = vadd.f32 1.0, %v942_v35  ;;  %955 = vpow2.f32 %v528_v44  ;;  %v468_v29 = vsub.f32 0.0, %v1204_v56  ;;  %v1210_v60 = vpop.f32.mrf.mxu0 }
  0xdb   : > { %v1212_v62 = vpop.f32.mrf.mxu1  ;;  %v946_v63 = vpop.eup %945  ;;  %v625_v0 = vmul.f32 %v944_v57, %v1137_v30  ;;  %957 = vrcp.f32 %v539_v52  ;;  %v445_v1 = vsub.f32 0.0, %v1210_v60  ;;  %v514_v7 = vmul.f32 1.442695, %v460_v59 }
  0xdc   : > { %v948_v47 = vpop.eup %947  ;;  %v602_v4 = vmul.f32 %v946_v63, %v1141_v36  ;;  %959 = vrcp.f32 %v547_v58  ;;  %v453_v8 = vsub.f32 0.0, %v1212_v62  ;;  %v530_v12 = vmul.f32 1.442695, %v468_v29 }
  0xdd   : > { %v950_v50 = vpop.eup %949  ;;  %658 = vst.msk [vmem:[%s1111_s29 + $0xd8] sm:$0xff] %vm630_vm2, %v625_v0  ;;  %v555_v9 = vadd.f32 1.0, %v948_v47  ;;  %961 = vpow2.f32 %v482_v53  ;;  %v484_v14 = vmul.f32 1.442695, %v445_v1 }
  0xde   : > { %v952_v13 = vpop.eup %951  ;;  %635 = vst.msk [vmem:[%s1111_s29 + $0x20] sm:$0xff] %vm630_vm2, %v602_v4  ;;  %v610_v30 = vmul.f32 %v950_v50, %v1143_v37  ;;  %963 = vpow2.f32 %v498_v54  ;;  %v500_v18 = vmul.f32 1.442695, %v453_v8 }
  0xdf   : > { %v954_v36 = vpop.eup %953  ;;  %v618_v15 = vmul.f32 %v952_v13, %v1157_v61  ;;  %965 = vrcp.f32 %v555_v9 }
  0xe0   : > { %v956_v16 = vpop.eup %955  ;;  %643 = vst.msk [vmem:[%s1111_s29 + $0x60] sm:$0xff] %vm630_vm2, %v610_v30  ;;  %v626_v17 = vmul.f32 %v954_v36, %v1159_v46  ;;  %967 = vpow2.f32 %v514_v7  ;;  %v1229_v37 = vpop.f32.mrf.mxu2 }
  0xe1   : > { %v958_v19 = vpop.eup %957  ;;  %651 = vst.msk [vmem:[%s1111_s29 + $0xa0] sm:$0xff] %vm630_vm2, %v618_v15  ;;  %v563_v20 = vadd.f32 1.0, %v956_v16  ;;  %969 = vpow2.f32 %v530_v12  ;;  %v1231_v21 = vpop.f32.mrf.mxu3  ;;  %v461_v46 = vsub.f32 0.0, %v1229_v37 }
  0xe2   : > { %v960_v61 = vpop.eup %959  ;;  %659 = vst.msk [vmem:[%s1111_s29 + $0xe0] sm:$0xff] %vm630_vm2, %v626_v17  ;;  %v603_v51 = vmul.f32 %v958_v19, %v1164_v2  ;;  %971 = vpow2.f32 %v484_v14  ;;  %v469_v10 = vsub.f32 0.0, %v1231_v21 }
  0xe3   : > { %v962_v22 = vpop.eup %961  ;;  %v611_v24 = vmul.f32 %v960_v61, %v1166_v3  ;;  %973 = vrcp.f32 %v563_v20  ;;  %v516_v27 = vmul.f32 1.442695, %v461_v46 }
  0xe4   : > { %v964_v25 = vpop.eup %963  ;;  %636 = vst.msk [vmem:[%s1111_s29 + $0x28] sm:$0xff] %vm630_vm2, %v603_v51  ;;  %v540_v26 = vadd.f32 1.0, %v962_v22  ;;  %975 = vpow2.f32 %v500_v18  ;;  %v532_v41 = vmul.f32 1.442695, %v469_v10 }
  0xe5   : > { %v966_v32 = vpop.eup %965  ;;  %644 = vst.msk [vmem:[%s1111_s29 + $0x68] sm:$0xff] %vm630_vm2, %v611_v24  ;;  %v548_v2 = vadd.f32 1.0, %v964_v25 }
  0xe6   : > { %v968_v31 = vpop.eup %967  ;;  %v619_v33 = vmul.f32 %v966_v32, %v1182_v5  ;;  %977 = vrcp.f32 %v540_v26 }
  0xe7   : > { %v970_v38 = vpop.eup %969  ;;  %979 = vrcp.f32 %v548_v2  ;;  %v556_v3 = vadd.f32 1.0, %v968_v31 }
  0xe8   : > { %v972_v39 = vpop.eup %971  ;;  %652 = vst.msk [vmem:[%s1111_s29 + $0xa8] sm:$0xff] %vm630_vm2, %v619_v33  ;;  %v564_v40 = vadd.f32 1.0, %v970_v38  ;;  %981 = vpow2.f32 %v516_v27 }
  0xe9   : > { %v974_v42 = vpop.eup %973  ;;  %983 = vrcp.f32 %v556_v3  ;;  %v541_v34 = vadd.f32 1.0, %v972_v39 }
  0xea   : > { %v976_v43 = vpop.eup %975  ;;  %v627_v44 = vmul.f32 %v974_v42, %v1184_v23  ;;  %985 = vrcp.f32 %v564_v40 }
  0xeb   : > { %987 = vrcp.f32 %v541_v34  ;;  %v549_v5 = vadd.f32 1.0, %v976_v43 }
  0xec   : > { %v978_v45 = vpop.eup %977  ;;  %660 = vst.msk [vmem:[%s1111_s29 + $0xe8] sm:$0xff] %vm630_vm2, %v627_v44  ;;  %989 = vpow2.f32 %v532_v41 }
  0xed   : > { %v980_v48 = vpop.eup %979  ;;  %v604_v11 = vmul.f32 %v978_v45, %v1190_v6  ;;  %991 = vrcp.f32 %v549_v5 }
  0xee   : > { %v982_v49 = vpop.eup %981  ;;  %v612_v35 = vmul.f32 %v980_v48, %v1192_v28 }
  0xef   : > { %v984_v52 = vpop.eup %983  ;;  %637 = vst.msk [vmem:[%s1111_s29 + $0x30] sm:$0xff] %vm630_vm2, %v604_v11  ;;  %v557_v23 = vadd.f32 1.0, %v982_v49 }
  0xf0   : > { %v986_v53 = vpop.eup %985  ;;  %645 = vst.msk [vmem:[%s1111_s29 + $0x70] sm:$0xff] %vm630_vm2, %v612_v35  ;;  %v620_v54 = vmul.f32 %v984_v52, %v1202_v55 }
  0xf1   : > { %v988_v57 = vpop.eup %987  ;;  %v628_v6 = vmul.f32 %v986_v53, %v1204_v56  ;;  %993 = vrcp.f32 %v557_v23 }
  0xf2   : > { %v990_v58 = vpop.eup %989  ;;  %653 = vst.msk [vmem:[%s1111_s29 + $0xb0] sm:$0xff] %vm630_vm2, %v620_v54  ;;  %v605_v28 = vmul.f32 %v988_v57, %v1210_v60 }
  0xf3   : > { %v992_v59 = vpop.eup %991  ;;  %661 = vst.msk [vmem:[%s1111_s29 + $0xf0] sm:$0xff] %vm630_vm2, %v628_v6  ;;  %v565_v29 = vadd.f32 1.0, %v990_v58 }
  0xf4   : > { %638 = vst.msk [vmem:[%s1111_s29 + $0x38] sm:$0xff] %vm630_vm2, %v605_v28  ;;  %v613_v63 = vmul.f32 %v992_v59, %v1212_v62 }
  0xf5   : > { %995 = vrcp.f32 %v565_v29 }
  0xf6   : > { %646 = vst.msk [vmem:[%s1111_s29 + $0x78] sm:$0xff] %vm630_vm2, %v613_v63 }
  0xf7   : > { %v994_v55 = vpop.eup %993 }
  0xf8   : > { %v621_v56 = vmul.f32 %v994_v55, %v1229_v37 }
  0xfa   : > { %654 = vst.msk [vmem:[%s1111_s29 + $0xb8] sm:$0xff] %vm630_vm2, %v621_v56 }
  0xfb   : > { %v996_v0 = vpop.eup %995 }
  0xfc   : > { %v629_v1 = vmul.f32 %v996_v0, %v1231_v21 }
  0xfe   : > { %662 = vst.msk [vmem:[%s1111_s29 + $0xf8] sm:$0xff] %vm630_vm2, %v629_v1 }
  0xff PF: > { %s12_s9 = sadd.s32 1, %s1003_s9  }
 0x100   : > { %p9_p4 = scmp.ge.s32.totalorder %s12_s9, 4  }
 0x102   :  { %11 = sbr.rel (!%p9_p4) target bundleno = 1 (0x1), region = 58 }

// kernel: forward.21
= control target key start
LH: loop header
LB: loop body
LE: loop exit
PB: predicated region body
PF: predicated region fallthrough
CT: control target
= control target key end

     0   :  { %s1308_s9 = smov 0   ;;  %s1612_s0 = inlined_call_operand.vmem [shape: bf16[512,144], index: 0, kind: input, shape index: {}]   ;;  %s1613_s1 = inlined_call_operand.vmem [shape: bf16[144,16], index: 1, kind: input, shape index: {}]   ;;  %s1614_s2 = inlined_call_operand.vmem [shape: f32[512,16], index: 2, kind: output, shape index: {}]  }
   0x1 LB: > { %s906_s10 = sadd.s32 4294967295, %s1291_s9   ;;  %p910_p0 = scmp.ge.s32.totalorder %s1291_s9, 1  ;;  %s1291_s9 = sphi %s1308_s9, %s12_s9  }
   0x2   : > { %p114_p1 = scmp.lt.s32.totalorder %s1291_s9, 3 }
   0x4   : > { %p115_p2 = pnand %p910_p0, %p114_p1 }
   0x5   : > { %s911_s15 = sshll.u32 (!%p115_p2), %s906_s10, 5 }
   0x6   : > { %118 = sbr.rel (%p115_p2) target bundleno = 320 (0x140), region = 28  ;;  %p138_p3 = scmp.lt.s32.totalorder (!%p115_p2), %s911_s15, 63 }
   0xb   : > { %v1138_v0 = vld [vmem:[%s1613_s1 + $0x38] sm:$0xff]  ;;  %v1139_v1 = vld [vmem:[%s1613_s1 + $0x40] sm:$0xff]  ;;  %v1137_v2 = vld [vmem:[%s1613_s1 + $0x30] sm:$0xff]  ;;  %s1616_s15 = smov (!%p138_p3, %s911_s15), 63  ;;  %vm399_vm0 = vcmask 130048  }
   0xc   : > { %448 = vmatpush.bf16.msra.mxu0 %v1138_v0  ;;  %1140 = vmatpush.bf16.msra.mxu2 %v1138_v0  ;;  %s1098_s18 = sshll.u32 %s1616_s15, 3  ;;  %v1136_v3 = vld [vmem:[%s1613_s1 + $0x28] sm:$0xff]  ;;  %v1135_v7 = vld [vmem:[%s1613_s1 + $0x20] sm:$0xff]  ;;  %v1134_v11 = vld [vmem:[%s1613_s1 + $0x18] sm:$0xff] }
   0xd   : > { %544 = vmatpush.bf16.msra.mxu1 %v1139_v1  ;;  %1148 = vmatpush.bf16.msra.mxu3 %v1139_v1  ;;  %s1333_s21 = scalar_lea.vmem %s1612_s0, %s1098_s18  ;;  %v1133_v12 = vld [vmem:[%s1613_s1 + $0x10] sm:$0xff]  ;;  %v1132_v16 = vld [vmem:[%s1613_s1 + $0x8] sm:$0xff]  ;;  %v1131_v20 = vld [vmem:[%s1613_s1] sm:$0xff]  ;;  %s1442_s8 = scalar_lea.vmem %s1614_s2, %s1098_s18 }
   0xe   : > { %v1099_v4 = vld [vmem:[%s1333_s21 + $0x4] sm:$0xf]  ;;  %v920_v5 = vld [vmem:[%s1333_s21 + $0x8] sm:$0xf0]  ;;  %v1117_v8 = vld [vmem:[%s1333_s21 + $0x94] sm:$0xf] }
   0xf   : > { %v923_v6 = vor.u32 %v1099_v4, %v920_v5  ;;  %v992_v9 = vld [vmem:[%s1333_s21 + $0x98] sm:$0xf0]  ;;  %v1101_v13 = vld [vmem:[%s1333_s21 + $0x14] sm:$0xf]  ;;  %v1119_v17 = vld [vmem:[%s1333_s21 + $0xa4] sm:$0xf] }
  0x10   : > { %449 = vmatpush.bf16.msra.mxu0 %v1137_v2  ;;  %1141 = vmatpush.bf16.msra.mxu2 %v1137_v2  ;;  %v995_v10 = vor.u32 %v1117_v8, %v992_v9  ;;  %v928_v14 = vld [vmem:[%s1333_s21 + $0x18] sm:$0xf0]  ;;  %v1000_v18 = vld [vmem:[%s1333_s21 + $0xa8] sm:$0xf0]  ;;  %v918_v21 = vld [vmem:[%s1333_s21] sm:$0xf] }
  0x11   : > { %1080 = vmatmul.msk.bf16.vlgmr.msra.gmra.mxu1 %vm399_vm0, %v923_v6  ;;  %v931_v15 = vor.u32 %v1101_v13, %v928_v14  ;;  %v1003_v19 = vor.u32 %v1119_v17, %v1000_v18  ;;  %v1100_v22 = vld [vmem:[%s1333_s21 + $0x4] sm:$0xf0]  ;;  %v982_v23 = vld [vmem:[%s1333_s21 + $0x80] sm:$0xf]  ;;  %v1103_v27 = vld [vmem:[%s1333_s21 + $0x24] sm:$0xf] }
  0x12   : > { %1089 = vmatmul.msk.bf16.vlgmr.msra.gmra.mxu3 %vm399_vm0, %v995_v10  ;;  %v1116_v24 = vld [vmem:[%s1333_s21 + $0x84] sm:$0xf0]  ;;  %v919_v25 = vor.u32 %v1100_v22, %v918_v21  ;;  %v936_v28 = vld [vmem:[%s1333_s21 + $0x28] sm:$0xf0]  ;;  %v1121_v30 = vld [vmem:[%s1333_s21 + $0xb4] sm:$0xf] }
  0x13   : > { %v983_v26 = vor.u32 %v1116_v24, %v982_v23  ;;  %v939_v29 = vor.u32 %v1103_v27, %v936_v28  ;;  %v1008_v31 = vld [vmem:[%s1333_s21 + $0xb8] sm:$0xf0]  ;;  %v926_v33 = vld [vmem:[%s1333_s21 + $0x10] sm:$0xf]  ;;  %v1102_v34 = vld [vmem:[%s1333_s21 + $0x14] sm:$0xf0] }
  0x14   : > { %450 = vmatpush.bf16.msra.mxu0 %v1136_v3  ;;  %1142 = vmatpush.bf16.msra.mxu2 %v1136_v3  ;;  %v1011_v32 = vor.u32 %v1121_v30, %v1008_v31  ;;  %v990_v35 = vld [vmem:[%s1333_s21 + $0x90] sm:$0xf]  ;;  %v1118_v36 = vld [vmem:[%s1333_s21 + $0x94] sm:$0xf0]  ;;  %v927_v37 = vor.u32 %v1102_v34, %v926_v33  ;;  %v1105_v39 = vld [vmem:[%s1333_s21 + $0x34] sm:$0xf] }
  0x15   : > { %v991_v38 = vor.u32 %v1118_v36, %v990_v35  ;;  %v944_v40 = vld [vmem:[%s1333_s21 + $0x38] sm:$0xf0]  ;;  %v1123_v42 = vld [vmem:[%s1333_s21 + $0xc4] sm:$0xf]  ;;  %v1016_v43 = vld [vmem:[%s1333_s21 + $0xc8] sm:$0xf0] }
  0x16   : > { %v947_v41 = vor.u32 %v1105_v39, %v944_v40  ;;  %v1019_v44 = vor.u32 %v1123_v42, %v1016_v43  ;;  %v934_v45 = vld [vmem:[%s1333_s21 + $0x20] sm:$0xf]  ;;  %v1104_v46 = vld [vmem:[%s1333_s21 + $0x24] sm:$0xf0]  ;;  %v1107_v51 = vld [vmem:[%s1333_s21 + $0x44] sm:$0xf] }
  0x17   : > { %v998_v47 = vld [vmem:[%s1333_s21 + $0xa0] sm:$0xf]  ;;  %v1120_v48 = vld [vmem:[%s1333_s21 + $0xa4] sm:$0xf0]  ;;  %v935_v49 = vor.u32 %v1104_v46, %v934_v45  ;;  %v952_v52 = vld [vmem:[%s1333_s21 + $0x48] sm:$0xf0] }
  0x18   : > { %451 = vmatpush.bf16.msra.mxu0 %v1135_v7  ;;  %1143 = vmatpush.bf16.msra.mxu2 %v1135_v7  ;;  %v999_v50 = vor.u32 %v1120_v48, %v998_v47  ;;  %v955_v53 = vor.u32 %v1107_v51, %v952_v52  ;;  %v1125_v54 = vld [vmem:[%s1333_s21 + $0xd4] sm:$0xf]  ;;  %v1024_v55 = vld [vmem:[%s1333_s21 + $0xd8] sm:$0xf0]  ;;  %v942_v57 = vld [vmem:[%s1333_s21 + $0x30] sm:$0xf] }
  0x19   : > { %v1027_v56 = vor.u32 %v1125_v54, %v1024_v55  ;;  %v1106_v58 = vld [vmem:[%s1333_s21 + $0x34] sm:$0xf0]  ;;  %v1006_v59 = vld [vmem:[%s1333_s21 + $0xb0] sm:$0xf]  ;;  %v1109_v63 = vld [vmem:[%s1333_s21 + $0x54] sm:$0xf] }
  0x1a   : > { %v1122_v60 = vld [vmem:[%s1333_s21 + $0xb4] sm:$0xf0]  ;;  %v943_v61 = vor.u32 %v1106_v58, %v942_v57  ;;  %v960_v0 = vld [vmem:[%s1333_s21 + $0x58] sm:$0xf0]  ;;  %v1127_v2 = vld [vmem:[%s1333_s21 + $0xe4] sm:$0xf] }
  0x1b   : > { %v1007_v62 = vor.u32 %v1122_v60, %v1006_v59  ;;  %v963_v1 = vor.u32 %v1109_v63, %v960_v0  ;;  %v1032_v3 = vld [vmem:[%s1333_s21 + $0xe8] sm:$0xf0]  ;;  %v950_v5 = vld [vmem:[%s1333_s21 + $0x40] sm:$0xf]  ;;  %v1108_v6 = vld [vmem:[%s1333_s21 + $0x44] sm:$0xf0] }
  0x1c   : > { %452 = vmatpush.bf16.msra.mxu0 %v1134_v11  ;;  %1144 = vmatpush.bf16.msra.mxu2 %v1134_v11  ;;  %v1035_v4 = vor.u32 %v1127_v2, %v1032_v3  ;;  %v1014_v7 = vld [vmem:[%s1333_s21 + $0xc0] sm:$0xf]  ;;  %v1124_v8 = vld [vmem:[%s1333_s21 + $0xc4] sm:$0xf0]  ;;  %v951_v9 = vor.u32 %v1108_v6, %v950_v5  ;;  %v1111_v11 = vld [vmem:[%s1333_s21 + $0x64] sm:$0xf] }
  0x1d   : > { %v1015_v10 = vor.u32 %v1124_v8, %v1014_v7  ;;  %v1129_v14 = vld [vmem:[%s1333_s21 + $0xf4] sm:$0xf]  ;;  %v958_v17 = vld [vmem:[%s1333_s21 + $0x50] sm:$0xf]  ;;  %v1110_v18 = vld [vmem:[%s1333_s21 + $0x54] sm:$0xf0] }
  0x1e   : > { %v959_v21 = vor.u32 %v1110_v18, %v958_v17  ;;  %v1113_v23 = vld [vmem:[%s1333_s21 + $0x74] sm:$0xf]  ;;  %v976_v24 = vld [vmem:[%s1333_s21 + $0x78] sm:$0xf0]  ;;  %v1112_v27 = vld [vmem:[%s1333_s21 + $0x64] sm:$0xf0] }
  0x1f   : > { %v1030_v28 = vld [vmem:[%s1333_s21 + $0xe0] sm:$0xf]  ;;  %v984_v33 = vld [vmem:[%s1333_s21 + $0x88] sm:$0xf0]  ;;  %v974_v36 = vld [vmem:[%s1333_s21 + $0x70] sm:$0xf] }
  0x20   : > { %453 = vmatpush.bf16.msra.mxu0 %v1133_v12  ;;  %1145 = vmatpush.bf16.msra.mxu2 %v1133_v12  ;;  %v968_v12 = vld [vmem:[%s1333_s21 + $0x68] sm:$0xf0]  ;;  %v1130_v39 = vld [vmem:[%s1333_s21 + $0xf4] sm:$0xf0] }
  0x21   : > { %1081 = vmatmul.msk.bf16.gmra.mxu1 %vm399_vm0, %v931_v15  ;;  %v971_v13 = vor.u32 %v1111_v11, %v968_v12  ;;  %v1040_v15 = vld [vmem:[%s1333_s21 + $0xf8] sm:$0xf0] }
  0x22   : > { %1090 = vmatmul.msk.bf16.gmra.mxu3 %vm399_vm0, %v1003_v19  ;;  %v1022_v19 = vld [vmem:[%s1333_s21 + $0xd0] sm:$0xf] }
  0x24   : > { %454 = vmatpush.bf16.msra.mxu0 %v1132_v16  ;;  %1146 = vmatpush.bf16.msra.mxu2 %v1132_v16  ;;  %v1043_v16 = vor.u32 %v1129_v14, %v1040_v15 }
  0x28   : > { %455 = vmatpush.bf16.msra.mxu0 %v1131_v20  ;;  %1147 = vmatpush.bf16.msra.mxu2 %v1131_v20  ;;  %v1126_v20 = vld [vmem:[%s1333_s21 + $0xd4] sm:$0xf0] }
  0x29   : > { %v1023_v22 = vor.u32 %v1126_v20, %v1022_v19 }
  0x2b   : > { %456 = vmatmul.bf16.vlgmr.msra.gmra.mxu0 %v919_v25  ;;  %496 = vmatmul.bf16.vlgmr.msra.gmra.mxu2 %v983_v26  ;;  %v979_v25 = vor.u32 %v1113_v23, %v976_v24  ;;  %v966_v26 = vld [vmem:[%s1333_s21 + $0x60] sm:$0xf] }
  0x2c   : > { %v967_v30 = vor.u32 %v1112_v27, %v966_v26 }
  0x31   : > { %1082 = vmatmul.msk.bf16.gmra.mxu1 %vm399_vm0, %v939_v29  ;;  %v1128_v29 = vld [vmem:[%s1333_s21 + $0xe4] sm:$0xf0] }
  0x32   : > { %1091 = vmatmul.msk.bf16.gmra.mxu3 %vm399_vm0, %v1011_v32  ;;  %v1031_v31 = vor.u32 %v1128_v29, %v1030_v28  ;;  %v1115_v32 = vld [vmem:[%s1333_s21 + $0x84] sm:$0xf] }
  0x33   : > { %v987_v34 = vor.u32 %v1115_v32, %v984_v33 }
  0x3b   : > { %461 = vmatmul.bf16.gmra.mxu0 %v927_v37  ;;  %501 = vmatmul.bf16.gmra.mxu2 %v991_v38  ;;  %v1114_v37 = vld [vmem:[%s1333_s21 + $0x74] sm:$0xf0]  ;;  %v1038_v38 = vld [vmem:[%s1333_s21 + $0xf0] sm:$0xf] }
  0x3c   : > { %v975_v40 = vor.u32 %v1114_v37, %v974_v36 }
  0x41   : > { %1083 = vmatmul.msk.bf16.gmra.mxu1 %vm399_vm0, %v947_v41  ;;  %v1039_v41 = vor.u32 %v1130_v39, %v1038_v38 }
  0x42   : > { %1092 = vmatmul.msk.bf16.gmra.mxu3 %vm399_vm0, %v1019_v44 }
  0x4b   : > { %466 = vmatmul.bf16.gmra.mxu0 %v935_v49  ;;  %506 = vmatmul.bf16.gmra.mxu2 %v999_v50 }
  0x51   : > { %1084 = vmatmul.msk.bf16.gmra.mxu1 %vm399_vm0, %v955_v53 }
  0x52   : > { %1093 = vmatmul.msk.bf16.gmra.mxu3 %vm399_vm0, %v1027_v56 }
  0x5b   : > { %471 = vmatmul.bf16.gmra.mxu0 %v943_v61  ;;  %511 = vmatmul.bf16.gmra.mxu2 %v1007_v62 }
  0x61   : > { %1085 = vmatmul.msk.bf16.gmra.mxu1 %vm399_vm0, %v963_v1 }
  0x62   : > { %1094 = vmatmul.msk.bf16.gmra.mxu3 %vm399_vm0, %v1035_v4 }
  0x6b   : > { %476 = vmatmul.bf16.gmra.mxu0 %v951_v9  ;;  %516 = vmatmul.bf16.gmra.mxu2 %v1015_v10 }
  0x71   : > { %1086 = vmatmul.msk.bf16.gmra.mxu1 %vm399_vm0, %v971_v13 }
  0x72   : > { %1095 = vmatmul.msk.bf16.gmra.mxu3 %vm399_vm0, %v1043_v16 }
  0x7b   : > { %481 = vmatmul.bf16.gmra.mxu0 %v959_v21  ;;  %521 = vmatmul.bf16.gmra.mxu2 %v1023_v22 }
  0x81   : > { %1087 = vmatmul.msk.bf16.gmra.mxu1 %vm399_vm0, %v979_v25 }
  0x8b   : > { %486 = vmatmul.bf16.gmra.mxu0 %v967_v30  ;;  %526 = vmatmul.bf16.gmra.mxu2 %v1031_v31 }
  0x8e   : > { %v546_v35 = vpop.f32.mrf.mxu1 }
  0x91   : > { %1088 = vmatmul.msk.bf16.gmra.mxu1 %vm399_vm0, %v987_v34 }
  0x95   : > { %v591_v44 = vpop.f32.mrf.mxu3 }
  0x96   : > { %v548_v42 = vpop.f32.mrf.mxu1 }
  0x9b   : > { %491 = vmatmul.bf16.gmra.mxu0 %v975_v40  ;;  %531 = vmatmul.bf16.gmra.mxu2 %v1039_v41 }
  0x9d   : > { %v593_v51 = vpop.f32.mrf.mxu3 }
  0x9e   : > { %v551_v43 = vpop.f32.mrf.mxu1 }
  0xa5   : > { %v596_v63 = vpop.f32.mrf.mxu3 }
  0xa6   : > { %v553_v47 = vpop.f32.mrf.mxu1 }
  0xa8   : > { %v457_v45 = vpop.f32.mrf.mxu0 }
  0xa9   : > { %v547_v46 = vadd.f32 %v546_v35, %v457_v45 }
  0xab   : > { %v626_v48 = vsub.f32 0.0, %v547_v46 }
  0xad   : > { %v658_v49 = vmul.f32 1.442695, %v626_v48  ;;  %v598_v13 = vpop.f32.mrf.mxu3 }
  0xae   : > { %v1433_v50 = vpop.f32.mrf.mxu2  ;;  %v556_v54 = vpop.f32.mrf.mxu1 }
  0xaf   : > { %1157 = vpow2.f32 %v658_v49 }
  0xb0   : > { %v459_v52 = vpop.f32.mrf.mxu0 }
  0xb1   : > { %v549_v53 = vadd.f32 %v548_v42, %v459_v52 }
  0xb3   : > { %v627_v55 = vsub.f32 0.0, %v549_v53 }
  0xb5   : > { %v1158_v56 = vpop.eup %1157  ;;  %v660_v57 = vmul.f32 1.442695, %v627_v55  ;;  %v601_v32 = vpop.f32.mrf.mxu3 }
  0xb6   : > { %v722_v58 = vadd.f32 1.0, %v1158_v56  ;;  %v1435_v59 = vpop.f32.mrf.mxu2  ;;  %v558_v62 = vpop.f32.mrf.mxu1 }
  0xb7   : > { %1159 = vpow2.f32 %v660_v57 }
  0xb8   : > { %1161 = vrcp.f32 %v722_v58  ;;  %v462_v60 = vpop.f32.mrf.mxu0 }
  0xb9   : > { %v552_v61 = vadd.f32 %v551_v43, %v462_v60 }
  0xbb   : > { %v628_v0 = vsub.f32 0.0, %v552_v61 }
  0xbd   : > { %v1160_v1 = vpop.eup %1159  ;;  %v662_v2 = vmul.f32 1.442695, %v628_v0 }
  0xbe   : > { %v1162_v3 = vpop.eup %1161  ;;  %v723_v4 = vadd.f32 1.0, %v1160_v1  ;;  %v502_v6 = vpop.f32.mrf.mxu2 }
  0xbf   : > { %v786_v5 = vmul.f32 %v1162_v3, %v547_v46  ;;  %1163 = vpow2.f32 %v662_v2  ;;  %v592_v7 = vadd.f32 %v591_v44, %v502_v6  ;;  %v561_v10 = vpop.f32.mrf.mxu1 }
  0xc0   : > { %1165 = vrcp.f32 %v723_v4  ;;  %v464_v8 = vpop.f32.mrf.mxu0 }
  0xc1   : > { %818 = vst.msk [vmem:[%s1442_s8] sm:$0xff] %vm399_vm0, %v786_v5  ;;  %v554_v9 = vadd.f32 %v553_v47, %v464_v8  ;;  %v644_v11 = vsub.f32 0.0, %v592_v7 }
  0xc3   : > { %v629_v12 = vsub.f32 0.0, %v554_v9  ;;  %v694_v14 = vmul.f32 1.442695, %v644_v11 }
  0xc5   : > { %v1164_v15 = vpop.eup %1163  ;;  %v664_v16 = vmul.f32 1.442695, %v629_v12  ;;  %1167 = vpow2.f32 %v694_v14 }
  0xc6   : > { %v1166_v17 = vpop.eup %1165  ;;  %v724_v18 = vadd.f32 1.0, %v1164_v15  ;;  %v504_v20 = vpop.f32.mrf.mxu2 }
  0xc7   : > { %v787_v19 = vmul.f32 %v1166_v17, %v549_v53  ;;  %1169 = vpow2.f32 %v664_v16  ;;  %v594_v21 = vadd.f32 %v593_v51, %v504_v20  ;;  %v1450_v24 = vpop.f32.mrf.mxu1 }
  0xc8   : > { %1171 = vrcp.f32 %v724_v18  ;;  %v467_v22 = vpop.f32.mrf.mxu0 }
  0xc9   : > { %819 = vst.msk [vmem:[%s1442_s8 + $0x8] sm:$0xff] %vm399_vm0, %v787_v19  ;;  %v1448_v23 = vadd.f32 %v556_v54, %v467_v22  ;;  %v645_v25 = vsub.f32 0.0, %v594_v21  ;;  %v603_v54 = vpop.f32.mrf.mxu3 }
  0xcb   : > { %v630_v26 = vsub.f32 0.0, %v1448_v23  ;;  %v1168_v27 = vpop.eup %1167  ;;  %v696_v28 = vmul.f32 1.442695, %v645_v25 }
  0xcc   : > { %v740_v30 = vadd.f32 1.0, %v1168_v27 }
  0xcd   : > { %v1170_v29 = vpop.eup %1169  ;;  %v666_v31 = vmul.f32 1.442695, %v630_v26  ;;  %1173 = vpow2.f32 %v696_v28 }
  0xce   : > { %v1172_v33 = vpop.eup %1171  ;;  %v725_v34 = vadd.f32 1.0, %v1170_v29  ;;  %1175 = vrcp.f32 %v740_v30  ;;  %v507_v36 = vpop.f32.mrf.mxu2 }
  0xcf   : > { %v788_v35 = vmul.f32 %v1172_v33, %v552_v61  ;;  %v597_v37 = vadd.f32 %v596_v63, %v507_v36  ;;  %v1457_v40 = vpop.f32.mrf.mxu1 }
  0xd0   : > { %1177 = vrcp.f32 %v725_v34  ;;  %v469_v38 = vpop.f32.mrf.mxu0 }
  0xd1   : > { %820 = vst.msk [vmem:[%s1442_s8 + $0x10] sm:$0xff] %vm399_vm0, %v788_v35  ;;  %1179 = vpow2.f32 %v666_v31  ;;  %v1455_v39 = vadd.f32 %v558_v62, %v469_v38  ;;  %v646_v41 = vsub.f32 0.0, %v597_v37  ;;  %v606_v14 = vpop.f32.mrf.mxu3 }
  0xd3   : > { %v631_v42 = vsub.f32 0.0, %v1455_v39  ;;  %v1174_v43 = vpop.eup %1173  ;;  %v698_v44 = vmul.f32 1.442695, %v646_v41 }
  0xd4   : > { %v1176_v45 = vpop.eup %1175  ;;  %v741_v46 = vadd.f32 1.0, %v1174_v43 }
  0xd5   : > { %v668_v47 = vmul.f32 1.442695, %v631_v42  ;;  %v804_v49 = vmul.f32 %v1176_v45, %v592_v7  ;;  %1181 = vpow2.f32 %v698_v44 }
  0xd6   : > { %v1178_v48 = vpop.eup %1177  ;;  %1183 = vrcp.f32 %v741_v46  ;;  %v509_v53 = vpop.f32.mrf.mxu2 }
  0xd7   : > { %v1180_v51 = vpop.eup %1179  ;;  %v789_v52 = vmul.f32 %v1178_v48, %v554_v9  ;;  %836 = vst.msk [vmem:[%s1442_s8 + $0x90] sm:$0xff] %vm399_vm0, %v804_v49  ;;  %1185 = vpow2.f32 %v668_v47  ;;  %v599_v56 = vadd.f32 %v598_v13, %v509_v53  ;;  %v1466_v60 = vpop.f32.mrf.mxu1 }
  0xd8   : > { %v726_v55 = vadd.f32 1.0, %v1180_v51  ;;  %v472_v57 = vpop.f32.mrf.mxu0 }
  0xd9   : > { %821 = vst.msk [vmem:[%s1442_s8 + $0x18] sm:$0xff] %vm399_vm0, %v789_v52  ;;  %v1464_v58 = vadd.f32 %v561_v10, %v472_v57  ;;  %v647_v61 = vsub.f32 0.0, %v599_v56  ;;  %v608_v34 = vpop.f32.mrf.mxu3 }
  0xda   : > { %1187 = vrcp.f32 %v726_v55 }
  0xdb   : > { %v632_v62 = vsub.f32 0.0, %v1464_v58  ;;  %v1182_v63 = vpop.eup %1181  ;;  %v700_v0 = vmul.f32 1.442695, %v647_v61 }
  0xdc   : > { %v1184_v1 = vpop.eup %1183  ;;  %v742_v2 = vadd.f32 1.0, %v1182_v63 }
  0xdd   : > { %v670_v3 = vmul.f32 1.442695, %v632_v62  ;;  %v1186_v4 = vpop.eup %1185  ;;  %v805_v5 = vmul.f32 %v1184_v1, %v594_v21  ;;  %1189 = vpow2.f32 %v700_v0 }
  0xde   : > { %1191 = vrcp.f32 %v742_v2  ;;  %v727_v6 = vadd.f32 1.0, %v1186_v4  ;;  %v512_v7 = vpop.f32.mrf.mxu2 }
  0xdf   : > { %837 = vst.msk [vmem:[%s1442_s8 + $0x98] sm:$0xff] %vm399_vm0, %v805_v5  ;;  %1193 = vpow2.f32 %v670_v3  ;;  %v1471_v9 = vadd.f32 %v601_v32, %v512_v7  ;;  %v1477_v13 = vpop.f32.mrf.mxu1 }
  0xe0   : > { %v1188_v8 = vpop.eup %1187  ;;  %v474_v10 = vpop.f32.mrf.mxu0  ;;  %1195 = vrcp.f32 %v727_v6 }
  0xe1   : > { %v790_v11 = vmul.f32 %v1188_v8, %v1448_v23  ;;  %v1475_v12 = vadd.f32 %v1450_v24, %v474_v10  ;;  %v648_v15 = vsub.f32 0.0, %v1471_v9 }
  0xe3   : > { %822 = vst.msk [vmem:[%s1442_s8 + $0x20] sm:$0xff] %vm399_vm0, %v790_v11  ;;  %v633_v16 = vsub.f32 0.0, %v1475_v12  ;;  %v1190_v17 = vpop.eup %1189  ;;  %v702_v18 = vmul.f32 1.442695, %v648_v15 }
  0xe4   : > { %v1192_v19 = vpop.eup %1191  ;;  %v743_v20 = vadd.f32 1.0, %v1190_v17 }
  0xe5   : > { %v672_v21 = vmul.f32 1.442695, %v633_v16  ;;  %v1194_v22 = vpop.eup %1193  ;;  %v806_v23 = vmul.f32 %v1192_v19, %v597_v37  ;;  %1197 = vpow2.f32 %v702_v18 }
  0xe6   : > { %v1196_v24 = vpop.eup %1195  ;;  %1199 = vrcp.f32 %v743_v20  ;;  %v728_v25 = vadd.f32 1.0, %v1194_v22  ;;  %v514_v26 = vpop.f32.mrf.mxu2 }
  0xe7   : > { %838 = vst.msk [vmem:[%s1442_s8 + $0xa0] sm:$0xff] %vm399_vm0, %v806_v23  ;;  %v791_v27 = vmul.f32 %v1196_v24, %v1455_v39  ;;  %1201 = vpow2.f32 %v672_v21  ;;  %v604_v28 = vadd.f32 %v603_v54, %v514_v26  ;;  %v1489_v31 = vpop.f32.mrf.mxu1 }
  0xe8   : > { %v477_v29 = vpop.f32.mrf.mxu0  ;;  %1203 = vrcp.f32 %v728_v25 }
  0xe9   : > { %v1487_v30 = vadd.f32 %v1457_v40, %v477_v29  ;;  %823 = vst.msk [vmem:[%s1442_s8 + $0x28] sm:$0xff] %vm399_vm0, %v791_v27  ;;  %v649_v32 = vsub.f32 0.0, %v604_v28 }
  0xeb   : > { %v634_v33 = vsub.f32 0.0, %v1487_v30  ;;  %v1198_v35 = vpop.eup %1197  ;;  %v704_v36 = vmul.f32 1.442695, %v649_v32 }
  0xec   : > { %v1200_v37 = vpop.eup %1199  ;;  %v744_v38 = vadd.f32 1.0, %v1198_v35 }
  0xed   : > { %v674_v39 = vmul.f32 1.442695, %v634_v33  ;;  %v1202_v41 = vpop.eup %1201  ;;  %v807_v42 = vmul.f32 %v1200_v37, %v599_v56  ;;  %1205 = vpow2.f32 %v704_v36 }
  0xee   : > { %v1204_v40 = vpop.eup %1203  ;;  %1207 = vrcp.f32 %v744_v38  ;;  %v729_v43 = vadd.f32 1.0, %v1202_v41  ;;  %v517_v44 = vpop.f32.mrf.mxu2 }
  0xef   : > { %839 = vst.msk [vmem:[%s1442_s8 + $0xa8] sm:$0xff] %vm399_vm0, %v807_v42  ;;  %v792_v45 = vmul.f32 %v1204_v40, %v1464_v58  ;;  %1209 = vpow2.f32 %v674_v39  ;;  %v607_v46 = vadd.f32 %v606_v14, %v517_v44  ;;  %v1500_v49 = vpop.f32.mrf.mxu1  ;;  %v611_v58 = vpop.f32.mrf.mxu3 }
  0xf0   : > { %v479_v47 = vpop.f32.mrf.mxu0  ;;  %1211 = vrcp.f32 %v729_v43 }
  0xf1   : > { %v1498_v48 = vadd.f32 %v1466_v60, %v479_v47  ;;  %824 = vst.msk [vmem:[%s1442_s8 + $0x30] sm:$0xff] %vm399_vm0, %v792_v45  ;;  %v650_v51 = vsub.f32 0.0, %v607_v46 }
  0xf3   : > { %v635_v52 = vsub.f32 0.0, %v1498_v48  ;;  %v1206_v53 = vpop.eup %1205  ;;  %v706_v54 = vmul.f32 1.442695, %v650_v51 }
  0xf4   : > { %v1208_v55 = vpop.eup %1207  ;;  %v745_v56 = vadd.f32 1.0, %v1206_v53 }
  0xf5   : > { %v676_v57 = vmul.f32 1.442695, %v635_v52  ;;  %v1210_v61 = vpop.eup %1209  ;;  %v808_v62 = vmul.f32 %v1208_v55, %v1471_v9  ;;  %1213 = vpow2.f32 %v706_v54 }
  0xf6   : > { %v1212_v60 = vpop.eup %1211  ;;  %1215 = vrcp.f32 %v745_v56  ;;  %v730_v63 = vadd.f32 1.0, %v1210_v61  ;;  %v519_v0 = vpop.f32.mrf.mxu2 }
  0xf7   : > { %840 = vst.msk [vmem:[%s1442_s8 + $0xb0] sm:$0xff] %vm399_vm0, %v808_v62  ;;  %v793_v1 = vmul.f32 %v1212_v60, %v1475_v12  ;;  %1217 = vpow2.f32 %v676_v57  ;;  %v609_v2 = vadd.f32 %v608_v34, %v519_v0  ;;  %v1512_v5 = vpop.f32.mrf.mxu1  ;;  %v613_v18 = vpop.f32.mrf.mxu3 }
  0xf8   : > { %v482_v3 = vpop.f32.mrf.mxu0  ;;  %1219 = vrcp.f32 %v730_v63 }
  0xf9   : > { %v1510_v4 = vadd.f32 %v1477_v13, %v482_v3  ;;  %825 = vst.msk [vmem:[%s1442_s8 + $0x38] sm:$0xff] %vm399_vm0, %v793_v1  ;;  %v651_v6 = vsub.f32 0.0, %v609_v2 }
  0xfb   : > { %v636_v7 = vsub.f32 0.0, %v1510_v4  ;;  %v1214_v8 = vpop.eup %1213  ;;  %v708_v9 = vmul.f32 1.442695, %v651_v6 }
  0xfc   : > { %v1216_v10 = vpop.eup %1215  ;;  %v746_v11 = vadd.f32 1.0, %v1214_v8 }
  0xfd   : > { %v678_v12 = vmul.f32 1.442695, %v636_v7  ;;  %v1218_v14 = vpop.eup %1217  ;;  %v809_v15 = vmul.f32 %v1216_v10, %v604_v28  ;;  %1221 = vpow2.f32 %v708_v9 }
  0xfe   : > { %v1220_v16 = vpop.eup %1219  ;;  %1223 = vrcp.f32 %v746_v11  ;;  %v731_v13 = vadd.f32 1.0, %v1218_v14  ;;  %v522_v17 = vpop.f32.mrf.mxu2 }
  0xff   : > { %841 = vst.msk [vmem:[%s1442_s8 + $0xb8] sm:$0xff] %vm399_vm0, %v809_v15  ;;  %v794_v19 = vmul.f32 %v1220_v16, %v1487_v30  ;;  %1225 = vpow2.f32 %v678_v12  ;;  %v1520_v20 = vadd.f32 %v611_v58, %v522_v17  ;;  %v1525_v23 = vpop.f32.mrf.mxu1  ;;  %v616_v39 = vpop.f32.mrf.mxu3 }
 0x100   : > { %v484_v21 = vpop.f32.mrf.mxu0  ;;  %1227 = vrcp.f32 %v731_v13 }
 0x101   : > { %v1523_v22 = vadd.f32 %v1489_v31, %v484_v21  ;;  %826 = vst.msk [vmem:[%s1442_s8 + $0x40] sm:$0xff] %vm399_vm0, %v794_v19  ;;  %v652_v24 = vsub.f32 0.0, %v1520_v20 }
 0x103   : > { %v637_v25 = vsub.f32 0.0, %v1523_v22  ;;  %v1222_v26 = vpop.eup %1221  ;;  %v710_v27 = vmul.f32 1.442695, %v652_v24 }
 0x104   : > { %v1224_v28 = vpop.eup %1223  ;;  %v747_v29 = vadd.f32 1.0, %v1222_v26 }
 0x105   : > { %v680_v30 = vmul.f32 1.442695, %v637_v25  ;;  %v1226_v32 = vpop.eup %1225  ;;  %v810_v33 = vmul.f32 %v1224_v28, %v607_v46  ;;  %1229 = vpow2.f32 %v710_v27 }
 0x106   : > { %v1228_v31 = vpop.eup %1227  ;;  %1231 = vrcp.f32 %v747_v29  ;;  %v732_v34 = vadd.f32 1.0, %v1226_v32  ;;  %v524_v35 = vpop.f32.mrf.mxu2 }
 0x107   : > { %842 = vst.msk [vmem:[%s1442_s8 + $0xc0] sm:$0xff] %vm399_vm0, %v810_v33  ;;  %v795_v36 = vmul.f32 %v1228_v31, %v1498_v48  ;;  %1233 = vpow2.f32 %v680_v30  ;;  %v1534_v37 = vadd.f32 %v613_v18, %v524_v35  ;;  %v1539_v42 = vpop.f32.mrf.mxu1  ;;  %v618_v63 = vpop.f32.mrf.mxu3 }
 0x108   : > { %v487_v38 = vpop.f32.mrf.mxu0  ;;  %1235 = vrcp.f32 %v732_v34 }
 0x109   : > { %v1537_v41 = vadd.f32 %v1500_v49, %v487_v38  ;;  %827 = vst.msk [vmem:[%s1442_s8 + $0x48] sm:$0xff] %vm399_vm0, %v795_v36  ;;  %v653_v40 = vsub.f32 0.0, %v1534_v37 }
 0x10b   : > { %v638_v43 = vsub.f32 0.0, %v1537_v41  ;;  %v1230_v44 = vpop.eup %1229  ;;  %v712_v45 = vmul.f32 1.442695, %v653_v40 }
 0x10c   : > { %v1232_v46 = vpop.eup %1231  ;;  %v748_v47 = vadd.f32 1.0, %v1230_v44 }
 0x10d   : > { %v682_v48 = vmul.f32 1.442695, %v638_v43  ;;  %v1234_v51 = vpop.eup %1233  ;;  %v811_v52 = vmul.f32 %v1232_v46, %v609_v2  ;;  %1237 = vpow2.f32 %v712_v45 }
 0x10e   : > { %v1236_v49 = vpop.eup %1235  ;;  %1239 = vrcp.f32 %v748_v47  ;;  %v733_v53 = vadd.f32 1.0, %v1234_v51  ;;  %v527_v54 = vpop.f32.mrf.mxu2 }
 0x10f   : > { %843 = vst.msk [vmem:[%s1442_s8 + $0xc8] sm:$0xff] %vm399_vm0, %v811_v52  ;;  %v796_v55 = vmul.f32 %v1236_v49, %v1510_v4  ;;  %1241 = vpow2.f32 %v682_v48  ;;  %v1548_v56 = vadd.f32 %v616_v39, %v527_v54  ;;  %v586_v61 = vpop.f32.mrf.mxu1 }
 0x110   : > { %v489_v57 = vpop.f32.mrf.mxu0  ;;  %1243 = vrcp.f32 %v733_v53  ;;  %v1557_v60 = vadd.f32 %v586_v61, %v1433_v50 }
 0x111   : > { %v1551_v58 = vadd.f32 %v1512_v5, %v489_v57  ;;  %828 = vst.msk [vmem:[%s1442_s8 + $0x50] sm:$0xff] %vm399_vm0, %v796_v55  ;;  %v654_v62 = vsub.f32 0.0, %v1548_v56 }
 0x112   : > { %v642_v3 = vsub.f32 0.0, %v1557_v60 }
 0x113   : > { %v639_v0 = vsub.f32 0.0, %v1551_v58  ;;  %v1238_v1 = vpop.eup %1237  ;;  %v714_v2 = vmul.f32 1.442695, %v654_v62 }
 0x114   : > { %v1240_v4 = vpop.eup %1239  ;;  %v749_v6 = vadd.f32 1.0, %v1238_v1  ;;  %v690_v9 = vmul.f32 1.442695, %v642_v3 }
 0x115   : > { %v684_v5 = vmul.f32 1.442695, %v639_v0  ;;  %v1242_v7 = vpop.eup %1241  ;;  %v812_v8 = vmul.f32 %v1240_v4, %v1520_v20  ;;  %1245 = vpow2.f32 %v714_v2 }
 0x116   : > { %v1244_v10 = vpop.eup %1243  ;;  %1247 = vrcp.f32 %v749_v6  ;;  %v734_v50 = vadd.f32 1.0, %v1242_v7  ;;  %v529_v11 = vpop.f32.mrf.mxu2 }
 0x117   : > { %844 = vst.msk [vmem:[%s1442_s8 + $0xd0] sm:$0xff] %vm399_vm0, %v812_v8  ;;  %v797_v12 = vmul.f32 %v1244_v10, %v1523_v22  ;;  %1249 = vpow2.f32 %v684_v5  ;;  %v1565_v14 = vadd.f32 %v618_v63, %v529_v11  ;;  %v588_v13 = vpop.f32.mrf.mxu1 }
 0x118   : > { %v492_v15 = vpop.f32.mrf.mxu0  ;;  %1251 = vrcp.f32 %v734_v50  ;;  %v1574_v18 = vadd.f32 %v588_v13, %v1435_v59 }
 0x119   : > { %v1568_v16 = vadd.f32 %v1525_v23, %v492_v15  ;;  %829 = vst.msk [vmem:[%s1442_s8 + $0x58] sm:$0xff] %vm399_vm0, %v797_v12  ;;  %1253 = vpow2.f32 %v690_v9  ;;  %v655_v17 = vsub.f32 0.0, %v1565_v14  ;;  %v621_v23 = vpop.f32.mrf.mxu3 }
 0x11a   : > { %v643_v22 = vsub.f32 0.0, %v1574_v18 }
 0x11b   : > { %v640_v19 = vsub.f32 0.0, %v1568_v16  ;;  %v1246_v20 = vpop.eup %1245  ;;  %v716_v21 = vmul.f32 1.442695, %v655_v17 }
 0x11c   : > { %v1248_v24 = vpop.eup %1247  ;;  %v750_v25 = vadd.f32 1.0, %v1246_v20  ;;  %v692_v29 = vmul.f32 1.442695, %v643_v22 }
 0x11d   : > { %v686_v26 = vmul.f32 1.442695, %v640_v19  ;;  %v1250_v27 = vpop.eup %1249  ;;  %v813_v28 = vmul.f32 %v1248_v24, %v1534_v37  ;;  %1255 = vpow2.f32 %v716_v21 }
 0x11e   : > { %v1252_v30 = vpop.eup %1251  ;;  %1257 = vrcp.f32 %v750_v25  ;;  %v735_v59 = vadd.f32 1.0, %v1250_v27  ;;  %v532_v32 = vpop.f32.mrf.mxu2 }
 0x11f   : > { %v1254_v33 = vpop.eup %1253  ;;  %845 = vst.msk [vmem:[%s1442_s8 + $0xd8] sm:$0xff] %vm399_vm0, %v813_v28  ;;  %v798_v31 = vmul.f32 %v1252_v30, %v1537_v41  ;;  %1259 = vpow2.f32 %v686_v26  ;;  %v622_v34 = vadd.f32 %v621_v23, %v532_v32 }
 0x120   : > { %v494_v35 = vpop.f32.mrf.mxu0  ;;  %1261 = vrcp.f32 %v735_v59  ;;  %v738_v36 = vadd.f32 1.0, %v1254_v33 }
 0x121   : > { %v584_v38 = vadd.f32 %v1539_v42, %v494_v35  ;;  %830 = vst.msk [vmem:[%s1442_s8 + $0x60] sm:$0xff] %vm399_vm0, %v798_v31  ;;  %1263 = vpow2.f32 %v692_v29  ;;  %v656_v37 = vsub.f32 0.0, %v622_v34  ;;  %v623_v51 = vpop.f32.mrf.mxu3 }
 0x122   : > { %1265 = vrcp.f32 %v738_v36 }
 0x123   : > { %v641_v39 = vsub.f32 0.0, %v584_v38  ;;  %v1256_v40 = vpop.eup %1255  ;;  %v718_v43 = vmul.f32 1.442695, %v656_v37 }
 0x124   : > { %v1258_v44 = vpop.eup %1257  ;;  %v751_v45 = vadd.f32 1.0, %v1256_v40 }
 0x125   : > { %v688_v46 = vmul.f32 1.442695, %v641_v39  ;;  %v1260_v41 = vpop.eup %1259  ;;  %v814_v47 = vmul.f32 %v1258_v44, %v1548_v56  ;;  %1267 = vpow2.f32 %v718_v43 }
 0x126   : > { %v1262_v48 = vpop.eup %1261  ;;  %1269 = vrcp.f32 %v751_v45  ;;  %v736_v42 = vadd.f32 1.0, %v1260_v41  ;;  %v534_v52 = vpop.f32.mrf.mxu2 }
 0x127   : > { %v1264_v49 = vpop.eup %1263  ;;  %846 = vst.msk [vmem:[%s1442_s8 + $0xe0] sm:$0xff] %vm399_vm0, %v814_v47  ;;  %v799_v53 = vmul.f32 %v1262_v48, %v1551_v58  ;;  %1271 = vpow2.f32 %v688_v46  ;;  %v624_v54 = vadd.f32 %v623_v51, %v534_v52 }
 0x128   : > { %v1266_v55 = vpop.eup %1265  ;;  %1273 = vrcp.f32 %v736_v42  ;;  %v739_v57 = vadd.f32 1.0, %v1264_v49 }
 0x129   : > { %831 = vst.msk [vmem:[%s1442_s8 + $0x68] sm:$0xff] %vm399_vm0, %v799_v53  ;;  %v802_v56 = vmul.f32 %v1266_v55, %v1557_v60  ;;  %v657_v61 = vsub.f32 0.0, %v624_v54 }
 0x12a   : > { %1275 = vrcp.f32 %v739_v57 }
 0x12b   : > { %v1268_v62 = vpop.eup %1267  ;;  %834 = vst.msk [vmem:[%s1442_s8 + $0x80] sm:$0xff] %vm399_vm0, %v802_v56  ;;  %v720_v63 = vmul.f32 1.442695, %v657_v61 }
 0x12c   : > { %v1270_v0 = vpop.eup %1269  ;;  %v752_v58 = vadd.f32 1.0, %v1268_v62 }
 0x12d   : > { %v1272_v1 = vpop.eup %1271  ;;  %v815_v2 = vmul.f32 %v1270_v0, %v1565_v14  ;;  %1277 = vpow2.f32 %v720_v63 }
 0x12e   : > { %v1274_v3 = vpop.eup %1273  ;;  %1279 = vrcp.f32 %v752_v58  ;;  %v737_v4 = vadd.f32 1.0, %v1272_v1 }
 0x12f   : > { %847 = vst.msk [vmem:[%s1442_s8 + $0xe8] sm:$0xff] %vm399_vm0, %v815_v2  ;;  %v800_v60 = vmul.f32 %v1274_v3, %v1568_v16 }
 0x130   : > { %v1276_v6 = vpop.eup %1275  ;;  %1281 = vrcp.f32 %v737_v4 }
 0x131   : > { %832 = vst.msk [vmem:[%s1442_s8 + $0x70] sm:$0xff] %vm399_vm0, %v800_v60  ;;  %v803_v5 = vmul.f32 %v1276_v6, %v1574_v18 }
 0x133   : > { %v1278_v7 = vpop.eup %1277  ;;  %835 = vst.msk [vmem:[%s1442_s8 + $0x88] sm:$0xff] %vm399_vm0, %v803_v5 }
 0x134   : > { %v1280_v8 = vpop.eup %1279  ;;  %v753_v9 = vadd.f32 1.0, %v1278_v7 }
 0x135   : > { %v816_v10 = vmul.f32 %v1280_v8, %v622_v34 }
 0x136   : > { %v1282_v50 = vpop.eup %1281  ;;  %1283 = vrcp.f32 %v753_v9 }
 0x137   : > { %848 = vst.msk [vmem:[%s1442_s8 + $0xf0] sm:$0xff] %vm399_vm0, %v816_v10  ;;  %v801_v11 = vmul.f32 %v1282_v50, %v584_v38 }
 0x139   : > { %833 = vst.msk [vmem:[%s1442_s8 + $0x78] sm:$0xff] %vm399_vm0, %v801_v11 }
 0x13c   : > { %v1284_v12 = vpop.eup %1283 }
 0x13d   : > { %v817_v14 = vmul.f32 %v1284_v12, %v624_v54 }
 0x13f   : > { %849 = vst.msk [vmem:[%s1442_s8 + $0xf8] sm:$0xff] %vm399_vm0, %v817_v14 }
 0x140 PF: > { %s12_s9 = sadd.s32 1, %s1291_s9  }
 0x141   : > { %p9_p4 = scmp.ge.s32.totalorder %s12_s9, 4  }
 0x143   :  { %11 = sbr.rel (!%p9_p4) target bundleno = 1 (0x1), region = 58 }

// kernel: forward.22
= control target key start
LH: loop header
LB: loop body
LE: loop exit
PB: predicated region body
PF: predicated region fallthrough
CT: control target
= control target key end

     0   :  { %s1408_s12 = smov 0   ;;  %s1790_s0 = inlined_call_operand.vmem [shape: bf16[512,144], index: 0, kind: input, shape index: {}]   ;;  %s1791_s1 = inlined_call_operand.vmem [shape: bf16[144,16], index: 1, kind: input, shape index: {}]   ;;  %s1792_s2 = inlined_call_operand.vmem [shape: f32[512,16], index: 2, kind: input, shape index: {}]   ;;  %s1793_s3 = inlined_call_operand.vmem [shape: f32[512,16], index: 3, kind: output, shape index: {}]  }
   0x1 LB: > { %s999_s13 = sadd.s32 4294967295, %s1386_s12   ;;  %p1003_p0 = scmp.ge.s32.totalorder %s1386_s12, 1  ;;  %s1386_s12 = sphi %s1408_s12, %s13_s12  }
   0x2   : > { %p150_p1 = scmp.lt.s32.totalorder %s1386_s12, 3 }
   0x4   : > { %p151_p2 = pnand %p1003_p0, %p150_p1 }
   0x5   : > { %s1004_s18 = sshll.u32 (!%p151_p2), %s999_s13, 5 }
   0x6   : > { %154 = sbr.rel (%p151_p2) target bundleno = 322 (0x142), region = 32  ;;  %p181_p3 = scmp.lt.s32.totalorder (!%p151_p2), %s1004_s18, 63 }
   0xb   : > { %v1233_v0 = vld [vmem:[%s1791_s1 + $0x38] sm:$0xff]  ;;  %v1234_v1 = vld [vmem:[%s1791_s1 + $0x40] sm:$0xff]  ;;  %v1232_v2 = vld [vmem:[%s1791_s1 + $0x30] sm:$0xff]  ;;  %s1795_s18 = smov (!%p181_p3, %s1004_s18), 63  ;;  %vm480_vm0 = vcmask 130048  }
   0xc   : > { %529 = vmatpush.bf16.msra.mxu0 %v1233_v0  ;;  %1235 = vmatpush.bf16.msra.mxu2 %v1233_v0  ;;  %s1425_s21 = sshll.u32 %s1795_s18, 3  ;;  %v1231_v3 = vld [vmem:[%s1791_s1 + $0x28] sm:$0xff]  ;;  %v1230_v7 = vld [vmem:[%s1791_s1 + $0x20] sm:$0xff]  ;;  %v1229_v11 = vld [vmem:[%s1791_s1 + $0x18] sm:$0xff] }
   0xd   : > { %625 = vmatpush.bf16.msra.mxu1 %v1234_v1  ;;  %1243 = vmatpush.bf16.msra.mxu3 %v1234_v1  ;;  %s1431_s24 = scalar_lea.vmem %s1790_s0, %s1425_s21  ;;  %v1228_v12 = vld [vmem:[%s1791_s1 + $0x10] sm:$0xff]  ;;  %v1227_v16 = vld [vmem:[%s1791_s1 + $0x8] sm:$0xff]  ;;  %v1226_v19 = vld [vmem:[%s1791_s1] sm:$0xff]  ;;  %s1535_s13 = scalar_lea.vmem %s1792_s2, %s1425_s21 }
   0xe   : > { %v1194_v4 = vld [vmem:[%s1431_s24 + $0x4] sm:$0xf]  ;;  %v1015_v5 = vld [vmem:[%s1431_s24 + $0x8] sm:$0xf0]  ;;  %v1212_v8 = vld [vmem:[%s1431_s24 + $0x94] sm:$0xf]  ;;  %s1554_s16 = scalar_lea.vmem %s1793_s3, %s1425_s21 }
   0xf   : > { %v1018_v6 = vor.u32 %v1194_v4, %v1015_v5  ;;  %v1087_v9 = vld [vmem:[%s1431_s24 + $0x98] sm:$0xf0]  ;;  %v1196_v13 = vld [vmem:[%s1431_s24 + $0x14] sm:$0xf]  ;;  %v1214_v17 = vld [vmem:[%s1431_s24 + $0xa4] sm:$0xf] }
  0x10   : > { %530 = vmatpush.bf16.msra.mxu0 %v1232_v2  ;;  %1236 = vmatpush.bf16.msra.mxu2 %v1232_v2  ;;  %v1090_v10 = vor.u32 %v1212_v8, %v1087_v9  ;;  %v1023_v14 = vld [vmem:[%s1431_s24 + $0x18] sm:$0xf0]  ;;  %v1095_v18 = vld [vmem:[%s1431_s24 + $0xa8] sm:$0xf0]  ;;  %v1013_v20 = vld [vmem:[%s1431_s24] sm:$0xf] }
  0x11   : > { %1175 = vmatmul.msk.bf16.vlgmr.msra.gmra.mxu1 %vm480_vm0, %v1018_v6  ;;  %v1026_v15 = vor.u32 %v1196_v13, %v1023_v14  ;;  %v1195_v21 = vld [vmem:[%s1431_s24 + $0x4] sm:$0xf0]  ;;  %v1098_v22 = vor.u32 %v1214_v17, %v1095_v18  ;;  %v1077_v23 = vld [vmem:[%s1431_s24 + $0x80] sm:$0xf]  ;;  %v1198_v27 = vld [vmem:[%s1431_s24 + $0x24] sm:$0xf] }
  0x12   : > { %1184 = vmatmul.msk.bf16.vlgmr.msra.gmra.mxu3 %vm480_vm0, %v1090_v10  ;;  %v1211_v24 = vld [vmem:[%s1431_s24 + $0x84] sm:$0xf0]  ;;  %v1014_v25 = vor.u32 %v1195_v21, %v1013_v20  ;;  %v1031_v28 = vld [vmem:[%s1431_s24 + $0x28] sm:$0xf0]  ;;  %v1216_v30 = vld [vmem:[%s1431_s24 + $0xb4] sm:$0xf] }
  0x13   : > { %v1078_v26 = vor.u32 %v1211_v24, %v1077_v23  ;;  %v1034_v29 = vor.u32 %v1198_v27, %v1031_v28  ;;  %v1103_v31 = vld [vmem:[%s1431_s24 + $0xb8] sm:$0xf0]  ;;  %v1021_v32 = vld [vmem:[%s1431_s24 + $0x10] sm:$0xf]  ;;  %v1197_v33 = vld [vmem:[%s1431_s24 + $0x14] sm:$0xf0] }
  0x14   : > { %531 = vmatpush.bf16.msra.mxu0 %v1231_v3  ;;  %1237 = vmatpush.bf16.msra.mxu2 %v1231_v3  ;;  %v1106_v34 = vor.u32 %v1216_v30, %v1103_v31  ;;  %v1085_v35 = vld [vmem:[%s1431_s24 + $0x90] sm:$0xf]  ;;  %v1213_v36 = vld [vmem:[%s1431_s24 + $0x94] sm:$0xf0]  ;;  %v1022_v37 = vor.u32 %v1197_v33, %v1021_v32  ;;  %v1200_v39 = vld [vmem:[%s1431_s24 + $0x34] sm:$0xf] }
  0x15   : > { %v1086_v38 = vor.u32 %v1213_v36, %v1085_v35  ;;  %v1039_v40 = vld [vmem:[%s1431_s24 + $0x38] sm:$0xf0]  ;;  %v1218_v42 = vld [vmem:[%s1431_s24 + $0xc4] sm:$0xf]  ;;  %v1111_v43 = vld [vmem:[%s1431_s24 + $0xc8] sm:$0xf0] }
  0x16   : > { %v1042_v41 = vor.u32 %v1200_v39, %v1039_v40  ;;  %v1029_v44 = vld [vmem:[%s1431_s24 + $0x20] sm:$0xf]  ;;  %v1199_v45 = vld [vmem:[%s1431_s24 + $0x24] sm:$0xf0]  ;;  %v1114_v46 = vor.u32 %v1218_v42, %v1111_v43  ;;  %v1202_v51 = vld [vmem:[%s1431_s24 + $0x44] sm:$0xf] }
  0x17   : > { %v1093_v47 = vld [vmem:[%s1431_s24 + $0xa0] sm:$0xf]  ;;  %v1215_v48 = vld [vmem:[%s1431_s24 + $0xa4] sm:$0xf0]  ;;  %v1030_v49 = vor.u32 %v1199_v45, %v1029_v44  ;;  %v1047_v52 = vld [vmem:[%s1431_s24 + $0x48] sm:$0xf0] }
  0x18   : > { %532 = vmatpush.bf16.msra.mxu0 %v1230_v7  ;;  %1238 = vmatpush.bf16.msra.mxu2 %v1230_v7  ;;  %v1094_v50 = vor.u32 %v1215_v48, %v1093_v47  ;;  %v1050_v53 = vor.u32 %v1202_v51, %v1047_v52  ;;  %v1220_v54 = vld [vmem:[%s1431_s24 + $0xd4] sm:$0xf]  ;;  %v1119_v55 = vld [vmem:[%s1431_s24 + $0xd8] sm:$0xf0]  ;;  %v1037_v56 = vld [vmem:[%s1431_s24 + $0x30] sm:$0xf] }
  0x19   : > { %v1201_v57 = vld [vmem:[%s1431_s24 + $0x34] sm:$0xf0]  ;;  %v1122_v58 = vor.u32 %v1220_v54, %v1119_v55  ;;  %v1101_v59 = vld [vmem:[%s1431_s24 + $0xb0] sm:$0xf]  ;;  %v1204_v63 = vld [vmem:[%s1431_s24 + $0x54] sm:$0xf] }
  0x1a   : > { %v1217_v60 = vld [vmem:[%s1431_s24 + $0xb4] sm:$0xf0]  ;;  %v1038_v61 = vor.u32 %v1201_v57, %v1037_v56  ;;  %v1055_v0 = vld [vmem:[%s1431_s24 + $0x58] sm:$0xf0]  ;;  %v1222_v2 = vld [vmem:[%s1431_s24 + $0xe4] sm:$0xf] }
  0x1b   : > { %v1102_v62 = vor.u32 %v1217_v60, %v1101_v59  ;;  %v1058_v1 = vor.u32 %v1204_v63, %v1055_v0  ;;  %v1127_v3 = vld [vmem:[%s1431_s24 + $0xe8] sm:$0xf0]  ;;  %v1045_v4 = vld [vmem:[%s1431_s24 + $0x40] sm:$0xf]  ;;  %v1203_v5 = vld [vmem:[%s1431_s24 + $0x44] sm:$0xf0] }
  0x1c   : > { %533 = vmatpush.bf16.msra.mxu0 %v1229_v11  ;;  %1239 = vmatpush.bf16.msra.mxu2 %v1229_v11  ;;  %v1130_v6 = vor.u32 %v1222_v2, %v1127_v3  ;;  %v1109_v7 = vld [vmem:[%s1431_s24 + $0xc0] sm:$0xf]  ;;  %v1219_v8 = vld [vmem:[%s1431_s24 + $0xc4] sm:$0xf0]  ;;  %v1046_v9 = vor.u32 %v1203_v5, %v1045_v4  ;;  %v1206_v11 = vld [vmem:[%s1431_s24 + $0x64] sm:$0xf] }
  0x1d   : > { %v1110_v10 = vor.u32 %v1219_v8, %v1109_v7  ;;  %v1224_v14 = vld [vmem:[%s1431_s24 + $0xf4] sm:$0xf]  ;;  %v1205_v17 = vld [vmem:[%s1431_s24 + $0x54] sm:$0xf0]  ;;  %v1071_v24 = vld [vmem:[%s1431_s24 + $0x78] sm:$0xf0] }
  0x1e   : > { %v1221_v20 = vld [vmem:[%s1431_s24 + $0xd4] sm:$0xf0]  ;;  %v1208_v23 = vld [vmem:[%s1431_s24 + $0x74] sm:$0xf]  ;;  %v1207_v27 = vld [vmem:[%s1431_s24 + $0x64] sm:$0xf0] }
  0x1f   : > { %v1125_v28 = vld [vmem:[%s1431_s24 + $0xe0] sm:$0xf]  ;;  %v1210_v32 = vld [vmem:[%s1431_s24 + $0x84] sm:$0xf]  ;;  %v1079_v33 = vld [vmem:[%s1431_s24 + $0x88] sm:$0xf0] }
  0x20   : > { %534 = vmatpush.bf16.msra.mxu0 %v1228_v12  ;;  %1240 = vmatpush.bf16.msra.mxu2 %v1228_v12  ;;  %v1063_v12 = vld [vmem:[%s1431_s24 + $0x68] sm:$0xf0]  ;;  %v1069_v36 = vld [vmem:[%s1431_s24 + $0x70] sm:$0xf]  ;;  %v1225_v39 = vld [vmem:[%s1431_s24 + $0xf4] sm:$0xf0] }
  0x21   : > { %1176 = vmatmul.msk.bf16.gmra.mxu1 %vm480_vm0, %v1026_v15  ;;  %v1066_v13 = vor.u32 %v1206_v11, %v1063_v12  ;;  %v1135_v15 = vld [vmem:[%s1431_s24 + $0xf8] sm:$0xf0]  ;;  %v250_v44 = vld [vmem:[%s1535_s13] sm:$0xff]  ;;  %v251_v51 = vld [vmem:[%s1535_s13 + $0x8] sm:$0xff] }
  0x22   : > { %1185 = vmatmul.msk.bf16.gmra.mxu3 %vm480_vm0, %v1098_v22  ;;  %v1138_v18 = vor.u32 %v1224_v14, %v1135_v15  ;;  %v252_v60 = vld [vmem:[%s1535_s13 + $0x10] sm:$0xff]  ;;  %v253_v8 = vld [vmem:[%s1535_s13 + $0x18] sm:$0xff] }
  0x23   : > { %v268_v7 = vld [vmem:[%s1535_s13 + $0x90] sm:$0xff] }
  0x24   : > { %535 = vmatpush.bf16.msra.mxu0 %v1227_v16  ;;  %1241 = vmatpush.bf16.msra.mxu2 %v1227_v16  ;;  %v1053_v16 = vld [vmem:[%s1431_s24 + $0x50] sm:$0xf] }
  0x25   : > { %v1054_v21 = vor.u32 %v1205_v17, %v1053_v16 }
  0x28   : > { %536 = vmatpush.bf16.msra.mxu0 %v1226_v19  ;;  %1242 = vmatpush.bf16.msra.mxu2 %v1226_v19  ;;  %v1117_v19 = vld [vmem:[%s1431_s24 + $0xd0] sm:$0xf] }
  0x29   : > { %v1118_v22 = vor.u32 %v1221_v20, %v1117_v19 }
  0x2b   : > { %537 = vmatmul.bf16.vlgmr.msra.gmra.mxu0 %v1014_v25  ;;  %577 = vmatmul.bf16.vlgmr.msra.gmra.mxu2 %v1078_v26  ;;  %v1074_v25 = vor.u32 %v1208_v23, %v1071_v24  ;;  %v1061_v26 = vld [vmem:[%s1431_s24 + $0x60] sm:$0xf]  ;;  %v269_v23 = vld [vmem:[%s1535_s13 + $0x98] sm:$0xff] }
  0x2c   : > { %v1062_v30 = vor.u32 %v1207_v27, %v1061_v26  ;;  %v254_v26 = vld [vmem:[%s1535_s13 + $0x20] sm:$0xff] }
  0x31   : > { %1177 = vmatmul.msk.bf16.gmra.mxu1 %vm480_vm0, %v1034_v29  ;;  %v1223_v29 = vld [vmem:[%s1431_s24 + $0xe4] sm:$0xf0] }
  0x32   : > { %1186 = vmatmul.msk.bf16.gmra.mxu3 %vm480_vm0, %v1106_v34  ;;  %v1126_v31 = vor.u32 %v1223_v29, %v1125_v28  ;;  %v1082_v34 = vor.u32 %v1210_v32, %v1079_v33 }
  0x3b   : > { %542 = vmatmul.bf16.gmra.mxu0 %v1022_v37  ;;  %582 = vmatmul.bf16.gmra.mxu2 %v1086_v38  ;;  %v1209_v37 = vld [vmem:[%s1431_s24 + $0x74] sm:$0xf0]  ;;  %v1133_v38 = vld [vmem:[%s1431_s24 + $0xf0] sm:$0xf] }
  0x3c   : > { %v1070_v40 = vor.u32 %v1209_v37, %v1069_v36 }
  0x41   : > { %1178 = vmatmul.msk.bf16.gmra.mxu1 %vm480_vm0, %v1042_v41  ;;  %v1134_v41 = vor.u32 %v1225_v39, %v1133_v38 }
  0x42   : > { %1187 = vmatmul.msk.bf16.gmra.mxu3 %vm480_vm0, %v1114_v46 }
  0x4b   : > { %547 = vmatmul.bf16.gmra.mxu0 %v1030_v49  ;;  %587 = vmatmul.bf16.gmra.mxu2 %v1094_v50 }
  0x51   : > { %1179 = vmatmul.msk.bf16.gmra.mxu1 %vm480_vm0, %v1050_v53 }
  0x52   : > { %1188 = vmatmul.msk.bf16.gmra.mxu3 %vm480_vm0, %v1122_v58 }
  0x5b   : > { %552 = vmatmul.bf16.gmra.mxu0 %v1038_v61  ;;  %592 = vmatmul.bf16.gmra.mxu2 %v1102_v62 }
  0x61   : > { %1180 = vmatmul.msk.bf16.gmra.mxu1 %vm480_vm0, %v1058_v1 }
  0x62   : > { %1189 = vmatmul.msk.bf16.gmra.mxu3 %vm480_vm0, %v1130_v6 }
  0x6b   : > { %557 = vmatmul.bf16.gmra.mxu0 %v1046_v9  ;;  %597 = vmatmul.bf16.gmra.mxu2 %v1110_v10 }
  0x71   : > { %1181 = vmatmul.msk.bf16.gmra.mxu1 %vm480_vm0, %v1066_v13 }
  0x72   : > { %1190 = vmatmul.msk.bf16.gmra.mxu3 %vm480_vm0, %v1138_v18 }
  0x7b   : > { %562 = vmatmul.bf16.gmra.mxu0 %v1054_v21  ;;  %602 = vmatmul.bf16.gmra.mxu2 %v1118_v22 }
  0x81   : > { %1182 = vmatmul.msk.bf16.gmra.mxu1 %vm480_vm0, %v1074_v25 }
  0x8b   : > { %567 = vmatmul.bf16.gmra.mxu0 %v1062_v30  ;;  %607 = vmatmul.bf16.gmra.mxu2 %v1126_v31 }
  0x8e   : > { %v627_v35 = vpop.f32.mrf.mxu1 }
  0x91   : > { %1183 = vmatmul.msk.bf16.gmra.mxu1 %vm480_vm0, %v1082_v34 }
  0x95   : > { %v672_v45 = vpop.f32.mrf.mxu3 }
  0x96   : > { %v629_v42 = vpop.f32.mrf.mxu1 }
  0x9b   : > { %572 = vmatmul.bf16.gmra.mxu0 %v1070_v40  ;;  %612 = vmatmul.bf16.gmra.mxu2 %v1134_v41  ;;  %v270_v41 = vld [vmem:[%s1535_s13 + $0xa0] sm:$0xff] }
  0x9d   : > { %v674_v57 = vpop.f32.mrf.mxu3 }
  0x9e   : > { %v632_v43 = vpop.f32.mrf.mxu1 }
  0xa5   : > { %v1546_v5 = vpop.f32.mrf.mxu3 }
  0xa6   : > { %v634_v48 = vpop.f32.mrf.mxu1 }
  0xa8   : > { %v538_v46 = vpop.f32.mrf.mxu0 }
  0xa9   : > { %v539_v47 = vadd.f32 %v538_v46, %v250_v44  ;;  %v255_v44 = vld [vmem:[%s1535_s13 + $0x28] sm:$0xff] }
  0xab   : > { %v628_v49 = vadd.f32 %v627_v35, %v539_v47 }
  0xad   : > { %v707_v50 = vsub.f32 0.0, %v628_v49  ;;  %v1564_v24 = vpop.f32.mrf.mxu3 }
  0xae   : > { %v1539_v53 = vpop.f32.mrf.mxu2  ;;  %v637_v56 = vpop.f32.mrf.mxu1 }
  0xaf   : > { %v739_v52 = vmul.f32 1.442695, %v707_v50 }
  0xb0   : > { %v540_v54 = vpop.f32.mrf.mxu0 }
  0xb1   : > { %1252 = vpow2.f32 %v739_v52  ;;  %v541_v55 = vadd.f32 %v540_v54, %v251_v51 }
  0xb3   : > { %v630_v58 = vadd.f32 %v629_v42, %v541_v55 }
  0xb5   : > { %v708_v59 = vsub.f32 0.0, %v630_v58 }
  0xb6   : > { %v1542_v63 = vpop.f32.mrf.mxu2  ;;  %v1544_v3 = vpop.f32.mrf.mxu1 }
  0xb7   : > { %v1253_v61 = vpop.eup %1252  ;;  %v741_v62 = vmul.f32 1.442695, %v708_v59 }
  0xb8   : > { %v803_v0 = vadd.f32 1.0, %v1253_v61  ;;  %v543_v1 = vpop.f32.mrf.mxu0 }
  0xb9   : > { %1254 = vpow2.f32 %v741_v62  ;;  %v544_v2 = vadd.f32 %v543_v1, %v252_v60  ;;  %v271_v62 = vld [vmem:[%s1535_s13 + $0xa8] sm:$0xff] }
  0xba   : > { %1256 = vrcp.f32 %v803_v0 }
  0xbb   : > { %v633_v4 = vadd.f32 %v632_v43, %v544_v2  ;;  %v256_v2 = vld [vmem:[%s1535_s13 + $0x30] sm:$0xff] }
  0xbd   : > { %v709_v6 = vsub.f32 0.0, %v633_v4 }
  0xbe   : > { %v583_v11 = vpop.f32.mrf.mxu2  ;;  %v1556_v18 = vpop.f32.mrf.mxu1 }
  0xbf   : > { %v1255_v9 = vpop.eup %1254  ;;  %v743_v10 = vmul.f32 1.442695, %v709_v6  ;;  %v584_v14 = vadd.f32 %v583_v11, %v268_v7 }
  0xc0   : > { %v1257_v12 = vpop.eup %1256  ;;  %v804_v13 = vadd.f32 1.0, %v1255_v9  ;;  %v545_v15 = vpop.f32.mrf.mxu0 }
  0xc1   : > { %v867_v16 = vmul.f32 %v1257_v12, %v628_v49  ;;  %1258 = vpow2.f32 %v743_v10  ;;  %v546_v17 = vadd.f32 %v545_v15, %v253_v8  ;;  %v673_v19 = vadd.f32 %v672_v45, %v584_v14  ;;  %v1579_v49 = vpop.f32.mrf.mxu3 }
  0xc2   : > { %1260 = vrcp.f32 %v804_v13 }
  0xc3   : > { %899 = vst.msk [vmem:[%s1554_s16] sm:$0xff] %vm480_vm0, %v867_v16  ;;  %v1560_v20 = vadd.f32 %v634_v48, %v546_v17  ;;  %v725_v21 = vsub.f32 0.0, %v673_v19 }
  0xc5   : > { %v710_v22 = vsub.f32 0.0, %v1560_v20  ;;  %v775_v25 = vmul.f32 1.442695, %v725_v21 }
  0xc6   : > { %v585_v29 = vpop.f32.mrf.mxu2  ;;  %v1567_v36 = vpop.f32.mrf.mxu1 }
  0xc7   : > { %v1259_v27 = vpop.eup %1258  ;;  %v745_v28 = vmul.f32 1.442695, %v710_v22  ;;  %1262 = vpow2.f32 %v775_v25  ;;  %v586_v32 = vadd.f32 %v585_v29, %v269_v23  ;;  %v272_v22 = vld [vmem:[%s1535_s13 + $0xb0] sm:$0xff] }
  0xc8   : > { %v1261_v30 = vpop.eup %1260  ;;  %v805_v31 = vadd.f32 1.0, %v1259_v27  ;;  %v548_v33 = vpop.f32.mrf.mxu0 }
  0xc9   : > { %v868_v34 = vmul.f32 %v1261_v30, %v630_v58  ;;  %1264 = vpow2.f32 %v745_v28  ;;  %v549_v35 = vadd.f32 %v548_v33, %v254_v26  ;;  %v1569_v37 = vadd.f32 %v674_v57, %v586_v32  ;;  %v684_v15 = vpop.f32.mrf.mxu3  ;;  %v257_v26 = vld [vmem:[%s1535_s13 + $0x38] sm:$0xff] }
  0xca   : > { %1266 = vrcp.f32 %v805_v31 }
  0xcb   : > { %900 = vst.msk [vmem:[%s1554_s16 + $0x8] sm:$0xff] %vm480_vm0, %v868_v34  ;;  %v1573_v38 = vadd.f32 %v637_v56, %v549_v35  ;;  %v726_v39 = vsub.f32 0.0, %v1569_v37 }
  0xcd   : > { %v711_v40 = vsub.f32 0.0, %v1573_v38  ;;  %v1263_v42 = vpop.eup %1262  ;;  %v777_v43 = vmul.f32 1.442695, %v726_v39 }
  0xce   : > { %v821_v46 = vadd.f32 1.0, %v1263_v42  ;;  %v588_v48 = vpop.f32.mrf.mxu2  ;;  %v1581_v57 = vpop.f32.mrf.mxu1 }
  0xcf   : > { %v1265_v45 = vpop.eup %1264  ;;  %v747_v47 = vmul.f32 1.442695, %v711_v40  ;;  %1268 = vpow2.f32 %v777_v43  ;;  %v589_v52 = vadd.f32 %v588_v48, %v270_v41  ;;  %v258_v48 = vld [vmem:[%s1535_s13 + $0x40] sm:$0xff] }
  0xd0   : > { %v1267_v50 = vpop.eup %1266  ;;  %v806_v51 = vadd.f32 1.0, %v1265_v45  ;;  %v550_v54 = vpop.f32.mrf.mxu0  ;;  %1270 = vrcp.f32 %v821_v46  ;;  %v273_v45 = vld [vmem:[%s1535_s13 + $0xb8] sm:$0xff] }
  0xd1   : > { %v869_v55 = vmul.f32 %v1267_v50, %v633_v4  ;;  %v551_v56 = vadd.f32 %v550_v54, %v255_v44  ;;  %v1584_v58 = vadd.f32 %v1546_v5, %v589_v52  ;;  %v687_v42 = vpop.f32.mrf.mxu3 }
  0xd2   : > { %1272 = vrcp.f32 %v806_v51 }
  0xd3   : > { %901 = vst.msk [vmem:[%s1554_s16 + $0x10] sm:$0xff] %vm480_vm0, %v869_v55  ;;  %1274 = vpow2.f32 %v747_v47  ;;  %v1589_v59 = vadd.f32 %v1544_v3, %v551_v56  ;;  %v727_v60 = vsub.f32 0.0, %v1584_v58 }
  0xd5   : > { %v712_v61 = vsub.f32 0.0, %v1589_v59  ;;  %v1269_v0 = vpop.eup %1268  ;;  %v779_v1 = vmul.f32 1.442695, %v727_v60 }
  0xd6   : > { %v1271_v4 = vpop.eup %1270  ;;  %v822_v6 = vadd.f32 1.0, %v1269_v0  ;;  %v590_v5 = vpop.f32.mrf.mxu2 }
  0xd7   : > { %v749_v7 = vmul.f32 1.442695, %v712_v61  ;;  %v885_v9 = vmul.f32 %v1271_v4, %v673_v19  ;;  %1276 = vpow2.f32 %v779_v1  ;;  %v591_v10 = vadd.f32 %v590_v5, %v271_v62  ;;  %v1596_v14 = vpop.f32.mrf.mxu1 }
  0xd8   : > { %v1273_v8 = vpop.eup %1272  ;;  %v553_v3 = vpop.f32.mrf.mxu0  ;;  %1278 = vrcp.f32 %v822_v6  ;;  %v274_v6 = vld [vmem:[%s1535_s13 + $0xc0] sm:$0xff] }
  0xd9   : > { %v1275_v11 = vpop.eup %1274  ;;  %v870_v12 = vmul.f32 %v1273_v8, %v1560_v20  ;;  %v554_v13 = vadd.f32 %v553_v3, %v256_v2  ;;  %917 = vst.msk [vmem:[%s1554_s16 + $0x90] sm:$0xff] %vm480_vm0, %v885_v9  ;;  %1280 = vpow2.f32 %v749_v7  ;;  %v1601_v17 = vadd.f32 %v1564_v24, %v591_v10  ;;  %v689_v7 = vpop.f32.mrf.mxu3  ;;  %v259_v9 = vld [vmem:[%s1535_s13 + $0x48] sm:$0xff] }
  0xda   : > { %v807_v16 = vadd.f32 1.0, %v1275_v11 }
  0xdb   : > { %902 = vst.msk [vmem:[%s1554_s16 + $0x18] sm:$0xff] %vm480_vm0, %v870_v12  ;;  %v1606_v19 = vadd.f32 %v1556_v18, %v554_v13  ;;  %v728_v20 = vsub.f32 0.0, %v1601_v17 }
  0xdc   : > { %1282 = vrcp.f32 %v807_v16 }
  0xdd   : > { %v713_v21 = vsub.f32 0.0, %v1606_v19  ;;  %v1277_v23 = vpop.eup %1276  ;;  %v781_v25 = vmul.f32 1.442695, %v728_v20 }
  0xde   : > { %v1279_v27 = vpop.eup %1278  ;;  %v823_v28 = vadd.f32 1.0, %v1277_v23  ;;  %v593_v24 = vpop.f32.mrf.mxu2 }
  0xdf   : > { %v751_v29 = vmul.f32 1.442695, %v713_v21  ;;  %v1281_v30 = vpop.eup %1280  ;;  %v886_v31 = vmul.f32 %v1279_v27, %v1569_v37  ;;  %1284 = vpow2.f32 %v781_v25  ;;  %v594_v18 = vadd.f32 %v593_v24, %v272_v22  ;;  %v1613_v35 = vpop.f32.mrf.mxu1 }
  0xe0   : > { %v555_v32 = vpop.f32.mrf.mxu0  ;;  %1286 = vrcp.f32 %v823_v28  ;;  %v808_v33 = vadd.f32 1.0, %v1281_v30  ;;  %v275_v28 = vld [vmem:[%s1535_s13 + $0xc8] sm:$0xff]  ;;  %v260_v30 = vld [vmem:[%s1535_s13 + $0x50] sm:$0xff] }
  0xe1   : > { %v556_v34 = vadd.f32 %v555_v32, %v257_v26  ;;  %918 = vst.msk [vmem:[%s1554_s16 + $0x98] sm:$0xff] %vm480_vm0, %v886_v31  ;;  %1288 = vpow2.f32 %v751_v29  ;;  %v1618_v40 = vadd.f32 %v1579_v49, %v594_v18 }
  0xe2   : > { %v1283_v39 = vpop.eup %1282  ;;  %1290 = vrcp.f32 %v808_v33  ;;  %v692_v33 = vpop.f32.mrf.mxu3 }
  0xe3   : > { %v871_v37 = vmul.f32 %v1283_v39, %v1573_v38  ;;  %v1622_v41 = vadd.f32 %v1567_v36, %v556_v34  ;;  %v729_v43 = vsub.f32 0.0, %v1618_v40 }
  0xe5   : > { %903 = vst.msk [vmem:[%s1554_s16 + $0x20] sm:$0xff] %vm480_vm0, %v871_v37  ;;  %v714_v44 = vsub.f32 0.0, %v1622_v41  ;;  %v1285_v46 = vpop.eup %1284  ;;  %v783_v47 = vmul.f32 1.442695, %v729_v43 }
  0xe6   : > { %v1287_v49 = vpop.eup %1286  ;;  %v824_v50 = vadd.f32 1.0, %v1285_v46  ;;  %v595_v38 = vpop.f32.mrf.mxu2 }
  0xe7   : > { %v753_v51 = vmul.f32 1.442695, %v714_v44  ;;  %v1289_v52 = vpop.eup %1288  ;;  %v887_v36 = vmul.f32 %v1287_v49, %v1584_v58  ;;  %1292 = vpow2.f32 %v783_v47  ;;  %v596_v54 = vadd.f32 %v595_v38, %v273_v45  ;;  %v1631_v62 = vpop.f32.mrf.mxu1 }
  0xe8   : > { %v558_v55 = vpop.f32.mrf.mxu0  ;;  %v1291_v56 = vpop.eup %1290  ;;  %1294 = vrcp.f32 %v824_v50  ;;  %v809_v60 = vadd.f32 1.0, %v1289_v52  ;;  %v276_v50 = vld [vmem:[%s1535_s13 + $0xd0] sm:$0xff]  ;;  %v261_v52 = vld [vmem:[%s1535_s13 + $0x58] sm:$0xff] }
  0xe9   : > { %v559_v61 = vadd.f32 %v558_v55, %v258_v48  ;;  %919 = vst.msk [vmem:[%s1554_s16 + $0xa0] sm:$0xff] %vm480_vm0, %v887_v36  ;;  %v872_v0 = vmul.f32 %v1291_v56, %v1589_v59  ;;  %1296 = vpow2.f32 %v753_v51  ;;  %v1636_v1 = vadd.f32 %v684_v15, %v596_v54 }
  0xea   : > { %1298 = vrcp.f32 %v809_v60 }
  0xeb   : > { %v1639_v58 = vadd.f32 %v1581_v57, %v559_v61  ;;  %904 = vst.msk [vmem:[%s1554_s16 + $0x28] sm:$0xff] %vm480_vm0, %v872_v0  ;;  %v730_v2 = vsub.f32 0.0, %v1636_v1 }
  0xed   : > { %v715_v4 = vsub.f32 0.0, %v1639_v58  ;;  %v1293_v5 = vpop.eup %1292  ;;  %v785_v8 = vmul.f32 1.442695, %v730_v2 }
  0xee   : > { %v1295_v59 = vpop.eup %1294  ;;  %v825_v10 = vadd.f32 1.0, %v1293_v5  ;;  %v598_v11 = vpop.f32.mrf.mxu2 }
  0xef   : > { %v755_v3 = vmul.f32 1.442695, %v715_v4  ;;  %v1297_v12 = vpop.eup %1296  ;;  %v888_v57 = vmul.f32 %v1295_v59, %v1601_v17  ;;  %1300 = vpow2.f32 %v785_v8  ;;  %v599_v13 = vadd.f32 %v598_v11, %v274_v6  ;;  %v1648_v22 = vpop.f32.mrf.mxu1 }
  0xf0   : > { %v560_v15 = vpop.f32.mrf.mxu0  ;;  %v1299_v16 = vpop.eup %1298  ;;  %1302 = vrcp.f32 %v825_v10  ;;  %v810_v20 = vadd.f32 1.0, %v1297_v12  ;;  %v277_v10 = vld [vmem:[%s1535_s13 + $0xd8] sm:$0xff]  ;;  %v262_v12 = vld [vmem:[%s1535_s13 + $0x60] sm:$0xff] }
  0xf1   : > { %v561_v21 = vadd.f32 %v560_v15, %v259_v9  ;;  %920 = vst.msk [vmem:[%s1554_s16 + $0xa8] sm:$0xff] %vm480_vm0, %v888_v57  ;;  %v873_v23 = vmul.f32 %v1299_v16, %v1606_v19  ;;  %1304 = vpow2.f32 %v755_v3  ;;  %v1653_v25 = vadd.f32 %v687_v42, %v599_v13 }
  0xf2   : > { %1306 = vrcp.f32 %v810_v20 }
  0xf3   : > { %v1656_v17 = vadd.f32 %v1596_v14, %v561_v21  ;;  %905 = vst.msk [vmem:[%s1554_s16 + $0x30] sm:$0xff] %vm480_vm0, %v873_v23  ;;  %v731_v26 = vsub.f32 0.0, %v1653_v25 }
  0xf5   : > { %v716_v27 = vsub.f32 0.0, %v1656_v17  ;;  %v1301_v29 = vpop.eup %1300  ;;  %v787_v24 = vmul.f32 1.442695, %v731_v26 }
  0xf6   : > { %v1303_v31 = vpop.eup %1302  ;;  %v826_v19 = vadd.f32 1.0, %v1301_v29  ;;  %v600_v32 = vpop.f32.mrf.mxu2 }
  0xf7   : > { %v757_v18 = vmul.f32 1.442695, %v716_v27  ;;  %v1305_v34 = vpop.eup %1304  ;;  %v889_v14 = vmul.f32 %v1303_v31, %v1618_v40  ;;  %1308 = vpow2.f32 %v787_v24  ;;  %v601_v39 = vadd.f32 %v600_v32, %v275_v28  ;;  %v1665_v45 = vpop.f32.mrf.mxu1  ;;  %v278_v32 = vld [vmem:[%s1535_s13 + $0xe0] sm:$0xff] }
  0xf8   : > { %v563_v37 = vpop.f32.mrf.mxu0  ;;  %v1307_v42 = vpop.eup %1306  ;;  %1310 = vrcp.f32 %v826_v19  ;;  %v811_v43 = vadd.f32 1.0, %v1305_v34  ;;  %v266_v19 = vld [vmem:[%s1535_s13 + $0x80] sm:$0xff] }
  0xf9   : > { %v564_v44 = vadd.f32 %v563_v37, %v260_v30  ;;  %921 = vst.msk [vmem:[%s1554_s16 + $0xb0] sm:$0xff] %vm480_vm0, %v889_v14  ;;  %v874_v46 = vmul.f32 %v1307_v42, %v1622_v41  ;;  %1312 = vpow2.f32 %v757_v18  ;;  %v1670_v47 = vadd.f32 %v689_v7, %v601_v39  ;;  %v694_v7 = vpop.f32.mrf.mxu3  ;;  %v263_v14 = vld [vmem:[%s1535_s13 + $0x68] sm:$0xff] }
  0xfa   : > { %1314 = vrcp.f32 %v811_v43 }
  0xfb   : > { %v1673_v40 = vadd.f32 %v1613_v35, %v564_v44  ;;  %906 = vst.msk [vmem:[%s1554_s16 + $0x38] sm:$0xff] %vm480_vm0, %v874_v46  ;;  %v732_v48 = vsub.f32 0.0, %v1670_v47 }
  0xfd   : > { %v717_v49 = vsub.f32 0.0, %v1673_v40  ;;  %v1309_v51 = vpop.eup %1308  ;;  %v789_v38 = vmul.f32 1.442695, %v732_v48 }
  0xfe   : > { %v1311_v36 = vpop.eup %1310  ;;  %v827_v41 = vadd.f32 1.0, %v1309_v51  ;;  %v603_v55 = vpop.f32.mrf.mxu2 }
  0xff   : > { %v759_v54 = vmul.f32 1.442695, %v717_v49  ;;  %v1313_v56 = vpop.eup %1312  ;;  %v890_v60 = vmul.f32 %v1311_v36, %v1636_v1  ;;  %1316 = vpow2.f32 %v789_v38  ;;  %v604_v35 = vadd.f32 %v603_v55, %v276_v50  ;;  %v1682_v6 = vpop.f32.mrf.mxu1 }
 0x100   : > { %v565_v61 = vpop.f32.mrf.mxu0  ;;  %v1315_v0 = vpop.eup %1314  ;;  %1318 = vrcp.f32 %v827_v41  ;;  %v812_v2 = vadd.f32 1.0, %v1313_v56  ;;  %v267_v41 = vld [vmem:[%s1535_s13 + $0x88] sm:$0xff] }
 0x101   : > { %v566_v4 = vadd.f32 %v565_v61, %v261_v52  ;;  %922 = vst.msk [vmem:[%s1554_s16 + $0xb8] sm:$0xff] %vm480_vm0, %v890_v60  ;;  %v875_v5 = vmul.f32 %v1315_v0, %v1639_v58  ;;  %1320 = vpow2.f32 %v759_v54  ;;  %v1687_v8 = vadd.f32 %v692_v33, %v604_v35  ;;  %v697_v30 = vpop.f32.mrf.mxu3  ;;  %v264_v0 = vld [vmem:[%s1535_s13 + $0x70] sm:$0xff] }
 0x102   : > { %1322 = vrcp.f32 %v812_v2 }
 0x103   : > { %v1690_v1 = vadd.f32 %v1631_v62, %v566_v4  ;;  %907 = vst.msk [vmem:[%s1554_s16 + $0x40] sm:$0xff] %vm480_vm0, %v875_v5  ;;  %v733_v9 = vsub.f32 0.0, %v1687_v8  ;;  %v581_v4 = vadd.f32 %v1542_v63, %v267_v41 }
 0x105   : > { %v718_v59 = vsub.f32 0.0, %v1690_v1  ;;  %v1317_v3 = vpop.eup %1316  ;;  %v791_v11 = vmul.f32 1.442695, %v733_v9 }
 0x106   : > { %v1319_v57 = vpop.eup %1318  ;;  %v828_v58 = vadd.f32 1.0, %v1317_v3  ;;  %v605_v15 = vpop.f32.mrf.mxu2 }
 0x107   : > { %v761_v13 = vmul.f32 1.442695, %v718_v59  ;;  %v1321_v16 = vpop.eup %1320  ;;  %v891_v20 = vmul.f32 %v1319_v57, %v1653_v25  ;;  %1324 = vpow2.f32 %v791_v11  ;;  %v606_v62 = vadd.f32 %v605_v15, %v277_v10  ;;  %v1699_v28 = vpop.f32.mrf.mxu1 }
 0x108   : > { %v568_v21 = vpop.f32.mrf.mxu0  ;;  %v1323_v23 = vpop.eup %1322  ;;  %1326 = vrcp.f32 %v828_v58  ;;  %v813_v26 = vadd.f32 1.0, %v1321_v16 }
 0x109   : > { %v569_v27 = vadd.f32 %v568_v21, %v262_v12  ;;  %923 = vst.msk [vmem:[%s1554_s16 + $0xc0] sm:$0xff] %vm480_vm0, %v891_v20  ;;  %v876_v29 = vmul.f32 %v1323_v23, %v1656_v17  ;;  %1328 = vpow2.f32 %v761_v13  ;;  %v1704_v24 = vadd.f32 %v694_v7, %v606_v62  ;;  %v699_v60 = vpop.f32.mrf.mxu3  ;;  %v280_v23 = vld [vmem:[%s1535_s13 + $0xf0] sm:$0xff] }
 0x10a   : > { %1330 = vrcp.f32 %v813_v26 }
 0x10b   : > { %v1707_v25 = vadd.f32 %v1648_v22, %v569_v27  ;;  %908 = vst.msk [vmem:[%s1554_s16 + $0x48] sm:$0xff] %vm480_vm0, %v876_v29  ;;  %v734_v31 = vsub.f32 0.0, %v1704_v24  ;;  %v579_v22 = vadd.f32 %v1539_v53, %v266_v19  ;;  %v265_v27 = vld [vmem:[%s1535_s13 + $0x78] sm:$0xff] }
 0x10d   : > { %v719_v18 = vsub.f32 0.0, %v1707_v25  ;;  %v1325_v33 = vpop.eup %1324  ;;  %v793_v34 = vmul.f32 1.442695, %v734_v31 }
 0x10e   : > { %v1327_v17 = vpop.eup %1326  ;;  %v829_v39 = vadd.f32 1.0, %v1325_v33  ;;  %v608_v42 = vpop.f32.mrf.mxu2 }
 0x10f   : > { %v763_v37 = vmul.f32 1.442695, %v719_v18  ;;  %v1329_v43 = vpop.eup %1328  ;;  %v892_v44 = vmul.f32 %v1327_v17, %v1670_v47  ;;  %1332 = vpow2.f32 %v793_v34  ;;  %v609_v46 = vadd.f32 %v608_v42, %v278_v32  ;;  %v667_v38 = vpop.f32.mrf.mxu1 }
 0x110   : > { %v570_v48 = vpop.f32.mrf.mxu0  ;;  %v1331_v49 = vpop.eup %1330  ;;  %1334 = vrcp.f32 %v829_v39  ;;  %v814_v50 = vadd.f32 1.0, %v1329_v43  ;;  %v1723_v47 = vadd.f32 %v667_v38, %v579_v22 }
 0x111   : > { %v571_v51 = vadd.f32 %v570_v48, %v263_v14  ;;  %924 = vst.msk [vmem:[%s1554_s16 + $0xc8] sm:$0xff] %vm480_vm0, %v892_v44  ;;  %v877_v52 = vmul.f32 %v1331_v49, %v1673_v40  ;;  %1336 = vpow2.f32 %v763_v37  ;;  %v1721_v53 = vadd.f32 %v697_v30, %v609_v46  ;;  %v279_v40 = vld [vmem:[%s1535_s13 + $0xe8] sm:$0xff]  ;;  %v702_v19 = vpop.f32.mrf.mxu3  ;;  %v281_v49 = vld [vmem:[%s1535_s13 + $0xf8] sm:$0xff] }
 0x112   : > { %1338 = vrcp.f32 %v814_v50  ;;  %v723_v55 = vsub.f32 0.0, %v1723_v47 }
 0x113   : > { %v1726_v36 = vadd.f32 %v1665_v45, %v571_v51  ;;  %909 = vst.msk [vmem:[%s1554_s16 + $0x50] sm:$0xff] %vm480_vm0, %v877_v52  ;;  %v735_v54 = vsub.f32 0.0, %v1721_v53 }
 0x114   : > { %v771_v10 = vmul.f32 1.442695, %v723_v55 }
 0x115   : > { %v720_v56 = vsub.f32 0.0, %v1726_v36  ;;  %v1333_v35 = vpop.eup %1332  ;;  %v795_v61 = vmul.f32 1.442695, %v735_v54 }
 0x116   : > { %v1335_v2 = vpop.eup %1334  ;;  %v830_v45 = vadd.f32 1.0, %v1333_v35  ;;  %v610_v5 = vpop.f32.mrf.mxu2 }
 0x117   : > { %v765_v7 = vmul.f32 1.442695, %v720_v56  ;;  %v1337_v9 = vpop.eup %1336  ;;  %v893_v59 = vmul.f32 %v1335_v2, %v1687_v8  ;;  %1340 = vpow2.f32 %v795_v61  ;;  %v611_v3 = vadd.f32 %v610_v5, %v279_v40  ;;  %v669_v13 = vpop.f32.mrf.mxu1 }
 0x118   : > { %v573_v11 = vpop.f32.mrf.mxu0  ;;  %v1339_v12 = vpop.eup %1338  ;;  %1342 = vrcp.f32 %v830_v45  ;;  %v815_v57 = vadd.f32 1.0, %v1337_v9  ;;  %v1743_v8 = vadd.f32 %v669_v13, %v581_v4 }
 0x119   : > { %v574_v58 = vadd.f32 %v573_v11, %v264_v0  ;;  %925 = vst.msk [vmem:[%s1554_s16 + $0xd0] sm:$0xff] %vm480_vm0, %v893_v59  ;;  %v878_v63 = vmul.f32 %v1339_v12, %v1690_v1  ;;  %1344 = vpow2.f32 %v765_v7  ;;  %v1741_v15 = vadd.f32 %v699_v60, %v611_v3  ;;  %v704_v40 = vpop.f32.mrf.mxu3 }
 0x11a   : > { %1346 = vrcp.f32 %v815_v57  ;;  %v724_v62 = vsub.f32 0.0, %v1743_v8 }
 0x11b   : > { %v1746_v16 = vadd.f32 %v1682_v6, %v574_v58  ;;  %910 = vst.msk [vmem:[%s1554_s16 + $0x58] sm:$0xff] %vm480_vm0, %v878_v63  ;;  %1348 = vpow2.f32 %v771_v10  ;;  %v736_v20 = vsub.f32 0.0, %v1741_v15 }
 0x11c   : > { %v773_v33 = vmul.f32 1.442695, %v724_v62 }
 0x11d   : > { %v721_v21 = vsub.f32 0.0, %v1746_v16  ;;  %v1341_v1 = vpop.eup %1340  ;;  %v797_v26 = vmul.f32 1.442695, %v736_v20 }
 0x11e   : > { %v1343_v29 = vpop.eup %1342  ;;  %v831_v30 = vadd.f32 1.0, %v1341_v1  ;;  %v613_v6 = vpop.f32.mrf.mxu2 }
 0x11f   : > { %v767_v31 = vmul.f32 1.442695, %v721_v21  ;;  %v1345_v18 = vpop.eup %1344  ;;  %v894_v32 = vmul.f32 %v1343_v29, %v1704_v24  ;;  %1350 = vpow2.f32 %v797_v26  ;;  %v614_v34 = vadd.f32 %v613_v6, %v280_v23 }
 0x120   : > { %v575_v14 = vpop.f32.mrf.mxu0  ;;  %v1347_v17 = vpop.eup %1346  ;;  %1352 = vrcp.f32 %v831_v30  ;;  %v816_v39 = vadd.f32 1.0, %v1345_v18 }
 0x121   : > { %v576_v37 = vadd.f32 %v575_v14, %v265_v27  ;;  %v1349_v42 = vpop.eup %1348  ;;  %926 = vst.msk [vmem:[%s1554_s16 + $0xd8] sm:$0xff] %vm480_vm0, %v894_v32  ;;  %v879_v43 = vmul.f32 %v1347_v17, %v1707_v25  ;;  %1354 = vpow2.f32 %v767_v31  ;;  %v703_v22 = vadd.f32 %v702_v19, %v614_v34 }
 0x122   : > { %1356 = vrcp.f32 %v816_v39  ;;  %v819_v44 = vadd.f32 1.0, %v1349_v42 }
 0x123   : > { %v665_v24 = vadd.f32 %v1699_v28, %v576_v37  ;;  %911 = vst.msk [vmem:[%s1554_s16 + $0x60] sm:$0xff] %vm480_vm0, %v879_v43  ;;  %1358 = vpow2.f32 %v773_v33  ;;  %v737_v46 = vsub.f32 0.0, %v703_v22 }
 0x124   : > { %1360 = vrcp.f32 %v819_v44 }
 0x125   : > { %v722_v48 = vsub.f32 0.0, %v665_v24  ;;  %v1351_v50 = vpop.eup %1350  ;;  %v799_v51 = vmul.f32 1.442695, %v737_v46 }
 0x126   : > { %v1353_v38 = vpop.eup %1352  ;;  %v832_v52 = vadd.f32 1.0, %v1351_v50  ;;  %v615_v25 = vpop.f32.mrf.mxu2 }
 0x127   : > { %v769_v41 = vmul.f32 1.442695, %v722_v48  ;;  %v1355_v54 = vpop.eup %1354  ;;  %v895_v55 = vmul.f32 %v1353_v38, %v1721_v53  ;;  %1362 = vpow2.f32 %v799_v51  ;;  %v616_v28 = vadd.f32 %v615_v25, %v281_v49 }
 0x128   : > { %v1357_v56 = vpop.eup %1356  ;;  %1364 = vrcp.f32 %v832_v52  ;;  %v817_v60 = vadd.f32 1.0, %v1355_v54 }
 0x129   : > { %v1359_v35 = vpop.eup %1358  ;;  %927 = vst.msk [vmem:[%s1554_s16 + $0xe0] sm:$0xff] %vm480_vm0, %v895_v55  ;;  %v880_v61 = vmul.f32 %v1357_v56, %v1726_v36  ;;  %1366 = vpow2.f32 %v769_v41  ;;  %v705_v0 = vadd.f32 %v704_v40, %v616_v28 }
 0x12a   : > { %v1361_v2 = vpop.eup %1360  ;;  %1368 = vrcp.f32 %v817_v60  ;;  %v820_v4 = vadd.f32 1.0, %v1359_v35 }
 0x12b   : > { %912 = vst.msk [vmem:[%s1554_s16 + $0x68] sm:$0xff] %vm480_vm0, %v880_v61  ;;  %v883_v53 = vmul.f32 %v1361_v2, %v1723_v47  ;;  %v738_v45 = vsub.f32 0.0, %v705_v0 }
 0x12c   : > { %1370 = vrcp.f32 %v820_v4 }
 0x12d   : > { %v1363_v7 = vpop.eup %1362  ;;  %915 = vst.msk [vmem:[%s1554_s16 + $0x80] sm:$0xff] %vm480_vm0, %v883_v53  ;;  %v801_v5 = vmul.f32 1.442695, %v738_v45 }
 0x12e   : > { %v1365_v9 = vpop.eup %1364  ;;  %v833_v36 = vadd.f32 1.0, %v1363_v7 }
 0x12f   : > { %v1367_v59 = vpop.eup %1366  ;;  %v896_v10 = vmul.f32 %v1365_v9, %v1741_v15  ;;  %1372 = vpow2.f32 %v801_v5 }
 0x130   : > { %v1369_v3 = vpop.eup %1368  ;;  %1374 = vrcp.f32 %v833_v36  ;;  %v818_v11 = vadd.f32 1.0, %v1367_v59 }
 0x131   : > { %928 = vst.msk [vmem:[%s1554_s16 + $0xe8] sm:$0xff] %vm480_vm0, %v896_v10  ;;  %v881_v47 = vmul.f32 %v1369_v3, %v1746_v16 }
 0x132   : > { %v1371_v12 = vpop.eup %1370  ;;  %1376 = vrcp.f32 %v818_v11 }
 0x133   : > { %913 = vst.msk [vmem:[%s1554_s16 + $0x70] sm:$0xff] %vm480_vm0, %v881_v47  ;;  %v884_v57 = vmul.f32 %v1371_v12, %v1743_v8 }
 0x135   : > { %v1373_v58 = vpop.eup %1372  ;;  %916 = vst.msk [vmem:[%s1554_s16 + $0x88] sm:$0xff] %vm480_vm0, %v884_v57 }
 0x136   : > { %v1375_v13 = vpop.eup %1374  ;;  %v834_v63 = vadd.f32 1.0, %v1373_v58 }
 0x137   : > { %v897_v15 = vmul.f32 %v1375_v13, %v703_v22 }
 0x138   : > { %v1377_v20 = vpop.eup %1376  ;;  %1378 = vrcp.f32 %v834_v63 }
 0x139   : > { %929 = vst.msk [vmem:[%s1554_s16 + $0xf0] sm:$0xff] %vm480_vm0, %v897_v15  ;;  %v882_v62 = vmul.f32 %v1377_v20, %v665_v24 }
 0x13b   : > { %914 = vst.msk [vmem:[%s1554_s16 + $0x78] sm:$0xff] %vm480_vm0, %v882_v62 }
 0x13e   : > { %v1379_v16 = vpop.eup %1378 }
 0x13f   : > { %v898_v21 = vmul.f32 %v1379_v16, %v705_v0 }
 0x141   : > { %930 = vst.msk [vmem:[%s1554_s16 + $0xf8] sm:$0xff] %vm480_vm0, %v898_v21 }
 0x142 PF: > { %s13_s12 = sadd.s32 1, %s1386_s12  }
 0x143   : > { %p10_p4 = scmp.ge.s32.totalorder %s13_s12, 4  }
 0x145   :  { %12 = sbr.rel (!%p10_p4) target bundleno = 1 (0x1), region = 65 }

// kernel: forward.27
= control target key start
LH: loop header
LB: loop body
LE: loop exit
PB: predicated region body
PF: predicated region fallthrough
CT: control target
= control target key end

     0   :  { %vm172_vm0 = vcmask 130048   ;;  %vm391_vm1 = vcmask 261120   ;;  %s872_s1 = inlined_call_operand.vmem [shape: bf16[144,32], index: 1, kind: input, shape index: {}]   ;;  %s873_s0 = inlined_call_operand.vmem [shape: bf16[128,144], index: 0, kind: input, shape index: {}]   ;;  %s874_s2 = inlined_call_operand.vmem [shape: f32[128,32], index: 2, kind: output, shape index: {}]  }
   0x1   :  { %v543_v0 = vld [vmem:[%s872_s1 + $0x38] sm:$0xff]  ;;  %v544_v1 = vld [vmem:[%s872_s1 + $0x40] sm:$0xff]  ;;  %v416_v3 = vld [vmem:[%s873_s0 + $0x8] sm:$0xf0] }
   0x2   :  { %v520_v2 = vld [vmem:[%s873_s0 + $0x4] sm:$0xf]  ;;  %197 = vmatpush.bf16.msra.mxu0 %v543_v0  ;;  %545 = vmatpush.bf16.msra.mxu2 %v543_v0  ;;  %v542_v5 = vld [vmem:[%s872_s1 + $0x30] sm:$0xff]  ;;  %v541_v6 = vld [vmem:[%s872_s1 + $0x28] sm:$0xff] }
   0x3   :  { %v419_v4 = vor.u32 %v520_v2, %v416_v3  ;;  %253 = vmatpush.bf16.msra.mxu1 %v544_v1  ;;  %553 = vmatpush.bf16.msra.mxu3 %v544_v1  ;;  %v530_v7 = vld [vmem:[%s873_s0 + $0x54] sm:$0xf]  ;;  %v456_v8 = vld [vmem:[%s873_s0 + $0x58] sm:$0xf0]  ;;  %v540_v10 = vld [vmem:[%s872_s1 + $0x20] sm:$0xff] }
   0x4   :  { %v459_v9 = vor.u32 %v530_v7, %v456_v8  ;;  %v539_v11 = vld [vmem:[%s872_s1 + $0x18] sm:$0xff]  ;;  %v522_v12 = vld [vmem:[%s873_s0 + $0x14] sm:$0xf]  ;;  %v537_v16 = vld [vmem:[%s872_s1 + $0x8] sm:$0xff] }
   0x5   :  { %v424_v13 = vld [vmem:[%s873_s0 + $0x18] sm:$0xf0]  ;;  %v538_v15 = vld [vmem:[%s872_s1 + $0x10] sm:$0xff]  ;;  %v532_v17 = vld [vmem:[%s873_s0 + $0x64] sm:$0xf] }
   0x6   :  { %512 = vmatmul.msk.bf16.vlgmr.msra.gmra.mxu1 %vm172_vm0, %v419_v4  ;;  %198 = vmatpush.bf16.msra.mxu0 %v542_v5  ;;  %v427_v14 = vor.u32 %v522_v12, %v424_v13  ;;  %v464_v18 = vld [vmem:[%s873_s0 + $0x68] sm:$0xf0]  ;;  %v536_v20 = vld [vmem:[%s872_s1] sm:$0xff]  ;;  %v521_v22 = vld [vmem:[%s873_s0 + $0x4] sm:$0xf0] }
   0x7   :  { %546 = vmatpush.bf16.msra.mxu2 %v542_v5  ;;  %517 = vmatmul.msk.bf16.vlgmr.msra.gmra.mxu3 %vm172_vm0, %v459_v9  ;;  %v467_v19 = vor.u32 %v532_v17, %v464_v18  ;;  %v414_v21 = vld [vmem:[%s873_s0] sm:$0xf]  ;;  %v529_v24 = vld [vmem:[%s873_s0 + $0x44] sm:$0xf0]  ;;  %v524_v27 = vld [vmem:[%s873_s0 + $0x24] sm:$0xf] }
   0x8   :  { %v446_v23 = vld [vmem:[%s873_s0 + $0x40] sm:$0xf]  ;;  %v415_v25 = vor.u32 %v521_v22, %v414_v21  ;;  %v432_v28 = vld [vmem:[%s873_s0 + $0x28] sm:$0xf0]  ;;  %v534_v30 = vld [vmem:[%s873_s0 + $0x74] sm:$0xf] }
   0x9   :  { %v447_v26 = vor.u32 %v529_v24, %v446_v23  ;;  %v435_v29 = vor.u32 %v524_v27, %v432_v28  ;;  %v472_v31 = vld [vmem:[%s873_s0 + $0x78] sm:$0xf0]  ;;  %v422_v33 = vld [vmem:[%s873_s0 + $0x10] sm:$0xf]  ;;  %v523_v34 = vld [vmem:[%s873_s0 + $0x14] sm:$0xf0] }
   0xa   :  { %199 = vmatpush.bf16.msra.mxu0 %v541_v6  ;;  %v475_v32 = vor.u32 %v534_v30, %v472_v31  ;;  %v454_v35 = vld [vmem:[%s873_s0 + $0x50] sm:$0xf]  ;;  %v531_v36 = vld [vmem:[%s873_s0 + $0x54] sm:$0xf0]  ;;  %v423_v37 = vor.u32 %v523_v34, %v422_v33  ;;  %v526_v39 = vld [vmem:[%s873_s0 + $0x34] sm:$0xf] }
   0xb   :  { %547 = vmatpush.bf16.msra.mxu2 %v541_v6  ;;  %v455_v38 = vor.u32 %v531_v36, %v454_v35  ;;  %v440_v40 = vld [vmem:[%s873_s0 + $0x38] sm:$0xf0]  ;;  %v430_v42 = vld [vmem:[%s873_s0 + $0x20] sm:$0xf]  ;;  %v525_v43 = vld [vmem:[%s873_s0 + $0x24] sm:$0xf0] }
   0xc   :  { %v443_v41 = vor.u32 %v526_v39, %v440_v40  ;;  %v462_v44 = vld [vmem:[%s873_s0 + $0x60] sm:$0xf]  ;;  %v533_v45 = vld [vmem:[%s873_s0 + $0x64] sm:$0xf0]  ;;  %v431_v46 = vor.u32 %v525_v43, %v430_v42  ;;  %v528_v48 = vld [vmem:[%s873_s0 + $0x44] sm:$0xf] }
   0xd   :  { %v463_v47 = vor.u32 %v533_v45, %v462_v44  ;;  %v448_v49 = vld [vmem:[%s873_s0 + $0x48] sm:$0xf0]  ;;  %v438_v51 = vld [vmem:[%s873_s0 + $0x30] sm:$0xf]  ;;  %v527_v52 = vld [vmem:[%s873_s0 + $0x34] sm:$0xf0] }
   0xe   :  { %200 = vmatpush.bf16.msra.mxu0 %v540_v10  ;;  %v451_v50 = vor.u32 %v528_v48, %v448_v49  ;;  %v470_v53 = vld [vmem:[%s873_s0 + $0x70] sm:$0xf]  ;;  %v535_v54 = vld [vmem:[%s873_s0 + $0x74] sm:$0xf0]  ;;  %v439_v55 = vor.u32 %v527_v52, %v438_v51 }
   0xf   :  { %548 = vmatpush.bf16.msra.mxu2 %v540_v10  ;;  %v471_v56 = vor.u32 %v535_v54, %v470_v53 }
  0x12   :  { %201 = vmatpush.bf16.msra.mxu0 %v539_v11 }
  0x13   :  { %549 = vmatpush.bf16.msra.mxu2 %v539_v11 }
  0x16   :  { %513 = vmatmul.msk.bf16.gmra.mxu1 %vm172_vm0, %v427_v14  ;;  %202 = vmatpush.bf16.msra.mxu0 %v538_v15 }
  0x17   :  { %550 = vmatpush.bf16.msra.mxu2 %v538_v15  ;;  %518 = vmatmul.msk.bf16.gmra.mxu3 %vm172_vm0, %v467_v19 }
  0x1a   :  { %203 = vmatpush.bf16.msra.mxu0 %v537_v16 }
  0x1b   :  { %551 = vmatpush.bf16.msra.mxu2 %v537_v16 }
  0x1e   :  { %204 = vmatpush.bf16.msra.mxu0 %v536_v20 }
  0x1f   :  { %552 = vmatpush.bf16.msra.mxu2 %v536_v20 }
  0x21   :  { %205 = vmatmul.bf16.vlgmr.msra.gmra.mxu0 %v415_v25 }
  0x22   :  { %225 = vmatmul.bf16.vlgmr.msra.gmra.mxu2 %v447_v26 }
  0x26   :  { %514 = vmatmul.msk.bf16.gmra.mxu1 %vm172_vm0, %v435_v29 }
  0x27   :  { %519 = vmatmul.msk.bf16.gmra.mxu3 %vm172_vm0, %v475_v32 }
  0x31   :  { %210 = vmatmul.bf16.gmra.mxu0 %v423_v37 }
  0x32   :  { %230 = vmatmul.bf16.gmra.mxu2 %v455_v38 }
  0x36   :  { %515 = vmatmul.msk.bf16.gmra.mxu1 %vm172_vm0, %v443_v41 }
  0x41   :  { %215 = vmatmul.bf16.gmra.mxu0 %v431_v46 }
  0x42   :  { %235 = vmatmul.bf16.gmra.mxu2 %v463_v47 }
  0x46   :  { %516 = vmatmul.msk.bf16.gmra.mxu1 %vm172_vm0, %v451_v50 }
  0x51   :  { %220 = vmatmul.bf16.gmra.mxu0 %v439_v55 }
  0x52   :  { %240 = vmatmul.bf16.gmra.mxu2 %v471_v56 }
  0x83   :  { %v255_v57 = vpop.f32.mrf.mxu1 }
  0x8a   :  { %v280_v9 = vpop.f32.mrf.mxu3 }
  0x8b   :  { %v257_v58 = vpop.f32.mrf.mxu1 }
  0x92   :  { %v282_v22 = vpop.f32.mrf.mxu3 }
  0x93   :  { %v260_v59 = vpop.f32.mrf.mxu1 }
  0x9a   :  { %v285_v38 = vpop.f32.mrf.mxu3 }
  0x9b   :  { %v262_v60 = vpop.f32.mrf.mxu1 }
  0x9e   :  { %v206_v61 = vpop.f32.mrf.mxu0 }
  0x9f   :  { %v256_v62 = vadd.f32 %v255_v57, %v206_v61 }
  0xa1   :  { %v295_v63 = vsub.f32 0.0, %v256_v62 }
  0xa3   :  { %v311_v0 = vmul.f32 1.442695, %v295_v63  ;;  %v265_v1 = vpop.f32.mrf.mxu1 }
  0xa5   :  { %554 = vpow2.f32 %v311_v0  ;;  %v226_v2 = vpop.f32.mrf.mxu2 }
  0xa6   :  { %v208_v3 = vpop.f32.mrf.mxu0 }
  0xa7   :  { %v258_v4 = vadd.f32 %v257_v58, %v208_v3 }
  0xa9   :  { %v296_v5 = vsub.f32 0.0, %v258_v4 }
  0xab   :  { %v555_v6 = vpop.eup %554  ;;  %v313_v7 = vmul.f32 1.442695, %v296_v5  ;;  %v764_v8 = vpop.f32.mrf.mxu1 }
  0xac   :  { %v343_v10 = vadd.f32 1.0, %v555_v6 }
  0xad   :  { %556 = vpow2.f32 %v313_v7  ;;  %v766_v11 = vpop.f32.mrf.mxu2 }
  0xae   :  { %558 = vrcp.f32 %v343_v10  ;;  %v211_v12 = vpop.f32.mrf.mxu0 }
  0xaf   :  { %v261_v13 = vadd.f32 %v260_v59, %v211_v12  ;;  %v287_v59 = vpop.f32.mrf.mxu3 }
  0xb1   :  { %v297_v14 = vsub.f32 0.0, %v261_v13 }
  0xb3   :  { %v557_v15 = vpop.eup %556  ;;  %v315_v16 = vmul.f32 1.442695, %v297_v14  ;;  %v768_v17 = vpop.f32.mrf.mxu1 }
  0xb4   :  { %v559_v18 = vpop.eup %558  ;;  %v344_v19 = vadd.f32 1.0, %v557_v15 }
  0xb5   :  { %v375_v20 = vmul.f32 %v559_v18, %v256_v62  ;;  %560 = vpow2.f32 %v315_v16  ;;  %v231_v21 = vpop.f32.mrf.mxu2 }
  0xb6   :  { %562 = vrcp.f32 %v344_v19  ;;  %v281_v23 = vadd.f32 %v280_v9, %v231_v21  ;;  %v213_v24 = vpop.f32.mrf.mxu0 }
  0xb7   :  { %392 = vst.msk [vmem:[%s874_s2] sm:$0xff] %vm391_vm1, %v375_v20  ;;  %v263_v25 = vadd.f32 %v262_v60, %v213_v24  ;;  %v290_v24 = vpop.f32.mrf.mxu3 }
  0xb8   :  { %v305_v26 = vsub.f32 0.0, %v281_v23 }
  0xb9   :  { %v298_v27 = vsub.f32 0.0, %v263_v25 }
  0xba   :  { %v331_v28 = vmul.f32 1.442695, %v305_v26 }
  0xbb   :  { %v561_v29 = vpop.eup %560  ;;  %v317_v30 = vmul.f32 1.442695, %v298_v27  ;;  %v774_v31 = vpop.f32.mrf.mxu1 }
  0xbc   :  { %v563_v32 = vpop.eup %562  ;;  %v345_v33 = vadd.f32 1.0, %v561_v29  ;;  %564 = vpow2.f32 %v331_v28 }
  0xbd   :  { %v376_v34 = vmul.f32 %v563_v32, %v258_v4  ;;  %566 = vpow2.f32 %v317_v30  ;;  %v233_v35 = vpop.f32.mrf.mxu2 }
  0xbe   :  { %568 = vrcp.f32 %v345_v33  ;;  %v776_v36 = vadd.f32 %v282_v22, %v233_v35  ;;  %v216_v37 = vpop.f32.mrf.mxu0 }
  0xbf   :  { %393 = vst.msk [vmem:[%s874_s2 + $0x8] sm:$0xff] %vm391_vm1, %v376_v34  ;;  %v782_v39 = vadd.f32 %v265_v1, %v216_v37 }
  0xc0   :  { %v306_v40 = vsub.f32 0.0, %v776_v36 }
  0xc1   :  { %v299_v41 = vsub.f32 0.0, %v782_v39 }
  0xc2   :  { %v565_v42 = vpop.eup %564  ;;  %v333_v43 = vmul.f32 1.442695, %v306_v40 }
  0xc3   :  { %v567_v44 = vpop.eup %566  ;;  %v353_v45 = vadd.f32 1.0, %v565_v42  ;;  %v319_v46 = vmul.f32 1.442695, %v299_v41  ;;  %v275_v47 = vpop.f32.mrf.mxu1 }
  0xc4   :  { %v569_v48 = vpop.eup %568  ;;  %v346_v49 = vadd.f32 1.0, %v567_v44  ;;  %570 = vpow2.f32 %v333_v43  ;;  %v786_v50 = vadd.f32 %v275_v47, %v226_v2 }
  0xc5   :  { %v377_v51 = vmul.f32 %v569_v48, %v261_v13  ;;  %572 = vrcp.f32 %v353_v45  ;;  %v236_v52 = vpop.f32.mrf.mxu2 }
  0xc6   :  { %574 = vrcp.f32 %v346_v49  ;;  %v303_v53 = vsub.f32 0.0, %v786_v50  ;;  %v789_v54 = vadd.f32 %v285_v38, %v236_v52  ;;  %v218_v55 = vpop.f32.mrf.mxu0  ;;  %v292_v49 = vpop.f32.mrf.mxu3 }
  0xc7   :  { %394 = vst.msk [vmem:[%s874_s2 + $0x10] sm:$0xff] %vm391_vm1, %v377_v51  ;;  %576 = vpow2.f32 %v319_v46  ;;  %v796_v56 = vadd.f32 %v764_v8, %v218_v55 }
  0xc8   :  { %v327_v57 = vmul.f32 1.442695, %v303_v53  ;;  %v307_v58 = vsub.f32 0.0, %v789_v54 }
  0xc9   :  { %v300_v60 = vsub.f32 0.0, %v796_v56 }
  0xca   :  { %v571_v61 = vpop.eup %570  ;;  %578 = vpow2.f32 %v327_v57  ;;  %v335_v62 = vmul.f32 1.442695, %v307_v58 }
  0xcb   :  { %v573_v63 = vpop.eup %572  ;;  %v354_v0 = vadd.f32 1.0, %v571_v61  ;;  %v321_v1 = vmul.f32 1.442695, %v300_v60  ;;  %v277_v2 = vpop.f32.mrf.mxu1 }
  0xcc   :  { %v575_v3 = vpop.eup %574  ;;  %v385_v4 = vmul.f32 %v573_v63, %v281_v23  ;;  %580 = vpow2.f32 %v335_v62  ;;  %v801_v5 = vadd.f32 %v277_v2, %v766_v11 }
  0xcd   :  { %v577_v6 = vpop.eup %576  ;;  %v378_v7 = vmul.f32 %v575_v3, %v263_v25  ;;  %582 = vrcp.f32 %v354_v0  ;;  %v238_v8 = vpop.f32.mrf.mxu2 }
  0xce   :  { %402 = vst.msk [vmem:[%s874_s2 + $0x50] sm:$0xff] %vm391_vm1, %v385_v4  ;;  %v347_v9 = vadd.f32 1.0, %v577_v6  ;;  %584 = vpow2.f32 %v321_v1  ;;  %v304_v10 = vsub.f32 0.0, %v801_v5  ;;  %v808_v12 = vadd.f32 %v287_v59, %v238_v8  ;;  %v221_v13 = vpop.f32.mrf.mxu0 }
  0xcf   :  { %395 = vst.msk [vmem:[%s874_s2 + $0x18] sm:$0xff] %vm391_vm1, %v378_v7  ;;  %v815_v11 = vadd.f32 %v768_v17, %v221_v13 }
  0xd0   :  { %v579_v14 = vpop.eup %578  ;;  %586 = vrcp.f32 %v347_v9  ;;  %v329_v15 = vmul.f32 1.442695, %v304_v10  ;;  %v308_v16 = vsub.f32 0.0, %v808_v12 }
  0xd1   :  { %v351_v18 = vadd.f32 1.0, %v579_v14  ;;  %v301_v19 = vsub.f32 0.0, %v815_v11 }
  0xd2   :  { %v581_v20 = vpop.eup %580  ;;  %588 = vpow2.f32 %v329_v15  ;;  %v337_v21 = vmul.f32 1.442695, %v308_v16 }
  0xd3   :  { %v583_v22 = vpop.eup %582  ;;  %590 = vrcp.f32 %v351_v18  ;;  %v355_v23 = vadd.f32 1.0, %v581_v20  ;;  %v323_v25 = vmul.f32 1.442695, %v301_v19 }
  0xd4   :  { %v585_v26 = vpop.eup %584  ;;  %v386_v17 = vmul.f32 %v583_v22, %v776_v36  ;;  %592 = vpow2.f32 %v337_v21 }
  0xd5   :  { %594 = vrcp.f32 %v355_v23  ;;  %v348_v27 = vadd.f32 1.0, %v585_v26  ;;  %v241_v28 = vpop.f32.mrf.mxu2 }
  0xd6   :  { %v587_v29 = vpop.eup %586  ;;  %403 = vst.msk [vmem:[%s874_s2 + $0x58] sm:$0xff] %vm391_vm1, %v386_v17  ;;  %596 = vpow2.f32 %v323_v25  ;;  %v291_v30 = vadd.f32 %v290_v24, %v241_v28  ;;  %v223_v32 = vpop.f32.mrf.mxu0 }
  0xd7   :  { %v379_v33 = vmul.f32 %v587_v29, %v782_v39  ;;  %598 = vrcp.f32 %v348_v27  ;;  %v273_v34 = vadd.f32 %v774_v31, %v223_v32 }
  0xd8   :  { %v589_v35 = vpop.eup %588  ;;  %v309_v36 = vsub.f32 0.0, %v291_v30 }
  0xd9   :  { %v591_v37 = vpop.eup %590  ;;  %396 = vst.msk [vmem:[%s874_s2 + $0x20] sm:$0xff] %vm391_vm1, %v379_v33  ;;  %v352_v38 = vadd.f32 1.0, %v589_v35  ;;  %v302_v40 = vsub.f32 0.0, %v273_v34 }
  0xda   :  { %v593_v41 = vpop.eup %592  ;;  %v383_v42 = vmul.f32 %v591_v37, %v786_v50  ;;  %v339_v43 = vmul.f32 1.442695, %v309_v36 }
  0xdb   :  { %v595_v44 = vpop.eup %594  ;;  %600 = vrcp.f32 %v352_v38  ;;  %v356_v39 = vadd.f32 1.0, %v593_v41  ;;  %v325_v45 = vmul.f32 1.442695, %v302_v40 }
  0xdc   :  { %v597_v46 = vpop.eup %596  ;;  %400 = vst.msk [vmem:[%s874_s2 + $0x40] sm:$0xff] %vm391_vm1, %v383_v42  ;;  %v387_v31 = vmul.f32 %v595_v44, %v789_v54  ;;  %602 = vpow2.f32 %v339_v43 }
  0xdd   :  { %v599_v47 = vpop.eup %598  ;;  %604 = vrcp.f32 %v356_v39  ;;  %v349_v48 = vadd.f32 1.0, %v597_v46  ;;  %v243_v51 = vpop.f32.mrf.mxu2 }
  0xde   :  { %404 = vst.msk [vmem:[%s874_s2 + $0x60] sm:$0xff] %vm391_vm1, %v387_v31  ;;  %v380_v50 = vmul.f32 %v599_v47, %v796_v56  ;;  %606 = vpow2.f32 %v325_v45  ;;  %v293_v52 = vadd.f32 %v292_v49, %v243_v51 }
  0xdf   :  { %608 = vrcp.f32 %v349_v48 }
  0xe0   :  { %397 = vst.msk [vmem:[%s874_s2 + $0x28] sm:$0xff] %vm391_vm1, %v380_v50  ;;  %v310_v53 = vsub.f32 0.0, %v293_v52 }
  0xe1   :  { %v601_v54 = vpop.eup %600 }
  0xe2   :  { %v603_v55 = vpop.eup %602  ;;  %v384_v57 = vmul.f32 %v601_v54, %v801_v5  ;;  %v341_v58 = vmul.f32 1.442695, %v310_v53 }
  0xe3   :  { %v605_v59 = vpop.eup %604  ;;  %v357_v60 = vadd.f32 1.0, %v603_v55 }
  0xe4   :  { %v607_v61 = vpop.eup %606  ;;  %401 = vst.msk [vmem:[%s874_s2 + $0x48] sm:$0xff] %vm391_vm1, %v384_v57  ;;  %v388_v56 = vmul.f32 %v605_v59, %v808_v12  ;;  %610 = vpow2.f32 %v341_v58 }
  0xe5   :  { %v609_v62 = vpop.eup %608  ;;  %612 = vrcp.f32 %v357_v60  ;;  %v350_v63 = vadd.f32 1.0, %v607_v61 }
  0xe6   :  { %405 = vst.msk [vmem:[%s874_s2 + $0x68] sm:$0xff] %vm391_vm1, %v388_v56  ;;  %v381_v0 = vmul.f32 %v609_v62, %v815_v11 }
  0xe7   :  { %614 = vrcp.f32 %v350_v63 }
  0xe8   :  { %398 = vst.msk [vmem:[%s874_s2 + $0x30] sm:$0xff] %vm391_vm1, %v381_v0 }
  0xea   :  { %v611_v1 = vpop.eup %610 }
  0xeb   :  { %v613_v2 = vpop.eup %612  ;;  %v358_v3 = vadd.f32 1.0, %v611_v1 }
  0xec   :  { %v389_v4 = vmul.f32 %v613_v2, %v291_v30 }
  0xed   :  { %v615_v5 = vpop.eup %614  ;;  %616 = vrcp.f32 %v358_v3 }
  0xee   :  { %406 = vst.msk [vmem:[%s874_s2 + $0x70] sm:$0xff] %vm391_vm1, %v389_v4  ;;  %v382_v6 = vmul.f32 %v615_v5, %v273_v34 }
  0xf0   :  { %399 = vst.msk [vmem:[%s874_s2 + $0x38] sm:$0xff] %vm391_vm1, %v382_v6 }
  0xf3   :  { %v617_v7 = vpop.eup %616 }
  0xf4   :  { %v390_v8 = vmul.f32 %v617_v7, %v293_v52 }
  0xf6   :  { %407 = vst.msk [vmem:[%s874_s2 + $0x78] sm:$0xff] %vm391_vm1, %v390_v8 }

// kernel: forward.29
= control target key start
LH: loop header
LB: loop body
LE: loop exit
PB: predicated region body
PF: predicated region fallthrough
CT: control target
= control target key end

     0   :  { %vm308_vm0 = vcmask 261120   ;;  %s1191_s1 = inlined_call_operand.vmem [shape: bf16[288,32], index: 1, kind: input, shape index: {}]   ;;  %s1192_s0 = inlined_call_operand.vmem [shape: bf16[128,288], index: 0, kind: input, shape index: {}]   ;;  %s1193_s2 = inlined_call_operand.vmem [shape: f32[128,32], index: 2, kind: output, shape index: {}]  }
   0x1   :  { %v803_v0 = vld [vmem:[%s1191_s1 + $0x38] sm:$0xff]  ;;  %v813_v2 = vld [vmem:[%s1191_s1 + $0x88] sm:$0xff]  ;;  %v802_v3 = vld [vmem:[%s1191_s1 + $0x30] sm:$0xff] }
   0x2   :  { %v811_v1 = vld [vmem:[%s1191_s1 + $0x78] sm:$0xff]  ;;  %333 = vmatpush.bf16.msra.mxu0 %v803_v0  ;;  %814 = vmatpush.bf16.msra.mxu3 %v803_v0  ;;  %v810_v4 = vld [vmem:[%s1191_s1 + $0x70] sm:$0xff]  ;;  %v812_v5 = vld [vmem:[%s1191_s1 + $0x80] sm:$0xff] }
   0x3   :  { %382 = vmatpush.bf16.msra.mxu1 %v811_v1  ;;  %437 = vmatpush.bf16.msra.mxu2 %v813_v2  ;;  %v606_v6 = vld [vmem:[%s1192_s0 + $0x8] sm:$0xf]  ;;  %v774_v7 = vld [vmem:[%s1192_s0 + $0x10] sm:$0xf0]  ;;  %v800_v11 = vld [vmem:[%s1191_s1 + $0x20] sm:$0xff] }
   0x4   :  { %v607_v8 = vor.u32 %v774_v7, %v606_v6  ;;  %v801_v9 = vld [vmem:[%s1191_s1 + $0x28] sm:$0xff]  ;;  %v808_v12 = vld [vmem:[%s1191_s1 + $0x60] sm:$0xff]  ;;  %v799_v13 = vld [vmem:[%s1191_s1 + $0x18] sm:$0xff] }
   0x5   :  { %v809_v10 = vld [vmem:[%s1191_s1 + $0x68] sm:$0xff]  ;;  %v807_v14 = vld [vmem:[%s1191_s1 + $0x58] sm:$0xff]  ;;  %v798_v15 = vld [vmem:[%s1191_s1 + $0x10] sm:$0xff] }
   0x6   :  { %334 = vmatpush.bf16.msra.mxu0 %v802_v3  ;;  %815 = vmatpush.bf16.msra.mxu3 %v802_v3  ;;  %v806_v16 = vld [vmem:[%s1191_s1 + $0x50] sm:$0xff]  ;;  %v618_v17 = vld [vmem:[%s1192_s0 + $0x20] sm:$0xf]  ;;  %v777_v18 = vld [vmem:[%s1192_s0 + $0x28] sm:$0xf0] }
   0x7   :  { %383 = vmatpush.bf16.msra.mxu1 %v810_v4  ;;  %438 = vmatpush.bf16.msra.mxu2 %v812_v5  ;;  %v619_v19 = vor.u32 %v777_v18, %v618_v17  ;;  %v797_v20 = vld [vmem:[%s1191_s1 + $0x8] sm:$0xff]  ;;  %v796_v22 = vld [vmem:[%s1191_s1] sm:$0xff]  ;;  %v670_v26 = vld [vmem:[%s1192_s0 + $0x90] sm:$0xf] }
   0x8   :  { %v805_v21 = vld [vmem:[%s1191_s1 + $0x48] sm:$0xff]  ;;  %v804_v23 = vld [vmem:[%s1191_s1 + $0x40] sm:$0xff]  ;;  %v791_v27 = vld [vmem:[%s1192_s0 + $0x98] sm:$0xf0] }
   0x9   :  { %v598_v24 = vld [vmem:[%s1192_s0] sm:$0xf]  ;;  %v773_v25 = vld [vmem:[%s1192_s0 + $0x8] sm:$0xf0]  ;;  %v772_v28 = vld [vmem:[%s1192_s0 + $0x4] sm:$0xf]  ;;  %v671_v31 = vor.u32 %v791_v27, %v670_v26 }
   0xa   :  { %764 = vmatmul.msk.bf16.vlgmr.msra.gmra.mxu2 %vm308_vm0, %v607_v8  ;;  %335 = vmatpush.bf16.msra.mxu0 %v801_v9  ;;  %v600_v29 = vld [vmem:[%s1192_s0 + $0xc] sm:$0xf0]  ;;  %v599_v30 = vor.u32 %v773_v25, %v598_v24  ;;  %v630_v33 = vld [vmem:[%s1192_s0 + $0x38] sm:$0xf]  ;;  %v780_v34 = vld [vmem:[%s1192_s0 + $0x40] sm:$0xf0] }
   0xb   :  { %816 = vmatpush.bf16.msra.mxu3 %v801_v9  ;;  %384 = vmatpush.bf16.msra.mxu1 %v809_v10  ;;  %v603_v32 = vor.u32 %v772_v28, %v600_v29  ;;  %v631_v35 = vor.u32 %v780_v34, %v630_v33  ;;  %v610_v36 = vld [vmem:[%s1192_s0 + $0x18] sm:$0xf]  ;;  %v776_v37 = vld [vmem:[%s1192_s0 + $0x20] sm:$0xf0]  ;;  %v682_v38 = vld [vmem:[%s1192_s0 + $0xa8] sm:$0xf] }
   0xc   :  { %v794_v39 = vld [vmem:[%s1192_s0 + $0xb0] sm:$0xf0]  ;;  %v775_v40 = vld [vmem:[%s1192_s0 + $0x1c] sm:$0xf]  ;;  %v612_v41 = vld [vmem:[%s1192_s0 + $0x24] sm:$0xf0]  ;;  %v611_v42 = vor.u32 %v776_v37, %v610_v36 }
   0xd   :  { %v683_v43 = vor.u32 %v794_v39, %v682_v38  ;;  %v615_v44 = vor.u32 %v775_v40, %v612_v41  ;;  %v642_v45 = vld [vmem:[%s1192_s0 + $0x50] sm:$0xf]  ;;  %v783_v46 = vld [vmem:[%s1192_s0 + $0x58] sm:$0xf0]  ;;  %v778_v50 = vld [vmem:[%s1192_s0 + $0x34] sm:$0xf] }
   0xe   :  { %336 = vmatpush.bf16.msra.mxu0 %v800_v11  ;;  %v643_v47 = vor.u32 %v783_v46, %v642_v45  ;;  %v622_v48 = vld [vmem:[%s1192_s0 + $0x30] sm:$0xf]  ;;  %v779_v49 = vld [vmem:[%s1192_s0 + $0x38] sm:$0xf0]  ;;  %v624_v51 = vld [vmem:[%s1192_s0 + $0x3c] sm:$0xf0] }
   0xf   :  { %817 = vmatpush.bf16.msra.mxu3 %v800_v11  ;;  %385 = vmatpush.bf16.msra.mxu1 %v808_v12  ;;  %v790_v52 = vld [vmem:[%s1192_s0 + $0x94] sm:$0xf]  ;;  %v672_v53 = vld [vmem:[%s1192_s0 + $0x9c] sm:$0xf0]  ;;  %v623_v54 = vor.u32 %v779_v49, %v622_v48  ;;  %v627_v55 = vor.u32 %v778_v50, %v624_v51  ;;  %v654_v57 = vld [vmem:[%s1192_s0 + $0x68] sm:$0xf] }
  0x10   :  { %v675_v56 = vor.u32 %v790_v52, %v672_v53  ;;  %v786_v58 = vld [vmem:[%s1192_s0 + $0x70] sm:$0xf0]  ;;  %v634_v60 = vld [vmem:[%s1192_s0 + $0x48] sm:$0xf]  ;;  %v781_v62 = vld [vmem:[%s1192_s0 + $0x4c] sm:$0xf] }
  0x11   :  { %v655_v59 = vor.u32 %v786_v58, %v654_v57  ;;  %v782_v61 = vld [vmem:[%s1192_s0 + $0x50] sm:$0xf0]  ;;  %v636_v63 = vld [vmem:[%s1192_s0 + $0x54] sm:$0xf0]  ;;  %v793_v0 = vld [vmem:[%s1192_s0 + $0xac] sm:$0xf] }
  0x12   :  { %337 = vmatpush.bf16.msra.mxu0 %v799_v13  ;;  %v635_v2 = vor.u32 %v782_v61, %v634_v60  ;;  %v639_v3 = vor.u32 %v781_v62, %v636_v63  ;;  %v666_v5 = vld [vmem:[%s1192_s0 + $0x80] sm:$0xf]  ;;  %v789_v6 = vld [vmem:[%s1192_s0 + $0x88] sm:$0xf0]  ;;  %v648_v11 = vld [vmem:[%s1192_s0 + $0x6c] sm:$0xf0] }
  0x13   :  { %818 = vmatpush.bf16.msra.mxu3 %v799_v13  ;;  %386 = vmatpush.bf16.msra.mxu1 %v807_v14  ;;  %v667_v7 = vor.u32 %v789_v6, %v666_v5  ;;  %v646_v8 = vld [vmem:[%s1192_s0 + $0x60] sm:$0xf]  ;;  %v785_v9 = vld [vmem:[%s1192_s0 + $0x68] sm:$0xf0]  ;;  %v658_v17 = vld [vmem:[%s1192_s0 + $0x78] sm:$0xf] }
  0x14   :  { %v788_v18 = vld [vmem:[%s1192_s0 + $0x80] sm:$0xf0]  ;;  %v795_v24 = vld [vmem:[%s1192_s0 + $0xb8] sm:$0xf0] }
  0x16   :  { %338 = vmatpush.bf16.msra.mxu0 %v798_v15 }
  0x17   :  { %819 = vmatpush.bf16.msra.mxu3 %v798_v15  ;;  %387 = vmatpush.bf16.msra.mxu1 %v806_v16  ;;  %v792_v15 = vld [vmem:[%s1192_s0 + $0xa0] sm:$0xf0] }
  0x1a   :  { %765 = vmatmul.msk.bf16.gmra.mxu2 %vm308_vm0, %v619_v19  ;;  %339 = vmatpush.bf16.msra.mxu0 %v797_v20  ;;  %v787_v19 = vld [vmem:[%s1192_s0 + $0x7c] sm:$0xf] }
  0x1b   :  { %820 = vmatpush.bf16.msra.mxu3 %v797_v20  ;;  %388 = vmatpush.bf16.msra.mxu1 %v805_v21  ;;  %v660_v20 = vld [vmem:[%s1192_s0 + $0x84] sm:$0xf0] }
  0x1e   :  { %340 = vmatpush.bf16.msra.mxu0 %v796_v22 }
  0x1f   :  { %821 = vmatpush.bf16.msra.mxu3 %v796_v22  ;;  %389 = vmatpush.bf16.msra.mxu1 %v804_v23  ;;  %v663_v22 = vor.u32 %v787_v19, %v660_v20 }
  0x21   :  { %341 = vmatmul.bf16.vlgmr.msra.gmra.mxu0 %v599_v30 }
  0x22   :  { %371 = vmatmul.bf16.vlgmr.msra.gmra.mxu3 %v671_v31  ;;  %390 = vmatmul.bf16.vlgmr.msra.gmra.mxu1 %v603_v32 }
  0x23   :  { %822 = vmatpush.bf16.msrb.mxu3 %v811_v1  ;;  %v684_v1 = vld [vmem:[%s1192_s0 + $0xb4] sm:$0xf0] }
  0x27   :  { %823 = vmatpush.bf16.msrb.mxu3 %v810_v4  ;;  %v687_v4 = vor.u32 %v793_v0, %v684_v1 }
  0x2a   :  { %766 = vmatmul.msk.bf16.gmra.mxu2 %vm308_vm0, %v631_v35 }
  0x2b   :  { %824 = vmatpush.bf16.msrb.mxu3 %v809_v10  ;;  %v784_v10 = vld [vmem:[%s1192_s0 + $0x64] sm:$0xf] }
  0x2c   :  { %v651_v13 = vor.u32 %v784_v10, %v648_v11 }
  0x2f   :  { %825 = vmatpush.bf16.msrb.mxu3 %v808_v12  ;;  %v647_v12 = vor.u32 %v785_v9, %v646_v8 }
  0x31   :  { %346 = vmatmul.bf16.gmra.mxu0 %v611_v42 }
  0x32   :  { %376 = vmatmul.bf16.gmra.mxu3 %v683_v43  ;;  %395 = vmatmul.bf16.gmra.mxu1 %v615_v44 }
  0x33   :  { %826 = vmatpush.bf16.msrb.mxu3 %v807_v14  ;;  %v678_v14 = vld [vmem:[%s1192_s0 + $0x98] sm:$0xf] }
  0x37   :  { %827 = vmatpush.bf16.msrb.mxu3 %v806_v16  ;;  %v679_v16 = vor.u32 %v792_v15, %v678_v14 }
  0x3a   :  { %767 = vmatmul.msk.bf16.gmra.mxu2 %vm308_vm0, %v643_v47 }
  0x3b   :  { %828 = vmatpush.bf16.msrb.mxu3 %v805_v21  ;;  %v659_v21 = vor.u32 %v788_v18, %v658_v17 }
  0x3f   :  { %829 = vmatpush.bf16.msrb.mxu3 %v804_v23  ;;  %v690_v23 = vld [vmem:[%s1192_s0 + $0xb0] sm:$0xf] }
  0x40   :  { %v691_v25 = vor.u32 %v795_v24, %v690_v23 }
  0x41   :  { %351 = vmatmul.bf16.gmra.mxu0 %v623_v54 }
  0x42   :  { %400 = vmatmul.bf16.gmra.mxu1 %v627_v55  ;;  %420 = vmatmul.bf16.vlgmr.msrb.gmra.mxu3 %v675_v56 }
  0x4a   :  { %768 = vmatmul.msk.bf16.gmra.mxu2 %vm308_vm0, %v655_v59 }
  0x51   :  { %356 = vmatmul.bf16.gmra.mxu0 %v635_v2 }
  0x52   :  { %405 = vmatmul.bf16.gmra.mxu1 %v639_v3  ;;  %425 = vmatmul.bf16.gmra.mxu3 %v687_v4 }
  0x5a   :  { %769 = vmatmul.msk.bf16.gmra.mxu2 %vm308_vm0, %v667_v7 }
  0x61   :  { %361 = vmatmul.bf16.gmra.mxu0 %v647_v12 }
  0x62   :  { %410 = vmatmul.bf16.gmra.mxu1 %v651_v13 }
  0x6a   :  { %770 = vmatmul.msk.bf16.gmra.mxu2 %vm308_vm0, %v679_v16 }
  0x71   :  { %366 = vmatmul.bf16.gmra.mxu0 %v659_v21 }
  0x72   :  { %415 = vmatmul.bf16.gmra.mxu1 %v663_v22 }
  0x7a   :  { %771 = vmatmul.msk.bf16.gmra.mxu2 %vm308_vm0, %v691_v25 }
  0x8d   :  { %v440_v26 = vpop.f32.mrf.mxu2 }
  0x95   :  { %v442_v27 = vpop.f32.mrf.mxu2 }
  0x9d   :  { %v445_v28 = vpop.f32.mrf.mxu2 }
  0x9e   :  { %v342_v29 = vpop.f32.mrf.mxu0 }
  0x9f   :  { %v391_v30 = vpop.f32.mrf.mxu1 }
  0xa0   :  { %v392_v31 = vadd.f32 %v391_v30, %v342_v29 }
  0xa2   :  { %v441_v32 = vadd.f32 %v440_v26, %v392_v31 }
  0xa4   :  { %v480_v33 = vsub.f32 0.0, %v441_v32 }
  0xa5   :  { %v447_v34 = vpop.f32.mrf.mxu2  ;;  %v1119_v60 = vpop.f32.mrf.mxu3 }
  0xa6   :  { %v496_v35 = vmul.f32 1.442695, %v480_v33  ;;  %v344_v36 = vpop.f32.mrf.mxu0 }
  0xa7   :  { %v393_v37 = vpop.f32.mrf.mxu1 }
  0xa8   :  { %830 = vpow2.f32 %v496_v35  ;;  %v394_v38 = vadd.f32 %v393_v37, %v344_v36 }
  0xaa   :  { %v443_v39 = vadd.f32 %v442_v27, %v394_v38 }
  0xac   :  { %v481_v40 = vsub.f32 0.0, %v443_v39 }
  0xad   :  { %v450_v41 = vpop.f32.mrf.mxu2  ;;  %v1125_v9 = vpop.f32.mrf.mxu3 }
  0xae   :  { %v831_v42 = vpop.eup %830  ;;  %v498_v43 = vmul.f32 1.442695, %v481_v40  ;;  %v347_v44 = vpop.f32.mrf.mxu0 }
  0xaf   :  { %v528_v45 = vadd.f32 1.0, %v831_v42  ;;  %v396_v46 = vpop.f32.mrf.mxu1 }
  0xb0   :  { %832 = vpow2.f32 %v498_v43  ;;  %v397_v47 = vadd.f32 %v396_v46, %v347_v44 }
  0xb1   :  { %834 = vrcp.f32 %v528_v45 }
  0xb2   :  { %v446_v48 = vadd.f32 %v445_v28, %v397_v47 }
  0xb4   :  { %v482_v49 = vsub.f32 0.0, %v446_v48 }
  0xb5   :  { %v452_v50 = vpop.f32.mrf.mxu2  ;;  %v1131_v26 = vpop.f32.mrf.mxu3 }
  0xb6   :  { %v833_v51 = vpop.eup %832  ;;  %v500_v52 = vmul.f32 1.442695, %v482_v49  ;;  %v349_v53 = vpop.f32.mrf.mxu0 }
  0xb7   :  { %v835_v54 = vpop.eup %834  ;;  %v529_v55 = vadd.f32 1.0, %v833_v51  ;;  %v398_v56 = vpop.f32.mrf.mxu1 }
  0xb8   :  { %v560_v57 = vmul.f32 %v835_v54, %v441_v32  ;;  %836 = vpow2.f32 %v500_v52  ;;  %v399_v58 = vadd.f32 %v398_v56, %v349_v53 }
  0xb9   :  { %838 = vrcp.f32 %v529_v55 }
  0xba   :  { %576 = vst.msk [vmem:[%s1193_s2] sm:$0xff] %vm308_vm0, %v560_v57  ;;  %v448_v59 = vadd.f32 %v447_v34, %v399_v58 }
  0xbc   :  { %v483_v61 = vsub.f32 0.0, %v448_v59 }
  0xbd   :  { %v455_v62 = vpop.f32.mrf.mxu2  ;;  %v1137_v42 = vpop.f32.mrf.mxu3 }
  0xbe   :  { %v837_v63 = vpop.eup %836  ;;  %v502_v0 = vmul.f32 1.442695, %v483_v61  ;;  %v352_v1 = vpop.f32.mrf.mxu0 }
  0xbf   :  { %v839_v2 = vpop.eup %838  ;;  %v530_v3 = vadd.f32 1.0, %v837_v63  ;;  %v401_v4 = vpop.f32.mrf.mxu1 }
  0xc0   :  { %v561_v5 = vmul.f32 %v839_v2, %v443_v39  ;;  %840 = vpow2.f32 %v502_v0  ;;  %v402_v6 = vadd.f32 %v401_v4, %v352_v1 }
  0xc1   :  { %842 = vrcp.f32 %v530_v3 }
  0xc2   :  { %577 = vst.msk [vmem:[%s1193_s2 + $0x8] sm:$0xff] %vm308_vm0, %v561_v5  ;;  %v451_v7 = vadd.f32 %v450_v41, %v402_v6 }
  0xc4   :  { %v484_v8 = vsub.f32 0.0, %v451_v7 }
  0xc5   :  { %v457_v10 = vpop.f32.mrf.mxu2  ;;  %v421_v55 = vpop.f32.mrf.mxu3 }
  0xc6   :  { %v841_v11 = vpop.eup %840  ;;  %v504_v12 = vmul.f32 1.442695, %v484_v8  ;;  %v354_v13 = vpop.f32.mrf.mxu0  ;;  %v422_v4 = vadd.f32 %v421_v55, %v1119_v60 }
  0xc7   :  { %v843_v14 = vpop.eup %842  ;;  %v531_v15 = vadd.f32 1.0, %v841_v11  ;;  %v403_v16 = vpop.f32.mrf.mxu1 }
  0xc8   :  { %v562_v17 = vmul.f32 %v843_v14, %v446_v48  ;;  %844 = vpow2.f32 %v504_v12  ;;  %v404_v18 = vadd.f32 %v403_v16, %v354_v13 }
  0xc9   :  { %846 = vrcp.f32 %v531_v15 }
  0xca   :  { %578 = vst.msk [vmem:[%s1193_s2 + $0x10] sm:$0xff] %vm308_vm0, %v562_v17  ;;  %v453_v19 = vadd.f32 %v452_v50, %v404_v18 }
  0xcc   :  { %v485_v20 = vsub.f32 0.0, %v453_v19 }
  0xcd   :  { %v460_v21 = vpop.f32.mrf.mxu2  ;;  %v423_v6 = vpop.f32.mrf.mxu3 }
  0xce   :  { %v845_v22 = vpop.eup %844  ;;  %v506_v23 = vmul.f32 1.442695, %v485_v20  ;;  %v357_v24 = vpop.f32.mrf.mxu0  ;;  %v424_v20 = vadd.f32 %v423_v6, %v1125_v9 }
  0xcf   :  { %v847_v25 = vpop.eup %846  ;;  %v532_v27 = vadd.f32 1.0, %v845_v22  ;;  %v406_v28 = vpop.f32.mrf.mxu1 }
  0xd0   :  { %v563_v29 = vmul.f32 %v847_v25, %v448_v59  ;;  %848 = vpow2.f32 %v506_v23  ;;  %v407_v30 = vadd.f32 %v406_v28, %v357_v24 }
  0xd1   :  { %850 = vrcp.f32 %v532_v27 }
  0xd2   :  { %579 = vst.msk [vmem:[%s1193_s2 + $0x18] sm:$0xff] %vm308_vm0, %v563_v29  ;;  %v456_v31 = vadd.f32 %v455_v62, %v407_v30 }
  0xd4   :  { %v486_v32 = vsub.f32 0.0, %v456_v31 }
  0xd5   :  { %v462_v33 = vpop.f32.mrf.mxu2  ;;  %v426_v29 = vpop.f32.mrf.mxu3 }
  0xd6   :  { %v849_v34 = vpop.eup %848  ;;  %v508_v35 = vmul.f32 1.442695, %v486_v32  ;;  %v359_v36 = vpop.f32.mrf.mxu0 }
  0xd7   :  { %v851_v37 = vpop.eup %850  ;;  %v533_v38 = vadd.f32 1.0, %v849_v34  ;;  %v408_v39 = vpop.f32.mrf.mxu1 }
  0xd8   :  { %v564_v40 = vmul.f32 %v851_v37, %v451_v7  ;;  %852 = vpow2.f32 %v508_v35  ;;  %v409_v41 = vadd.f32 %v408_v39, %v359_v36 }
  0xd9   :  { %854 = vrcp.f32 %v533_v38  ;;  %v427_v38 = vadd.f32 %v426_v29, %v1131_v26 }
  0xda   :  { %580 = vst.msk [vmem:[%s1193_s2 + $0x20] sm:$0xff] %vm308_vm0, %v564_v40  ;;  %v458_v43 = vadd.f32 %v457_v10, %v409_v41 }
  0xdc   :  { %v487_v44 = vsub.f32 0.0, %v458_v43 }
  0xdd   :  { %v465_v45 = vpop.f32.mrf.mxu2 }
  0xde   :  { %v853_v46 = vpop.eup %852  ;;  %v510_v47 = vmul.f32 1.442695, %v487_v44  ;;  %v362_v48 = vpop.f32.mrf.mxu0 }
  0xdf   :  { %v855_v49 = vpop.eup %854  ;;  %v534_v50 = vadd.f32 1.0, %v853_v46  ;;  %v411_v51 = vpop.f32.mrf.mxu1 }
  0xe0   :  { %v565_v52 = vmul.f32 %v855_v49, %v453_v19  ;;  %856 = vpow2.f32 %v510_v47  ;;  %v412_v53 = vadd.f32 %v411_v51, %v362_v48  ;;  %v428_v49 = vpop.f32.mrf.mxu3 }
  0xe1   :  { %858 = vrcp.f32 %v534_v50 }
  0xe2   :  { %581 = vst.msk [vmem:[%s1193_s2 + $0x28] sm:$0xff] %vm308_vm0, %v565_v52  ;;  %v461_v54 = vadd.f32 %v460_v21, %v412_v53  ;;  %v429_v53 = vadd.f32 %v428_v49, %v1137_v42 }
  0xe4   :  { %v488_v56 = vsub.f32 0.0, %v461_v54 }
  0xe5   :  { %v467_v57 = vpop.f32.mrf.mxu2 }
  0xe6   :  { %v857_v58 = vpop.eup %856  ;;  %v512_v59 = vmul.f32 1.442695, %v488_v56  ;;  %v364_v61 = vpop.f32.mrf.mxu0 }
  0xe7   :  { %v859_v62 = vpop.eup %858  ;;  %v535_v63 = vadd.f32 1.0, %v857_v58  ;;  %v413_v0 = vpop.f32.mrf.mxu1 }
  0xe8   :  { %v566_v1 = vmul.f32 %v859_v62, %v456_v31  ;;  %860 = vpow2.f32 %v512_v59  ;;  %v414_v2 = vadd.f32 %v413_v0, %v364_v61 }
  0xe9   :  { %862 = vrcp.f32 %v535_v63 }
  0xea   :  { %582 = vst.msk [vmem:[%s1193_s2 + $0x30] sm:$0xff] %vm308_vm0, %v566_v1  ;;  %v463_v3 = vadd.f32 %v462_v33, %v414_v2 }
  0xec   :  { %v489_v5 = vsub.f32 0.0, %v463_v3 }
  0xed   :  { %v470_v7 = vpop.f32.mrf.mxu2 }
  0xee   :  { %v861_v8 = vpop.eup %860  ;;  %v514_v10 = vmul.f32 1.442695, %v489_v5  ;;  %v471_v11 = vadd.f32 %v470_v7, %v422_v4  ;;  %v367_v12 = vpop.f32.mrf.mxu0 }
  0xef   :  { %v863_v13 = vpop.eup %862  ;;  %v536_v14 = vadd.f32 1.0, %v861_v8  ;;  %v416_v15 = vpop.f32.mrf.mxu1 }
  0xf0   :  { %v567_v16 = vmul.f32 %v863_v13, %v458_v43  ;;  %864 = vpow2.f32 %v514_v10  ;;  %v492_v17 = vsub.f32 0.0, %v471_v11  ;;  %v417_v18 = vadd.f32 %v416_v15, %v367_v12 }
  0xf1   :  { %866 = vrcp.f32 %v536_v14 }
  0xf2   :  { %583 = vst.msk [vmem:[%s1193_s2 + $0x38] sm:$0xff] %vm308_vm0, %v567_v16  ;;  %v520_v60 = vmul.f32 1.442695, %v492_v17  ;;  %v466_v19 = vadd.f32 %v465_v45, %v417_v18 }
  0xf4   :  { %868 = vpow2.f32 %v520_v60  ;;  %v490_v21 = vsub.f32 0.0, %v466_v19 }
  0xf5   :  { %v472_v22 = vpop.f32.mrf.mxu2 }
  0xf6   :  { %v865_v23 = vpop.eup %864  ;;  %v516_v24 = vmul.f32 1.442695, %v490_v21  ;;  %v473_v25 = vadd.f32 %v472_v22, %v424_v20  ;;  %v369_v27 = vpop.f32.mrf.mxu0 }
  0xf7   :  { %v867_v28 = vpop.eup %866  ;;  %v537_v30 = vadd.f32 1.0, %v865_v23  ;;  %v418_v31 = vpop.f32.mrf.mxu1 }
  0xf8   :  { %v568_v32 = vmul.f32 %v867_v28, %v461_v54  ;;  %870 = vpow2.f32 %v516_v24  ;;  %v493_v33 = vsub.f32 0.0, %v473_v25  ;;  %v419_v34 = vadd.f32 %v418_v31, %v369_v27 }
  0xf9   :  { %872 = vrcp.f32 %v537_v30 }
  0xfa   :  { %v869_v35 = vpop.eup %868  ;;  %584 = vst.msk [vmem:[%s1193_s2 + $0x40] sm:$0xff] %vm308_vm0, %v568_v32  ;;  %v522_v9 = vmul.f32 1.442695, %v493_v33  ;;  %v468_v36 = vadd.f32 %v467_v57, %v419_v34 }
  0xfb   :  { %v540_v37 = vadd.f32 1.0, %v869_v35 }
  0xfc   :  { %874 = vpow2.f32 %v522_v9  ;;  %v491_v39 = vsub.f32 0.0, %v468_v36 }
  0xfd   :  { %876 = vrcp.f32 %v540_v37  ;;  %v475_v40 = vpop.f32.mrf.mxu2 }
  0xfe   :  { %v871_v41 = vpop.eup %870  ;;  %v518_v43 = vmul.f32 1.442695, %v491_v39  ;;  %v476_v44 = vadd.f32 %v475_v40, %v427_v38 }
  0xff   :  { %v873_v45 = vpop.eup %872  ;;  %v538_v46 = vadd.f32 1.0, %v871_v41 }
 0x100   :  { %v569_v47 = vmul.f32 %v873_v45, %v463_v3  ;;  %878 = vpow2.f32 %v518_v43  ;;  %v494_v48 = vsub.f32 0.0, %v476_v44 }
 0x101   :  { %880 = vrcp.f32 %v538_v46 }
 0x102   :  { %v875_v50 = vpop.eup %874  ;;  %585 = vst.msk [vmem:[%s1193_s2 + $0x48] sm:$0xff] %vm308_vm0, %v569_v47  ;;  %v524_v26 = vmul.f32 1.442695, %v494_v48 }
 0x103   :  { %v877_v51 = vpop.eup %876  ;;  %v541_v52 = vadd.f32 1.0, %v875_v50 }
 0x104   :  { %v572_v54 = vmul.f32 %v877_v51, %v471_v11  ;;  %882 = vpow2.f32 %v524_v26 }
 0x105   :  { %884 = vrcp.f32 %v541_v52  ;;  %v477_v55 = vpop.f32.mrf.mxu2 }
 0x106   :  { %v879_v56 = vpop.eup %878  ;;  %588 = vst.msk [vmem:[%s1193_s2 + $0x60] sm:$0xff] %vm308_vm0, %v572_v54  ;;  %v478_v57 = vadd.f32 %v477_v55, %v429_v53 }
 0x107   :  { %v881_v58 = vpop.eup %880  ;;  %v539_v59 = vadd.f32 1.0, %v879_v56 }
 0x108   :  { %v570_v61 = vmul.f32 %v881_v58, %v466_v19  ;;  %v495_v62 = vsub.f32 0.0, %v478_v57 }
 0x109   :  { %886 = vrcp.f32 %v539_v59 }
 0x10a   :  { %v883_v63 = vpop.eup %882  ;;  %586 = vst.msk [vmem:[%s1193_s2 + $0x50] sm:$0xff] %vm308_vm0, %v570_v61  ;;  %v526_v42 = vmul.f32 1.442695, %v495_v62 }
 0x10b   :  { %v885_v0 = vpop.eup %884  ;;  %v542_v1 = vadd.f32 1.0, %v883_v63 }
 0x10c   :  { %v573_v2 = vmul.f32 %v885_v0, %v473_v25  ;;  %888 = vpow2.f32 %v526_v42 }
 0x10d   :  { %890 = vrcp.f32 %v542_v1 }
 0x10e   :  { %589 = vst.msk [vmem:[%s1193_s2 + $0x68] sm:$0xff] %vm308_vm0, %v573_v2 }
 0x10f   :  { %v887_v3 = vpop.eup %886 }
 0x110   :  { %v571_v4 = vmul.f32 %v887_v3, %v468_v36 }
 0x112   :  { %v889_v5 = vpop.eup %888  ;;  %587 = vst.msk [vmem:[%s1193_s2 + $0x58] sm:$0xff] %vm308_vm0, %v571_v4 }
 0x113   :  { %v891_v6 = vpop.eup %890  ;;  %v543_v7 = vadd.f32 1.0, %v889_v5 }
 0x114   :  { %v574_v8 = vmul.f32 %v891_v6, %v476_v44 }
 0x115   :  { %892 = vrcp.f32 %v543_v7 }
 0x116   :  { %590 = vst.msk [vmem:[%s1193_s2 + $0x70] sm:$0xff] %vm308_vm0, %v574_v8 }
 0x11b   :  { %v893_v10 = vpop.eup %892 }
 0x11c   :  { %v575_v11 = vmul.f32 %v893_v10, %v478_v57 }
 0x11e   :  { %591 = vst.msk [vmem:[%s1193_s2 + $0x78] sm:$0xff] %vm308_vm0, %v575_v11 }

// kernel: forward.30
= control target key start
LH: loop header
LB: loop body
LE: loop exit
PB: predicated region body
PF: predicated region fallthrough
CT: control target
= control target key end

     0   :  { %vm327_vm0 = vcmask 261120   ;;  %s1274_s1 = inlined_call_operand.vmem [shape: bf16[288,32], index: 1, kind: input, shape index: {}]   ;;  %s1275_s0 = inlined_call_operand.vmem [shape: bf16[128,288], index: 0, kind: input, shape index: {}]   ;;  %s1276_s2 = inlined_call_operand.vmem [shape: f32[128,32], index: 2, kind: input, shape index: {}]   ;;  %s1277_s3 = inlined_call_operand.vmem [shape: f32[128,32], index: 3, kind: output, shape index: {}]  }
   0x1   :  { %v822_v0 = vld [vmem:[%s1274_s1 + $0x38] sm:$0xff]  ;;  %v832_v1 = vld [vmem:[%s1274_s1 + $0x88] sm:$0xff]  ;;  %v821_v3 = vld [vmem:[%s1274_s1 + $0x30] sm:$0xff] }
   0x2   :  { %v830_v2 = vld [vmem:[%s1274_s1 + $0x78] sm:$0xff]  ;;  %352 = vmatpush.bf16.msra.mxu0 %v822_v0  ;;  %833 = vmatpush.bf16.msra.mxu3 %v822_v0  ;;  %v831_v4 = vld [vmem:[%s1274_s1 + $0x80] sm:$0xff]  ;;  %v829_v5 = vld [vmem:[%s1274_s1 + $0x70] sm:$0xff] }
   0x3   :  { %456 = vmatpush.bf16.msra.mxu2 %v832_v1  ;;  %401 = vmatpush.bf16.msra.mxu1 %v830_v2  ;;  %v625_v6 = vld [vmem:[%s1275_s0 + $0x8] sm:$0xf]  ;;  %v793_v7 = vld [vmem:[%s1275_s0 + $0x10] sm:$0xf0]  ;;  %v819_v11 = vld [vmem:[%s1274_s1 + $0x20] sm:$0xff] }
   0x4   :  { %v626_v8 = vor.u32 %v793_v7, %v625_v6  ;;  %v820_v9 = vld [vmem:[%s1274_s1 + $0x28] sm:$0xff]  ;;  %v827_v12 = vld [vmem:[%s1274_s1 + $0x60] sm:$0xff]  ;;  %v818_v13 = vld [vmem:[%s1274_s1 + $0x18] sm:$0xff] }
   0x5   :  { %v828_v10 = vld [vmem:[%s1274_s1 + $0x68] sm:$0xff]  ;;  %v826_v14 = vld [vmem:[%s1274_s1 + $0x58] sm:$0xff]  ;;  %v817_v15 = vld [vmem:[%s1274_s1 + $0x10] sm:$0xff] }
   0x6   :  { %353 = vmatpush.bf16.msra.mxu0 %v821_v3  ;;  %834 = vmatpush.bf16.msra.mxu3 %v821_v3  ;;  %v825_v16 = vld [vmem:[%s1274_s1 + $0x50] sm:$0xff]  ;;  %v637_v17 = vld [vmem:[%s1275_s0 + $0x20] sm:$0xf]  ;;  %v796_v18 = vld [vmem:[%s1275_s0 + $0x28] sm:$0xf0] }
   0x7   :  { %457 = vmatpush.bf16.msra.mxu2 %v831_v4  ;;  %402 = vmatpush.bf16.msra.mxu1 %v829_v5  ;;  %v638_v19 = vor.u32 %v796_v18, %v637_v17  ;;  %v816_v20 = vld [vmem:[%s1274_s1 + $0x8] sm:$0xff]  ;;  %v815_v22 = vld [vmem:[%s1274_s1] sm:$0xff]  ;;  %v689_v26 = vld [vmem:[%s1275_s0 + $0x90] sm:$0xf] }
   0x8   :  { %v824_v21 = vld [vmem:[%s1274_s1 + $0x48] sm:$0xff]  ;;  %v823_v23 = vld [vmem:[%s1274_s1 + $0x40] sm:$0xff]  ;;  %v810_v27 = vld [vmem:[%s1275_s0 + $0x98] sm:$0xf0] }
   0x9   :  { %v617_v24 = vld [vmem:[%s1275_s0] sm:$0xf]  ;;  %v792_v25 = vld [vmem:[%s1275_s0 + $0x8] sm:$0xf0]  ;;  %v791_v28 = vld [vmem:[%s1275_s0 + $0x4] sm:$0xf]  ;;  %v690_v31 = vor.u32 %v810_v27, %v689_v26 }
   0xa   :  { %783 = vmatmul.msk.bf16.vlgmr.msra.gmra.mxu2 %vm327_vm0, %v626_v8  ;;  %354 = vmatpush.bf16.msra.mxu0 %v820_v9  ;;  %v619_v29 = vld [vmem:[%s1275_s0 + $0xc] sm:$0xf0]  ;;  %v618_v30 = vor.u32 %v792_v25, %v617_v24  ;;  %v649_v33 = vld [vmem:[%s1275_s0 + $0x38] sm:$0xf]  ;;  %v799_v34 = vld [vmem:[%s1275_s0 + $0x40] sm:$0xf0] }
   0xb   :  { %835 = vmatpush.bf16.msra.mxu3 %v820_v9  ;;  %403 = vmatpush.bf16.msra.mxu1 %v828_v10  ;;  %v622_v32 = vor.u32 %v791_v28, %v619_v29  ;;  %v650_v35 = vor.u32 %v799_v34, %v649_v33  ;;  %v629_v36 = vld [vmem:[%s1275_s0 + $0x18] sm:$0xf]  ;;  %v795_v37 = vld [vmem:[%s1275_s0 + $0x20] sm:$0xf0]  ;;  %v701_v38 = vld [vmem:[%s1275_s0 + $0xa8] sm:$0xf] }
   0xc   :  { %v813_v39 = vld [vmem:[%s1275_s0 + $0xb0] sm:$0xf0]  ;;  %v794_v40 = vld [vmem:[%s1275_s0 + $0x1c] sm:$0xf]  ;;  %v631_v41 = vld [vmem:[%s1275_s0 + $0x24] sm:$0xf0]  ;;  %v630_v42 = vor.u32 %v795_v37, %v629_v36 }
   0xd   :  { %v702_v43 = vor.u32 %v813_v39, %v701_v38  ;;  %v634_v44 = vor.u32 %v794_v40, %v631_v41  ;;  %v661_v45 = vld [vmem:[%s1275_s0 + $0x50] sm:$0xf]  ;;  %v802_v46 = vld [vmem:[%s1275_s0 + $0x58] sm:$0xf0]  ;;  %v809_v50 = vld [vmem:[%s1275_s0 + $0x94] sm:$0xf] }
   0xe   :  { %355 = vmatpush.bf16.msra.mxu0 %v819_v11  ;;  %v662_v47 = vor.u32 %v802_v46, %v661_v45  ;;  %v641_v48 = vld [vmem:[%s1275_s0 + $0x30] sm:$0xf]  ;;  %v798_v49 = vld [vmem:[%s1275_s0 + $0x38] sm:$0xf0]  ;;  %v691_v51 = vld [vmem:[%s1275_s0 + $0x9c] sm:$0xf0] }
   0xf   :  { %836 = vmatpush.bf16.msra.mxu3 %v819_v11  ;;  %404 = vmatpush.bf16.msra.mxu1 %v827_v12  ;;  %v797_v52 = vld [vmem:[%s1275_s0 + $0x34] sm:$0xf]  ;;  %v643_v53 = vld [vmem:[%s1275_s0 + $0x3c] sm:$0xf0]  ;;  %v642_v54 = vor.u32 %v798_v49, %v641_v48  ;;  %v694_v55 = vor.u32 %v809_v50, %v691_v51  ;;  %v673_v57 = vld [vmem:[%s1275_s0 + $0x68] sm:$0xf] }
  0x10   :  { %v646_v56 = vor.u32 %v797_v52, %v643_v53  ;;  %v805_v58 = vld [vmem:[%s1275_s0 + $0x70] sm:$0xf0]  ;;  %v653_v60 = vld [vmem:[%s1275_s0 + $0x48] sm:$0xf]  ;;  %v812_v62 = vld [vmem:[%s1275_s0 + $0xac] sm:$0xf] }
  0x11   :  { %v674_v59 = vor.u32 %v805_v58, %v673_v57  ;;  %v801_v61 = vld [vmem:[%s1275_s0 + $0x50] sm:$0xf0]  ;;  %v703_v63 = vld [vmem:[%s1275_s0 + $0xb4] sm:$0xf0]  ;;  %v800_v0 = vld [vmem:[%s1275_s0 + $0x4c] sm:$0xf] }
  0x12   :  { %356 = vmatpush.bf16.msra.mxu0 %v818_v13  ;;  %v655_v1 = vld [vmem:[%s1275_s0 + $0x54] sm:$0xf0]  ;;  %v706_v3 = vor.u32 %v812_v62, %v703_v63  ;;  %v808_v6 = vld [vmem:[%s1275_s0 + $0x88] sm:$0xf0]  ;;  %v665_v8 = vld [vmem:[%s1275_s0 + $0x60] sm:$0xf] }
  0x13   :  { %837 = vmatpush.bf16.msra.mxu3 %v818_v13  ;;  %405 = vmatpush.bf16.msra.mxu1 %v826_v14  ;;  %v658_v4 = vor.u32 %v800_v0, %v655_v1  ;;  %v804_v9 = vld [vmem:[%s1275_s0 + $0x68] sm:$0xf0]  ;;  %v667_v11 = vld [vmem:[%s1275_s0 + $0x6c] sm:$0xf0]  ;;  %v677_v17 = vld [vmem:[%s1275_s0 + $0x78] sm:$0xf] }
  0x14   :  { %v807_v18 = vld [vmem:[%s1275_s0 + $0x80] sm:$0xf0]  ;;  %v814_v24 = vld [vmem:[%s1275_s0 + $0xb8] sm:$0xf0] }
  0x15   :  { %v83_v28 = vld [vmem:[%s1276_s2] sm:$0xff] }
  0x16   :  { %357 = vmatpush.bf16.msra.mxu0 %v817_v15 }
  0x17   :  { %838 = vmatpush.bf16.msra.mxu3 %v817_v15  ;;  %406 = vmatpush.bf16.msra.mxu1 %v825_v16  ;;  %v811_v15 = vld [vmem:[%s1275_s0 + $0xa0] sm:$0xf0] }
  0x1a   :  { %784 = vmatmul.msk.bf16.gmra.mxu2 %vm327_vm0, %v638_v19  ;;  %358 = vmatpush.bf16.msra.mxu0 %v816_v20  ;;  %v806_v19 = vld [vmem:[%s1275_s0 + $0x7c] sm:$0xf] }
  0x1b   :  { %839 = vmatpush.bf16.msra.mxu3 %v816_v20  ;;  %407 = vmatpush.bf16.msra.mxu1 %v824_v21  ;;  %v679_v20 = vld [vmem:[%s1275_s0 + $0x84] sm:$0xf0] }
  0x1e   :  { %359 = vmatpush.bf16.msra.mxu0 %v815_v22 }
  0x1f   :  { %840 = vmatpush.bf16.msra.mxu3 %v815_v22  ;;  %408 = vmatpush.bf16.msra.mxu1 %v823_v23  ;;  %v682_v22 = vor.u32 %v806_v19, %v679_v20 }
  0x21   :  { %360 = vmatmul.bf16.vlgmr.msra.gmra.mxu0 %v618_v30 }
  0x22   :  { %390 = vmatmul.bf16.vlgmr.msra.gmra.mxu3 %v690_v31  ;;  %409 = vmatmul.bf16.vlgmr.msra.gmra.mxu1 %v622_v32 }
  0x23   :  { %841 = vmatpush.bf16.msrb.mxu3 %v830_v2  ;;  %v654_v2 = vor.u32 %v801_v61, %v653_v60 }
  0x27   :  { %842 = vmatpush.bf16.msrb.mxu3 %v829_v5  ;;  %v685_v5 = vld [vmem:[%s1275_s0 + $0x80] sm:$0xf] }
  0x28   :  { %v686_v7 = vor.u32 %v808_v6, %v685_v5  ;;  %v87_v5 = vld [vmem:[%s1276_s2 + $0x20] sm:$0xff] }
  0x2a   :  { %785 = vmatmul.msk.bf16.gmra.mxu2 %vm327_vm0, %v650_v35  ;;  %v84_v35 = vld [vmem:[%s1276_s2 + $0x8] sm:$0xff] }
  0x2b   :  { %843 = vmatpush.bf16.msrb.mxu3 %v828_v10  ;;  %v803_v10 = vld [vmem:[%s1275_s0 + $0x64] sm:$0xf] }
  0x2c   :  { %v670_v13 = vor.u32 %v803_v10, %v667_v11 }
  0x2f   :  { %844 = vmatpush.bf16.msrb.mxu3 %v827_v12  ;;  %v666_v12 = vor.u32 %v804_v9, %v665_v8 }
  0x31   :  { %365 = vmatmul.bf16.gmra.mxu0 %v630_v42 }
  0x32   :  { %395 = vmatmul.bf16.gmra.mxu3 %v702_v43  ;;  %414 = vmatmul.bf16.gmra.mxu1 %v634_v44  ;;  %v85_v44 = vld [vmem:[%s1276_s2 + $0x10] sm:$0xff] }
  0x33   :  { %845 = vmatpush.bf16.msrb.mxu3 %v826_v14  ;;  %v697_v14 = vld [vmem:[%s1275_s0 + $0x98] sm:$0xf] }
  0x37   :  { %846 = vmatpush.bf16.msrb.mxu3 %v825_v16  ;;  %v698_v16 = vor.u32 %v811_v15, %v697_v14 }
  0x3a   :  { %786 = vmatmul.msk.bf16.gmra.mxu2 %vm327_vm0, %v662_v47 }
  0x3b   :  { %847 = vmatpush.bf16.msrb.mxu3 %v824_v21  ;;  %v678_v21 = vor.u32 %v807_v18, %v677_v17  ;;  %v88_v18 = vld [vmem:[%s1276_s2 + $0x28] sm:$0xff] }
  0x3f   :  { %848 = vmatpush.bf16.msrb.mxu3 %v823_v23  ;;  %v709_v23 = vld [vmem:[%s1275_s0 + $0xb0] sm:$0xf] }
  0x40   :  { %v710_v25 = vor.u32 %v814_v24, %v709_v23 }
  0x41   :  { %370 = vmatmul.bf16.gmra.mxu0 %v642_v54 }
  0x42   :  { %439 = vmatmul.bf16.vlgmr.msrb.gmra.mxu3 %v694_v55  ;;  %419 = vmatmul.bf16.gmra.mxu1 %v646_v56  ;;  %v86_v55 = vld [vmem:[%s1276_s2 + $0x18] sm:$0xff] }
  0x4a   :  { %787 = vmatmul.msk.bf16.gmra.mxu2 %vm327_vm0, %v674_v59 }
  0x51   :  { %375 = vmatmul.bf16.gmra.mxu0 %v654_v2 }
  0x52   :  { %444 = vmatmul.bf16.gmra.mxu3 %v706_v3  ;;  %424 = vmatmul.bf16.gmra.mxu1 %v658_v4 }
  0x5a   :  { %788 = vmatmul.msk.bf16.gmra.mxu2 %vm327_vm0, %v686_v7 }
  0x61   :  { %380 = vmatmul.bf16.gmra.mxu0 %v666_v12 }
  0x62   :  { %429 = vmatmul.bf16.gmra.mxu1 %v670_v13 }
  0x6a   :  { %789 = vmatmul.msk.bf16.gmra.mxu2 %vm327_vm0, %v698_v16 }
  0x71   :  { %385 = vmatmul.bf16.gmra.mxu0 %v678_v21 }
  0x72   :  { %434 = vmatmul.bf16.gmra.mxu1 %v682_v22 }
  0x7a   :  { %790 = vmatmul.msk.bf16.gmra.mxu2 %vm327_vm0, %v710_v25 }
  0x8d   :  { %v459_v26 = vpop.f32.mrf.mxu2 }
  0x95   :  { %v461_v27 = vpop.f32.mrf.mxu2 }
  0x9d   :  { %v464_v29 = vpop.f32.mrf.mxu2 }
  0x9e   :  { %v361_v30 = vpop.f32.mrf.mxu0 }
  0x9f   :  { %v362_v31 = vadd.f32 %v361_v30, %v83_v28  ;;  %v410_v32 = vpop.f32.mrf.mxu1 }
  0xa1   :  { %v411_v33 = vadd.f32 %v410_v32, %v362_v31  ;;  %v89_v32 = vld [vmem:[%s1276_s2 + $0x30] sm:$0xff] }
  0xa3   :  { %v460_v34 = vadd.f32 %v459_v26, %v411_v33 }
  0xa5   :  { %v499_v36 = vsub.f32 0.0, %v460_v34  ;;  %v466_v37 = vpop.f32.mrf.mxu2  ;;  %v1155_v3 = vpop.f32.mrf.mxu3 }
  0xa6   :  { %v363_v38 = vpop.f32.mrf.mxu0 }
  0xa7   :  { %v515_v39 = vmul.f32 1.442695, %v499_v36  ;;  %v364_v40 = vadd.f32 %v363_v38, %v84_v35  ;;  %v412_v41 = vpop.f32.mrf.mxu1 }
  0xa9   :  { %849 = vpow2.f32 %v515_v39  ;;  %v413_v42 = vadd.f32 %v412_v41, %v364_v40 }
  0xab   :  { %v462_v43 = vadd.f32 %v461_v27, %v413_v42 }
  0xad   :  { %v500_v45 = vsub.f32 0.0, %v462_v43  ;;  %v469_v46 = vpop.f32.mrf.mxu2  ;;  %v1167_v19 = vpop.f32.mrf.mxu3 }
  0xae   :  { %v366_v47 = vpop.f32.mrf.mxu0 }
  0xaf   :  { %v850_v48 = vpop.eup %849  ;;  %v517_v49 = vmul.f32 1.442695, %v500_v45  ;;  %v367_v50 = vadd.f32 %v366_v47, %v85_v44  ;;  %v415_v51 = vpop.f32.mrf.mxu1 }
  0xb0   :  { %v547_v52 = vadd.f32 1.0, %v850_v48 }
  0xb1   :  { %851 = vpow2.f32 %v517_v49  ;;  %v416_v53 = vadd.f32 %v415_v51, %v367_v50 }
  0xb2   :  { %853 = vrcp.f32 %v547_v52 }
  0xb3   :  { %v465_v54 = vadd.f32 %v464_v29, %v416_v53 }
  0xb5   :  { %v501_v56 = vsub.f32 0.0, %v465_v54  ;;  %v471_v57 = vpop.f32.mrf.mxu2 }
  0xb6   :  { %v368_v58 = vpop.f32.mrf.mxu0 }
  0xb7   :  { %v852_v59 = vpop.eup %851  ;;  %v519_v60 = vmul.f32 1.442695, %v501_v56  ;;  %v369_v61 = vadd.f32 %v368_v58, %v86_v55  ;;  %v417_v62 = vpop.f32.mrf.mxu1 }
  0xb8   :  { %v854_v63 = vpop.eup %853  ;;  %v548_v0 = vadd.f32 1.0, %v852_v59 }
  0xb9   :  { %v579_v1 = vmul.f32 %v854_v63, %v460_v34  ;;  %855 = vpow2.f32 %v519_v60  ;;  %v418_v2 = vadd.f32 %v417_v62, %v369_v61  ;;  %v91_v60 = vld [vmem:[%s1276_s2 + $0x40] sm:$0xff] }
  0xba   :  { %857 = vrcp.f32 %v548_v0 }
  0xbb   :  { %595 = vst.msk [vmem:[%s1277_s3] sm:$0xff] %vm327_vm0, %v579_v1  ;;  %v467_v4 = vadd.f32 %v466_v37, %v418_v2  ;;  %v1176_v37 = vpop.f32.mrf.mxu3 }
  0xbd   :  { %v502_v6 = vsub.f32 0.0, %v467_v4  ;;  %v474_v7 = vpop.f32.mrf.mxu2 }
  0xbe   :  { %v371_v8 = vpop.f32.mrf.mxu0 }
  0xbf   :  { %v856_v9 = vpop.eup %855  ;;  %v521_v10 = vmul.f32 1.442695, %v502_v6  ;;  %v372_v11 = vadd.f32 %v371_v8, %v87_v5  ;;  %v420_v12 = vpop.f32.mrf.mxu1 }
  0xc0   :  { %v858_v13 = vpop.eup %857  ;;  %v549_v14 = vadd.f32 1.0, %v856_v9 }
  0xc1   :  { %v580_v15 = vmul.f32 %v858_v13, %v462_v43  ;;  %859 = vpow2.f32 %v521_v10  ;;  %v421_v16 = vadd.f32 %v420_v12, %v372_v11  ;;  %v92_v11 = vld [vmem:[%s1276_s2 + $0x48] sm:$0xff]  ;;  %v95_v12 = vld [vmem:[%s1276_s2 + $0x60] sm:$0xff] }
  0xc2   :  { %861 = vrcp.f32 %v549_v14 }
  0xc3   :  { %596 = vst.msk [vmem:[%s1277_s3 + $0x8] sm:$0xff] %vm327_vm0, %v580_v15  ;;  %v470_v17 = vadd.f32 %v469_v46, %v421_v16  ;;  %v90_v46 = vld [vmem:[%s1276_s2 + $0x38] sm:$0xff]  ;;  %v1185_v56 = vpop.f32.mrf.mxu3 }
  0xc5   :  { %v503_v20 = vsub.f32 0.0, %v470_v17  ;;  %v476_v21 = vpop.f32.mrf.mxu2 }
  0xc6   :  { %v373_v22 = vpop.f32.mrf.mxu0 }
  0xc7   :  { %v860_v23 = vpop.eup %859  ;;  %v523_v24 = vmul.f32 1.442695, %v503_v20  ;;  %v374_v25 = vadd.f32 %v373_v22, %v88_v18  ;;  %v422_v26 = vpop.f32.mrf.mxu1  ;;  %v392_v22 = vadd.f32 %v1155_v3, %v95_v12  ;;  %v96_v3 = vld [vmem:[%s1276_s2 + $0x68] sm:$0xff] }
  0xc8   :  { %v862_v27 = vpop.eup %861  ;;  %v550_v28 = vadd.f32 1.0, %v860_v23 }
  0xc9   :  { %v581_v29 = vmul.f32 %v862_v27, %v465_v54  ;;  %863 = vpow2.f32 %v523_v24  ;;  %v423_v30 = vadd.f32 %v422_v26, %v374_v25 }
  0xca   :  { %865 = vrcp.f32 %v550_v28  ;;  %v93_v28 = vld [vmem:[%s1276_s2 + $0x50] sm:$0xff] }
  0xcb   :  { %597 = vst.msk [vmem:[%s1277_s3 + $0x10] sm:$0xff] %vm327_vm0, %v581_v29  ;;  %v472_v31 = vadd.f32 %v471_v57, %v423_v30  ;;  %v440_v9 = vpop.f32.mrf.mxu3 }
  0xcc   :  { %v441_v27 = vadd.f32 %v440_v9, %v392_v22 }
  0xcd   :  { %v504_v33 = vsub.f32 0.0, %v472_v31  ;;  %v479_v34 = vpop.f32.mrf.mxu2 }
  0xce   :  { %v376_v35 = vpop.f32.mrf.mxu0 }
  0xcf   :  { %v864_v36 = vpop.eup %863  ;;  %v525_v38 = vmul.f32 1.442695, %v504_v33  ;;  %v377_v39 = vadd.f32 %v376_v35, %v89_v32  ;;  %v425_v40 = vpop.f32.mrf.mxu1 }
  0xd0   :  { %v866_v41 = vpop.eup %865  ;;  %v551_v42 = vadd.f32 1.0, %v864_v36 }
  0xd1   :  { %v582_v43 = vmul.f32 %v866_v41, %v467_v4  ;;  %867 = vpow2.f32 %v525_v38  ;;  %v426_v44 = vadd.f32 %v425_v40, %v377_v39  ;;  %v394_v40 = vadd.f32 %v1167_v19, %v96_v3  ;;  %v94_v19 = vld [vmem:[%s1276_s2 + $0x58] sm:$0xff] }
  0xd2   :  { %869 = vrcp.f32 %v551_v42 }
  0xd3   :  { %598 = vst.msk [vmem:[%s1277_s3 + $0x18] sm:$0xff] %vm327_vm0, %v582_v43  ;;  %v475_v45 = vadd.f32 %v474_v7, %v426_v44  ;;  %v442_v29 = vpop.f32.mrf.mxu3 }
  0xd5   :  { %v505_v47 = vsub.f32 0.0, %v475_v45  ;;  %v481_v48 = vpop.f32.mrf.mxu2 }
  0xd6   :  { %v378_v49 = vpop.f32.mrf.mxu0 }
  0xd7   :  { %v868_v50 = vpop.eup %867  ;;  %v527_v51 = vmul.f32 1.442695, %v505_v47  ;;  %v379_v52 = vadd.f32 %v378_v49, %v90_v46  ;;  %v427_v53 = vpop.f32.mrf.mxu1  ;;  %v443_v47 = vadd.f32 %v442_v29, %v394_v40 }
  0xd8   :  { %v870_v54 = vpop.eup %869  ;;  %v552_v55 = vadd.f32 1.0, %v868_v50 }
  0xd9   :  { %v583_v57 = vmul.f32 %v870_v54, %v470_v17  ;;  %871 = vpow2.f32 %v527_v51  ;;  %v428_v58 = vadd.f32 %v427_v53, %v379_v52 }
  0xda   :  { %873 = vrcp.f32 %v552_v55 }
  0xdb   :  { %599 = vst.msk [vmem:[%s1277_s3 + $0x20] sm:$0xff] %vm327_vm0, %v583_v57  ;;  %v477_v59 = vadd.f32 %v476_v21, %v428_v58  ;;  %v445_v54 = vpop.f32.mrf.mxu3 }
  0xdd   :  { %v506_v61 = vsub.f32 0.0, %v477_v59  ;;  %v484_v62 = vpop.f32.mrf.mxu2 }
  0xde   :  { %v381_v63 = vpop.f32.mrf.mxu0 }
  0xdf   :  { %v872_v0 = vpop.eup %871  ;;  %v529_v1 = vmul.f32 1.442695, %v506_v61  ;;  %v382_v2 = vadd.f32 %v381_v63, %v91_v60  ;;  %v430_v4 = vpop.f32.mrf.mxu1 }
  0xe0   :  { %v874_v5 = vpop.eup %873  ;;  %v553_v6 = vadd.f32 1.0, %v872_v0 }
  0xe1   :  { %v584_v7 = vmul.f32 %v874_v5, %v472_v31  ;;  %875 = vpow2.f32 %v529_v1  ;;  %v431_v8 = vadd.f32 %v430_v4, %v382_v2 }
  0xe2   :  { %877 = vrcp.f32 %v553_v6 }
  0xe3   :  { %600 = vst.msk [vmem:[%s1277_s3 + $0x28] sm:$0xff] %vm327_vm0, %v584_v7  ;;  %v480_v10 = vadd.f32 %v479_v34, %v431_v8 }
  0xe5   :  { %v507_v13 = vsub.f32 0.0, %v480_v10  ;;  %v1204_v14 = vpop.f32.mrf.mxu2 }
  0xe6   :  { %v383_v15 = vpop.f32.mrf.mxu0 }
  0xe7   :  { %v876_v16 = vpop.eup %875  ;;  %v531_v17 = vmul.f32 1.442695, %v507_v13  ;;  %v384_v18 = vadd.f32 %v383_v15, %v92_v11  ;;  %v432_v20 = vpop.f32.mrf.mxu1 }
  0xe8   :  { %v878_v21 = vpop.eup %877  ;;  %v554_v23 = vadd.f32 1.0, %v876_v16 }
  0xe9   :  { %v585_v24 = vmul.f32 %v878_v21, %v475_v45  ;;  %879 = vpow2.f32 %v531_v17  ;;  %v433_v25 = vadd.f32 %v432_v20, %v384_v18  ;;  %v447_v17 = vpop.f32.mrf.mxu3 }
  0xea   :  { %881 = vrcp.f32 %v554_v23 }
  0xeb   :  { %601 = vst.msk [vmem:[%s1277_s3 + $0x30] sm:$0xff] %vm327_vm0, %v585_v24  ;;  %v1211_v26 = vadd.f32 %v481_v48, %v433_v25  ;;  %v97_v48 = vld [vmem:[%s1276_s2 + $0x70] sm:$0xff] }
  0xec   :  { %v397_v60 = vadd.f32 %v1176_v37, %v97_v48  ;;  %v98_v37 = vld [vmem:[%s1276_s2 + $0x78] sm:$0xff] }
  0xed   :  { %v508_v30 = vsub.f32 0.0, %v1211_v26  ;;  %v489_v31 = vpop.f32.mrf.mxu2  ;;  %v399_v13 = vadd.f32 %v1185_v56, %v98_v37 }
  0xee   :  { %v1220_v32 = vadd.f32 %v489_v31, %v441_v27  ;;  %v386_v33 = vpop.f32.mrf.mxu0  ;;  %v446_v6 = vadd.f32 %v445_v54, %v397_v60 }
  0xef   :  { %v880_v34 = vpop.eup %879  ;;  %v533_v35 = vmul.f32 1.442695, %v508_v30  ;;  %v387_v36 = vadd.f32 %v386_v33, %v93_v28  ;;  %v435_v38 = vpop.f32.mrf.mxu1  ;;  %v448_v23 = vadd.f32 %v447_v17, %v399_v13 }
  0xf0   :  { %v882_v39 = vpop.eup %881  ;;  %v555_v41 = vadd.f32 1.0, %v880_v34  ;;  %v511_v42 = vsub.f32 0.0, %v1220_v32 }
  0xf1   :  { %v586_v43 = vmul.f32 %v882_v39, %v477_v59  ;;  %883 = vpow2.f32 %v533_v35  ;;  %v436_v44 = vadd.f32 %v435_v38, %v387_v36 }
  0xf2   :  { %885 = vrcp.f32 %v555_v41  ;;  %v539_v45 = vmul.f32 1.442695, %v511_v42 }
  0xf3   :  { %602 = vst.msk [vmem:[%s1277_s3 + $0x38] sm:$0xff] %vm327_vm0, %v586_v43  ;;  %v485_v46 = vadd.f32 %v484_v62, %v436_v44 }
  0xf4   :  { %887 = vpow2.f32 %v539_v45 }
  0xf5   :  { %v509_v49 = vsub.f32 0.0, %v485_v46  ;;  %v491_v50 = vpop.f32.mrf.mxu2 }
  0xf6   :  { %v492_v51 = vadd.f32 %v491_v50, %v443_v47  ;;  %v388_v52 = vpop.f32.mrf.mxu0 }
  0xf7   :  { %v884_v53 = vpop.eup %883  ;;  %v535_v55 = vmul.f32 1.442695, %v509_v49  ;;  %v389_v57 = vadd.f32 %v388_v52, %v94_v19  ;;  %v437_v58 = vpop.f32.mrf.mxu1 }
  0xf8   :  { %v886_v59 = vpop.eup %885  ;;  %v556_v61 = vadd.f32 1.0, %v884_v53  ;;  %v512_v62 = vsub.f32 0.0, %v492_v51 }
  0xf9   :  { %v587_v63 = vmul.f32 %v886_v59, %v480_v10  ;;  %889 = vpow2.f32 %v535_v55  ;;  %v438_v0 = vadd.f32 %v437_v58, %v389_v57 }
  0xfa   :  { %v888_v1 = vpop.eup %887  ;;  %891 = vrcp.f32 %v556_v61  ;;  %v541_v2 = vmul.f32 1.442695, %v512_v62 }
  0xfb   :  { %603 = vst.msk [vmem:[%s1277_s3 + $0x40] sm:$0xff] %vm327_vm0, %v587_v63  ;;  %v559_v4 = vadd.f32 1.0, %v888_v1  ;;  %v487_v5 = vadd.f32 %v1204_v14, %v438_v0 }
  0xfc   :  { %893 = vpow2.f32 %v541_v2 }
  0xfd   :  { %895 = vrcp.f32 %v559_v4  ;;  %v510_v7 = vsub.f32 0.0, %v487_v5  ;;  %v494_v8 = vpop.f32.mrf.mxu2 }
  0xfe   :  { %v495_v9 = vadd.f32 %v494_v8, %v446_v6 }
  0xff   :  { %v890_v10 = vpop.eup %889  ;;  %v537_v11 = vmul.f32 1.442695, %v510_v7 }
 0x100   :  { %v892_v12 = vpop.eup %891  ;;  %v557_v15 = vadd.f32 1.0, %v890_v10  ;;  %v513_v16 = vsub.f32 0.0, %v495_v9 }
 0x101   :  { %v588_v14 = vmul.f32 %v892_v12, %v1211_v26  ;;  %897 = vpow2.f32 %v537_v11 }
 0x102   :  { %v894_v18 = vpop.eup %893  ;;  %899 = vrcp.f32 %v557_v15  ;;  %v543_v20 = vmul.f32 1.442695, %v513_v16 }
 0x103   :  { %v896_v21 = vpop.eup %895  ;;  %604 = vst.msk [vmem:[%s1277_s3 + $0x48] sm:$0xff] %vm327_vm0, %v588_v14  ;;  %v560_v22 = vadd.f32 1.0, %v894_v18 }
 0x104   :  { %v591_v24 = vmul.f32 %v896_v21, %v1220_v32  ;;  %901 = vpow2.f32 %v543_v20 }
 0x105   :  { %903 = vrcp.f32 %v560_v22  ;;  %v496_v56 = vpop.f32.mrf.mxu2 }
 0x106   :  { %607 = vst.msk [vmem:[%s1277_s3 + $0x60] sm:$0xff] %vm327_vm0, %v591_v24  ;;  %v497_v25 = vadd.f32 %v496_v56, %v448_v23 }
 0x107   :  { %v898_v26 = vpop.eup %897 }
 0x108   :  { %v900_v27 = vpop.eup %899  ;;  %v558_v28 = vadd.f32 1.0, %v898_v26  ;;  %v514_v3 = vsub.f32 0.0, %v497_v25 }
 0x109   :  { %v589_v29 = vmul.f32 %v900_v27, %v485_v46 }
 0x10a   :  { %v902_v30 = vpop.eup %901  ;;  %905 = vrcp.f32 %v558_v28  ;;  %v545_v31 = vmul.f32 1.442695, %v514_v3 }
 0x10b   :  { %v904_v33 = vpop.eup %903  ;;  %605 = vst.msk [vmem:[%s1277_s3 + $0x50] sm:$0xff] %vm327_vm0, %v589_v29  ;;  %v561_v32 = vadd.f32 1.0, %v902_v30 }
 0x10c   :  { %v592_v34 = vmul.f32 %v904_v33, %v492_v51  ;;  %907 = vpow2.f32 %v545_v31 }
 0x10d   :  { %909 = vrcp.f32 %v561_v32 }
 0x10e   :  { %608 = vst.msk [vmem:[%s1277_s3 + $0x68] sm:$0xff] %vm327_vm0, %v592_v34 }
 0x110   :  { %v906_v35 = vpop.eup %905 }
 0x111   :  { %v590_v36 = vmul.f32 %v906_v35, %v487_v5 }
 0x112   :  { %v908_v38 = vpop.eup %907 }
 0x113   :  { %v910_v39 = vpop.eup %909  ;;  %606 = vst.msk [vmem:[%s1277_s3 + $0x58] sm:$0xff] %vm327_vm0, %v590_v36  ;;  %v562_v40 = vadd.f32 1.0, %v908_v38 }
 0x114   :  { %v593_v41 = vmul.f32 %v910_v39, %v495_v9 }
 0x115   :  { %911 = vrcp.f32 %v562_v40 }
 0x116   :  { %609 = vst.msk [vmem:[%s1277_s3 + $0x70] sm:$0xff] %vm327_vm0, %v593_v41 }
 0x11b   :  { %v912_v42 = vpop.eup %911 }
 0x11c   :  { %v594_v43 = vmul.f32 %v912_v42, %v497_v25 }
 0x11e   :  { %610 = vst.msk [vmem:[%s1277_s3 + $0x78] sm:$0xff] %vm327_vm0, %v594_v43 }

// kernel: forward.28
= control target key start
LH: loop header
LB: loop body
LE: loop exit
PB: predicated region body
PF: predicated region fallthrough
CT: control target
= control target key end

     0   :  { %vm157_vm0 = vcmask 130048   ;;  %vm459_vm1 = vcmask 261120   ;;  %s1439_s1 = inlined_call_operand.vmem [shape: bf16[288,32], index: 1, kind: input, shape index: {}]   ;;  %s1440_s3 = inlined_call_operand.vmem [shape: bf16[16,32], index: 3, kind: input, shape index: {}]   ;;  %s1441_s0 = inlined_call_operand.vmem [shape: bf16[128,288], index: 0, kind: input, shape index: {}]   ;;  %s1442_s2 = inlined_call_operand.vmem [shape: bf16[128,16], index: 2, kind: input, shape index: {}]   ;;  %s1443_s4 = inlined_call_operand.vmem [shape: f32[1,32], index: 4, kind: input, shape index: {}]   ;;  %s1444_s5 = inlined_call_operand.vmem [shape: f32[128,32], index: 5, kind: output, shape index: {}]  }
   0x1   :  { %v998_v0 = vld [vmem:[%s1439_s1 + $0x38] sm:$0xff]  ;;  %v997_v2 = vld [vmem:[%s1439_s1 + $0x30] sm:$0xff]  ;;  %v1008_v4 = vld [vmem:[%s1439_s1 + $0x88] sm:$0xff] }
   0x2   :  { %v1006_v1 = vld [vmem:[%s1439_s1 + $0x78] sm:$0xff]  ;;  %484 = vmatpush.bf16.msra.mxu1 %v998_v0  ;;  %v1005_v3 = vld [vmem:[%s1439_s1 + $0x70] sm:$0xff]  ;;  %v1017_v5 = vld [vmem:[%s1440_s3] sm:$0xff]  ;;  %588 = vmatpush.bf16.msra.mxu3 %v1008_v4 }
   0x3   :  { %533 = vmatpush.bf16.msra.mxu2 %v1006_v1  ;;  %v996_v6 = vld [vmem:[%s1439_s1 + $0x28] sm:$0xff]  ;;  %v1007_v7 = vld [vmem:[%s1439_s1 + $0x80] sm:$0xff]  ;;  %v969_v10 = vld [vmem:[%s1441_s0 + $0x10] sm:$0xf0]  ;;  %189 = vmatpush.bf16.msra.mxu0 %v1017_v5 }
   0x4   :  { %v1004_v8 = vld [vmem:[%s1439_s1 + $0x68] sm:$0xff]  ;;  %v1009_v11 = vld [vmem:[%s1442_s2] sm:$0xff]  ;;  %v994_v15 = vld [vmem:[%s1439_s1 + $0x18] sm:$0xff] }
   0x5   :  { %v801_v9 = vld [vmem:[%s1441_s0 + $0x8] sm:$0xf]  ;;  %v995_v13 = vld [vmem:[%s1439_s1 + $0x20] sm:$0xff]  ;;  %v1002_v16 = vld [vmem:[%s1439_s1 + $0x58] sm:$0xff] }
   0x6   :  { %485 = vmatpush.bf16.msra.mxu1 %v997_v2  ;;  %v802_v12 = vor.u32 %v969_v10, %v801_v9  ;;  %589 = vmatpush.bf16.msra.mxu3 %v1007_v7  ;;  %v1003_v14 = vld [vmem:[%s1439_s1 + $0x60] sm:$0xff]  ;;  %v993_v17 = vld [vmem:[%s1439_s1 + $0x10] sm:$0xff]  ;;  %v972_v20 = vld [vmem:[%s1441_s0 + $0x28] sm:$0xf0] }
   0x7   :  { %534 = vmatpush.bf16.msra.mxu2 %v1005_v3  ;;  %783 = vmatmul.msk.bf16.vlgmr.msra.gmra.mxu0 %vm157_vm0, %v1009_v11  ;;  %v1001_v18 = vld [vmem:[%s1439_s1 + $0x50] sm:$0xff]  ;;  %v813_v19 = vld [vmem:[%s1441_s0 + $0x20] sm:$0xf]  ;;  %v992_v21 = vld [vmem:[%s1439_s1 + $0x8] sm:$0xff] }
   0x8   :  { %v1000_v22 = vld [vmem:[%s1439_s1 + $0x48] sm:$0xff]  ;;  %v814_v24 = vor.u32 %v972_v20, %v813_v19  ;;  %v991_v25 = vld [vmem:[%s1439_s1] sm:$0xff]  ;;  %v795_v30 = vld [vmem:[%s1441_s0 + $0xc] sm:$0xf0] }
   0x9   :  { %959 = vmatmul.msk.bf16.vlgmr.msra.gmra.mxu3 %vm459_vm1, %v802_v12  ;;  %v1010_v23 = vld [vmem:[%s1442_s2 + $0x8] sm:$0xff]  ;;  %v999_v26 = vld [vmem:[%s1439_s1 + $0x40] sm:$0xff]  ;;  %v825_v33 = vld [vmem:[%s1441_s0 + $0x38] sm:$0xf] }
   0xa   :  { %486 = vmatpush.bf16.msra.mxu1 %v996_v6  ;;  %v793_v27 = vld [vmem:[%s1441_s0] sm:$0xf]  ;;  %v968_v28 = vld [vmem:[%s1441_s0 + $0x8] sm:$0xf0]  ;;  %v967_v29 = vld [vmem:[%s1441_s0 + $0x4] sm:$0xf] }
   0xb   :  { %535 = vmatpush.bf16.msra.mxu2 %v1004_v8  ;;  %v794_v31 = vor.u32 %v968_v28, %v793_v27  ;;  %v798_v32 = vor.u32 %v967_v29, %v795_v30  ;;  %v975_v34 = vld [vmem:[%s1441_s0 + $0x40] sm:$0xf0]  ;;  %v1011_v35 = vld [vmem:[%s1442_s2 + $0x10] sm:$0xff]  ;;  %v805_v37 = vld [vmem:[%s1441_s0 + $0x18] sm:$0xf] }
   0xc   :  { %v826_v36 = vor.u32 %v975_v34, %v825_v33  ;;  %v971_v38 = vld [vmem:[%s1441_s0 + $0x20] sm:$0xf0]  ;;  %v970_v39 = vld [vmem:[%s1441_s0 + $0x1c] sm:$0xf]  ;;  %v807_v40 = vld [vmem:[%s1441_s0 + $0x24] sm:$0xf0] }
   0xd   :  { %v806_v41 = vor.u32 %v971_v38, %v805_v37  ;;  %v810_v42 = vor.u32 %v970_v39, %v807_v40  ;;  %v837_v43 = vld [vmem:[%s1441_s0 + $0x50] sm:$0xf]  ;;  %v978_v44 = vld [vmem:[%s1441_s0 + $0x58] sm:$0xf0]  ;;  %v973_v49 = vld [vmem:[%s1441_s0 + $0x34] sm:$0xf] }
   0xe   :  { %487 = vmatpush.bf16.msra.mxu1 %v995_v13  ;;  %v1012_v45 = vld [vmem:[%s1442_s2 + $0x18] sm:$0xff]  ;;  %v838_v46 = vor.u32 %v978_v44, %v837_v43  ;;  %v817_v47 = vld [vmem:[%s1441_s0 + $0x30] sm:$0xf]  ;;  %v819_v50 = vld [vmem:[%s1441_s0 + $0x3c] sm:$0xf0] }
   0xf   :  { %536 = vmatpush.bf16.msra.mxu2 %v1003_v14  ;;  %v974_v48 = vld [vmem:[%s1441_s0 + $0x38] sm:$0xf0]  ;;  %v822_v52 = vor.u32 %v973_v49, %v819_v50  ;;  %v849_v53 = vld [vmem:[%s1441_s0 + $0x68] sm:$0xf]  ;;  %v981_v54 = vld [vmem:[%s1441_s0 + $0x70] sm:$0xf0] }
  0x10   :  { %v818_v51 = vor.u32 %v974_v48, %v817_v47  ;;  %v1013_v55 = vld [vmem:[%s1442_s2 + $0x20] sm:$0xff]  ;;  %v850_v56 = vor.u32 %v981_v54, %v849_v53  ;;  %v829_v57 = vld [vmem:[%s1441_s0 + $0x48] sm:$0xf]  ;;  %v977_v58 = vld [vmem:[%s1441_s0 + $0x50] sm:$0xf0] }
  0x11   :  { %v976_v59 = vld [vmem:[%s1441_s0 + $0x4c] sm:$0xf]  ;;  %v831_v60 = vld [vmem:[%s1441_s0 + $0x54] sm:$0xf0]  ;;  %v830_v61 = vor.u32 %v977_v58, %v829_v57  ;;  %v861_v63 = vld [vmem:[%s1441_s0 + $0x80] sm:$0xf] }
  0x12   :  { %488 = vmatpush.bf16.msra.mxu1 %v994_v15  ;;  %v834_v62 = vor.u32 %v976_v59, %v831_v60  ;;  %v984_v0 = vld [vmem:[%s1441_s0 + $0x88] sm:$0xf0]  ;;  %v841_v3 = vld [vmem:[%s1441_s0 + $0x60] sm:$0xf]  ;;  %v979_v5 = vld [vmem:[%s1441_s0 + $0x64] sm:$0xf] }
  0x13   :  { %537 = vmatpush.bf16.msra.mxu2 %v1002_v16  ;;  %v1014_v1 = vld [vmem:[%s1442_s2 + $0x28] sm:$0xff]  ;;  %v862_v2 = vor.u32 %v984_v0, %v861_v63  ;;  %v843_v6 = vld [vmem:[%s1441_s0 + $0x6c] sm:$0xf0]  ;;  %v873_v9 = vld [vmem:[%s1441_s0 + $0x98] sm:$0xf] }
  0x14   :  { %v980_v4 = vld [vmem:[%s1441_s0 + $0x68] sm:$0xf0]  ;;  %v846_v8 = vor.u32 %v979_v5, %v843_v6  ;;  %v987_v10 = vld [vmem:[%s1441_s0 + $0xa0] sm:$0xf0]  ;;  %v1015_v11 = vld [vmem:[%s1442_s2 + $0x30] sm:$0xff] }
  0x15   :  { %v842_v7 = vor.u32 %v980_v4, %v841_v3  ;;  %v874_v12 = vor.u32 %v987_v10, %v873_v9  ;;  %v853_v13 = vld [vmem:[%s1441_s0 + $0x78] sm:$0xf]  ;;  %v983_v14 = vld [vmem:[%s1441_s0 + $0x80] sm:$0xf0]  ;;  %v982_v15 = vld [vmem:[%s1441_s0 + $0x7c] sm:$0xf] }
  0x16   :  { %489 = vmatpush.bf16.msra.mxu1 %v993_v17  ;;  %v855_v16 = vld [vmem:[%s1441_s0 + $0x84] sm:$0xf0]  ;;  %v854_v17 = vor.u32 %v983_v14, %v853_v13  ;;  %v885_v19 = vld [vmem:[%s1441_s0 + $0xb0] sm:$0xf]  ;;  %v990_v20 = vld [vmem:[%s1441_s0 + $0xb8] sm:$0xf0] }
  0x17   :  { %538 = vmatpush.bf16.msra.mxu2 %v1001_v18  ;;  %784 = vmatmul.msk.bf16.gmra.mxu0 %vm157_vm0, %v1010_v23  ;;  %v858_v18 = vor.u32 %v982_v15, %v855_v16  ;;  %v865_v23 = vld [vmem:[%s1441_s0 + $0x90] sm:$0xf]  ;;  %v877_v30 = vld [vmem:[%s1441_s0 + $0xa8] sm:$0xf]  ;;  %v879_v33 = vld [vmem:[%s1441_s0 + $0xb4] sm:$0xf0] }
  0x18   :  { %v1357_v40 = vld [vmem:[%s1443_s4] ss:$0 sm:$0xff] }
  0x19   :  { %960 = vmatmul.msk.bf16.gmra.mxu3 %vm459_vm1, %v814_v24  ;;  %v986_v24 = vld [vmem:[%s1441_s0 + $0x98] sm:$0xf0] }
  0x1a   :  { %490 = vmatpush.bf16.msra.mxu1 %v992_v21  ;;  %v1016_v21 = vld [vmem:[%s1442_s2 + $0x38] sm:$0xff]  ;;  %v866_v27 = vor.u32 %v986_v24, %v865_v23 }
  0x1b   :  { %539 = vmatpush.bf16.msra.mxu2 %v1000_v22  ;;  %v886_v22 = vor.u32 %v990_v20, %v885_v19 }
  0x1e   :  { %491 = vmatpush.bf16.msra.mxu1 %v991_v25  ;;  %v985_v25 = vld [vmem:[%s1441_s0 + $0x94] sm:$0xf] }
  0x1f   :  { %540 = vmatpush.bf16.msra.mxu2 %v999_v26  ;;  %v867_v26 = vld [vmem:[%s1441_s0 + $0x9c] sm:$0xf0] }
  0x20   :  { %v870_v28 = vor.u32 %v985_v25, %v867_v26 }
  0x21   :  { %492 = vmatmul.bf16.vlgmr.msra.gmra.mxu1 %v794_v31  ;;  %v989_v31 = vld [vmem:[%s1441_s0 + $0xb0] sm:$0xf0] }
  0x22   :  { %541 = vmatmul.bf16.vlgmr.msra.gmra.mxu2 %v798_v32  ;;  %v988_v32 = vld [vmem:[%s1441_s0 + $0xac] sm:$0xf]  ;;  %v878_v34 = vor.u32 %v989_v31, %v877_v30 }
  0x27   :  { %785 = vmatmul.msk.bf16.gmra.mxu0 %vm157_vm0, %v1011_v35  ;;  %v882_v35 = vor.u32 %v988_v32, %v879_v33 }
  0x29   :  { %961 = vmatmul.msk.bf16.gmra.mxu3 %vm459_vm1, %v826_v36 }
  0x31   :  { %497 = vmatmul.bf16.gmra.mxu1 %v806_v41 }
  0x32   :  { %546 = vmatmul.bf16.gmra.mxu2 %v810_v42 }
  0x37   :  { %786 = vmatmul.msk.bf16.gmra.mxu0 %vm157_vm0, %v1012_v45 }
  0x39   :  { %962 = vmatmul.msk.bf16.gmra.mxu3 %vm459_vm1, %v838_v46 }
  0x41   :  { %502 = vmatmul.bf16.gmra.mxu1 %v818_v51 }
  0x42   :  { %551 = vmatmul.bf16.gmra.mxu2 %v822_v52 }
  0x47   :  { %787 = vmatmul.msk.bf16.gmra.mxu0 %vm157_vm0, %v1013_v55 }
  0x49   :  { %963 = vmatmul.msk.bf16.gmra.mxu3 %vm459_vm1, %v850_v56 }
  0x51   :  { %507 = vmatmul.bf16.gmra.mxu1 %v830_v61 }
  0x52   :  { %556 = vmatmul.bf16.gmra.mxu2 %v834_v62 }
  0x57   :  { %788 = vmatmul.msk.bf16.gmra.mxu0 %vm157_vm0, %v1014_v1 }
  0x59   :  { %964 = vmatmul.msk.bf16.gmra.mxu3 %vm459_vm1, %v862_v2 }
  0x61   :  { %512 = vmatmul.bf16.gmra.mxu1 %v842_v7 }
  0x62   :  { %561 = vmatmul.bf16.gmra.mxu2 %v846_v8 }
  0x67   :  { %789 = vmatmul.msk.bf16.gmra.mxu0 %vm157_vm0, %v1015_v11 }
  0x69   :  { %965 = vmatmul.msk.bf16.gmra.mxu3 %vm459_vm1, %v874_v12 }
  0x71   :  { %517 = vmatmul.bf16.gmra.mxu1 %v854_v17 }
  0x72   :  { %566 = vmatmul.bf16.gmra.mxu2 %v858_v18 }
  0x77   :  { %790 = vmatmul.msk.bf16.gmra.mxu0 %vm157_vm0, %v1016_v21 }
  0x79   :  { %966 = vmatmul.msk.bf16.gmra.mxu3 %vm459_vm1, %v886_v22 }
  0x81   :  { %522 = vmatmul.bf16.gmra.mxu1 %v866_v27 }
  0x82   :  { %571 = vmatmul.bf16.gmra.mxu2 %v870_v28 }
  0x84   :  { %v191_v29 = vpop.f32.mrf.mxu0 }
  0x85   :  { %v192_v41 = vadd.f32 %v1357_v40, %v191_v29 }
  0x8c   :  { %v591_v36 = vpop.f32.mrf.mxu3  ;;  %v193_v37 = vpop.f32.mrf.mxu0 }
  0x8d   :  { %v194_v52 = vadd.f32 %v1357_v40, %v193_v37 }
  0x91   :  { %527 = vmatmul.bf16.gmra.mxu1 %v878_v34 }
  0x92   :  { %576 = vmatmul.bf16.gmra.mxu2 %v882_v35 }
  0x94   :  { %v593_v38 = vpop.f32.mrf.mxu3  ;;  %v196_v39 = vpop.f32.mrf.mxu0 }
  0x95   :  { %v197_v57 = vadd.f32 %v1357_v40, %v196_v39 }
  0x9c   :  { %v596_v43 = vpop.f32.mrf.mxu3  ;;  %v198_v44 = vpop.f32.mrf.mxu0 }
  0x9d   :  { %v199_v8 = vadd.f32 %v1357_v40, %v198_v44 }
  0x9e   :  { %v493_v42 = vpop.f32.mrf.mxu1 }
  0x9f   :  { %v494_v45 = vadd.f32 %v493_v42, %v192_v41 }
  0xa4   :  { %v598_v50 = vpop.f32.mrf.mxu3  ;;  %v201_v51 = vpop.f32.mrf.mxu0 }
  0xa5   :  { %v542_v46 = vpop.f32.mrf.mxu2  ;;  %v202_v19 = vadd.f32 %v1357_v40, %v201_v51 }
  0xa6   :  { %v543_v47 = vadd.f32 %v542_v46, %v494_v45  ;;  %v495_v48 = vpop.f32.mrf.mxu1 }
  0xa7   :  { %v496_v55 = vadd.f32 %v495_v48, %v194_v52 }
  0xa8   :  { %v592_v49 = vadd.f32 %v591_v36, %v543_v47 }
  0xaa   :  { %v631_v53 = vsub.f32 0.0, %v592_v49 }
  0xac   :  { %v647_v54 = vmul.f32 1.442695, %v631_v53  ;;  %v601_v61 = vpop.f32.mrf.mxu3  ;;  %v203_v0 = vpop.f32.mrf.mxu0 }
  0xad   :  { %v544_v56 = vpop.f32.mrf.mxu2  ;;  %v204_v36 = vadd.f32 %v1357_v40, %v203_v0 }
  0xae   :  { %1019 = vpow2.f32 %v647_v54  ;;  %v545_v58 = vadd.f32 %v544_v56, %v496_v55  ;;  %v498_v59 = vpop.f32.mrf.mxu1 }
  0xaf   :  { %v499_v63 = vadd.f32 %v498_v59, %v197_v57 }
  0xb0   :  { %v594_v60 = vadd.f32 %v593_v38, %v545_v58 }
  0xb2   :  { %v632_v62 = vsub.f32 0.0, %v594_v60 }
  0xb4   :  { %v1020_v1 = vpop.eup %1019  ;;  %v649_v2 = vmul.f32 1.442695, %v632_v62  ;;  %v603_v10 = vpop.f32.mrf.mxu3 }
  0xb5   :  { %v679_v3 = vadd.f32 1.0, %v1020_v1  ;;  %v547_v4 = vpop.f32.mrf.mxu2  ;;  %v206_v17 = vpop.f32.mrf.mxu0 }
  0xb6   :  { %1021 = vpow2.f32 %v649_v2  ;;  %v548_v5 = vadd.f32 %v547_v4, %v499_v63  ;;  %v500_v6 = vpop.f32.mrf.mxu1  ;;  %v207_v46 = vadd.f32 %v1357_v40, %v206_v17 }
  0xb7   :  { %1023 = vrcp.f32 %v679_v3  ;;  %v501_v13 = vadd.f32 %v500_v6, %v199_v8 }
  0xb8   :  { %v597_v7 = vadd.f32 %v596_v43, %v548_v5 }
  0xba   :  { %v633_v9 = vsub.f32 0.0, %v597_v7 }
  0xbc   :  { %v1022_v11 = vpop.eup %1021  ;;  %v651_v12 = vmul.f32 1.442695, %v633_v9  ;;  %v606_v30 = vpop.f32.mrf.mxu3 }
  0xbd   :  { %v1024_v14 = vpop.eup %1023  ;;  %v680_v15 = vadd.f32 1.0, %v1022_v11  ;;  %v549_v16 = vpop.f32.mrf.mxu2 }
  0xbe   :  { %v711_v18 = vmul.f32 %v1024_v14, %v592_v49  ;;  %1025 = vpow2.f32 %v651_v12  ;;  %v550_v20 = vadd.f32 %v549_v16, %v501_v13  ;;  %v503_v21 = vpop.f32.mrf.mxu1  ;;  %v208_v34 = vpop.f32.mrf.mxu0 }
  0xbf   :  { %1027 = vrcp.f32 %v680_v15  ;;  %v504_v24 = vadd.f32 %v503_v21, %v202_v19  ;;  %v209_v0 = vadd.f32 %v1357_v40, %v208_v34 }
  0xc0   :  { %727 = vst.msk [vmem:[%s1444_s5] sm:$0xff] %vm459_vm1, %v711_v18  ;;  %v599_v22 = vadd.f32 %v598_v50, %v550_v20 }
  0xc2   :  { %v634_v23 = vsub.f32 0.0, %v599_v22 }
  0xc4   :  { %v1026_v25 = vpop.eup %1025  ;;  %v653_v26 = vmul.f32 1.442695, %v634_v23  ;;  %v608_v49 = vpop.f32.mrf.mxu3 }
  0xc5   :  { %v1028_v27 = vpop.eup %1027  ;;  %v681_v28 = vadd.f32 1.0, %v1026_v25  ;;  %v552_v29 = vpop.f32.mrf.mxu2 }
  0xc6   :  { %v712_v31 = vmul.f32 %v1028_v27, %v594_v60  ;;  %1029 = vpow2.f32 %v653_v26  ;;  %v553_v32 = vadd.f32 %v552_v29, %v504_v24  ;;  %v505_v33 = vpop.f32.mrf.mxu1  ;;  %v211_v51 = vpop.f32.mrf.mxu0 }
  0xc7   :  { %1031 = vrcp.f32 %v681_v28  ;;  %v506_v41 = vadd.f32 %v505_v33, %v204_v36 }
  0xc8   :  { %728 = vst.msk [vmem:[%s1444_s5 + $0x8] sm:$0xff] %vm459_vm1, %v712_v31  ;;  %v602_v35 = vadd.f32 %v601_v61, %v553_v32 }
  0xca   :  { %v635_v37 = vsub.f32 0.0, %v602_v35 }
  0xcc   :  { %v1030_v38 = vpop.eup %1029  ;;  %v655_v39 = vmul.f32 1.442695, %v635_v37  ;;  %v611_v63 = vpop.f32.mrf.mxu3 }
  0xcd   :  { %v1032_v42 = vpop.eup %1031  ;;  %v682_v43 = vadd.f32 1.0, %v1030_v38  ;;  %v554_v44 = vpop.f32.mrf.mxu2 }
  0xce   :  { %v713_v45 = vmul.f32 %v1032_v42, %v597_v7  ;;  %1033 = vpow2.f32 %v655_v39  ;;  %v555_v47 = vadd.f32 %v554_v44, %v506_v41  ;;  %v508_v48 = vpop.f32.mrf.mxu1  ;;  %v213_v2 = vpop.f32.mrf.mxu0 }
  0xcf   :  { %1035 = vrcp.f32 %v682_v43  ;;  %v509_v53 = vadd.f32 %v508_v48, %v207_v46  ;;  %v214_v27 = vadd.f32 %v1357_v40, %v213_v2 }
  0xd0   :  { %729 = vst.msk [vmem:[%s1444_s5 + $0x10] sm:$0xff] %vm459_vm1, %v713_v45  ;;  %v604_v50 = vadd.f32 %v603_v10, %v555_v47  ;;  %v212_v10 = vadd.f32 %v1357_v40, %v211_v51 }
  0xd2   :  { %v636_v52 = vsub.f32 0.0, %v604_v50 }
  0xd4   :  { %v1034_v54 = vpop.eup %1033  ;;  %v657_v55 = vmul.f32 1.442695, %v636_v52  ;;  %v613_v16 = vpop.f32.mrf.mxu3 }
  0xd5   :  { %v1036_v56 = vpop.eup %1035  ;;  %v683_v57 = vadd.f32 1.0, %v1034_v54  ;;  %v557_v58 = vpop.f32.mrf.mxu2 }
  0xd6   :  { %v714_v59 = vmul.f32 %v1036_v56, %v599_v22  ;;  %1037 = vpow2.f32 %v657_v55  ;;  %v558_v60 = vadd.f32 %v557_v58, %v509_v53  ;;  %v510_v61 = vpop.f32.mrf.mxu1  ;;  %v216_v22 = vpop.f32.mrf.mxu0 }
  0xd7   :  { %1039 = vrcp.f32 %v683_v57  ;;  %v511_v5 = vadd.f32 %v510_v61, %v209_v0  ;;  %v217_v37 = vadd.f32 %v1357_v40, %v216_v22 }
  0xd8   :  { %730 = vst.msk [vmem:[%s1444_s5 + $0x18] sm:$0xff] %vm459_vm1, %v714_v59  ;;  %v607_v62 = vadd.f32 %v606_v30, %v558_v60 }
  0xda   :  { %v637_v1 = vsub.f32 0.0, %v607_v62 }
  0xdc   :  { %v1038_v3 = vpop.eup %1037  ;;  %v659_v4 = vmul.f32 1.442695, %v637_v1 }
  0xdd   :  { %v1040_v6 = vpop.eup %1039  ;;  %v684_v7 = vadd.f32 1.0, %v1038_v3  ;;  %v559_v8 = vpop.f32.mrf.mxu2 }
  0xde   :  { %v715_v9 = vmul.f32 %v1040_v6, %v602_v35  ;;  %1041 = vpow2.f32 %v659_v4  ;;  %v560_v11 = vadd.f32 %v559_v8, %v511_v5  ;;  %v513_v12 = vpop.f32.mrf.mxu1  ;;  %v616_v35 = vpop.f32.mrf.mxu3 }
  0xdf   :  { %1043 = vrcp.f32 %v684_v7  ;;  %v514_v15 = vadd.f32 %v513_v12, %v212_v10  ;;  %v218_v41 = vpop.f32.mrf.mxu0 }
  0xe0   :  { %731 = vst.msk [vmem:[%s1444_s5 + $0x20] sm:$0xff] %vm459_vm1, %v715_v9  ;;  %v609_v13 = vadd.f32 %v608_v49, %v560_v11  ;;  %v219_v56 = vadd.f32 %v1357_v40, %v218_v41 }
  0xe2   :  { %v638_v14 = vsub.f32 0.0, %v609_v13 }
  0xe4   :  { %v1042_v17 = vpop.eup %1041  ;;  %v661_v18 = vmul.f32 1.442695, %v638_v14 }
  0xe5   :  { %v1044_v19 = vpop.eup %1043  ;;  %v685_v20 = vadd.f32 1.0, %v1042_v17  ;;  %v562_v21 = vpop.f32.mrf.mxu2 }
  0xe6   :  { %v716_v23 = vmul.f32 %v1044_v19, %v604_v50  ;;  %1045 = vpow2.f32 %v661_v18  ;;  %v563_v24 = vadd.f32 %v562_v21, %v514_v15  ;;  %v515_v25 = vpop.f32.mrf.mxu1  ;;  %v618_v53 = vpop.f32.mrf.mxu3 }
  0xe7   :  { %1047 = vrcp.f32 %v685_v20  ;;  %v516_v31 = vadd.f32 %v515_v25, %v214_v27  ;;  %v221_v55 = vpop.f32.mrf.mxu0 }
  0xe8   :  { %732 = vst.msk [vmem:[%s1444_s5 + $0x28] sm:$0xff] %vm459_vm1, %v716_v23  ;;  %v612_v26 = vadd.f32 %v611_v63, %v563_v24  ;;  %v222_v1 = vadd.f32 %v1357_v40, %v221_v55 }
  0xea   :  { %v639_v28 = vsub.f32 0.0, %v612_v26 }
  0xec   :  { %v1046_v29 = vpop.eup %1045  ;;  %v663_v30 = vmul.f32 1.442695, %v639_v28 }
  0xed   :  { %v1048_v32 = vpop.eup %1047  ;;  %v686_v33 = vadd.f32 1.0, %v1046_v29  ;;  %v564_v34 = vpop.f32.mrf.mxu2 }
  0xee   :  { %v717_v36 = vmul.f32 %v1048_v32, %v607_v62  ;;  %1049 = vpow2.f32 %v663_v30  ;;  %v565_v38 = vadd.f32 %v564_v34, %v516_v31  ;;  %v518_v39 = vpop.f32.mrf.mxu1  ;;  %v621_v5 = vpop.f32.mrf.mxu3 }
  0xef   :  { %1051 = vrcp.f32 %v686_v33  ;;  %v519_v44 = vadd.f32 %v518_v39, %v217_v37  ;;  %v223_v8 = vpop.f32.mrf.mxu0 }
  0xf0   :  { %733 = vst.msk [vmem:[%s1444_s5 + $0x30] sm:$0xff] %vm459_vm1, %v717_v36  ;;  %v614_v42 = vadd.f32 %v613_v16, %v565_v38  ;;  %v224_v18 = vadd.f32 %v1357_v40, %v223_v8 }
  0xf2   :  { %v640_v43 = vsub.f32 0.0, %v614_v42 }
  0xf4   :  { %v1050_v45 = vpop.eup %1049  ;;  %v665_v46 = vmul.f32 1.442695, %v640_v43 }
  0xf5   :  { %v1052_v47 = vpop.eup %1051  ;;  %v687_v48 = vadd.f32 1.0, %v1050_v45  ;;  %v567_v49 = vpop.f32.mrf.mxu2 }
  0xf6   :  { %v718_v50 = vmul.f32 %v1052_v47, %v609_v13  ;;  %1053 = vpow2.f32 %v665_v46  ;;  %v568_v51 = vadd.f32 %v567_v49, %v519_v44  ;;  %v520_v52 = vpop.f32.mrf.mxu1  ;;  %v623_v20 = vpop.f32.mrf.mxu3 }
  0xf7   :  { %1055 = vrcp.f32 %v687_v48  ;;  %v521_v60 = vadd.f32 %v520_v52, %v219_v56 }
  0xf8   :  { %734 = vst.msk [vmem:[%s1444_s5 + $0x38] sm:$0xff] %vm459_vm1, %v718_v50  ;;  %v617_v54 = vadd.f32 %v616_v35, %v568_v51 }
  0xfa   :  { %v641_v57 = vsub.f32 0.0, %v617_v54 }
  0xfc   :  { %v1054_v58 = vpop.eup %1053  ;;  %v667_v59 = vmul.f32 1.442695, %v641_v57 }
  0xfd   :  { %v1056_v61 = vpop.eup %1055  ;;  %v688_v62 = vadd.f32 1.0, %v1054_v58  ;;  %v569_v63 = vpop.f32.mrf.mxu2 }
  0xfe   :  { %v719_v0 = vmul.f32 %v1056_v61, %v612_v26  ;;  %1057 = vpow2.f32 %v667_v59  ;;  %v570_v2 = vadd.f32 %v569_v63, %v521_v60  ;;  %v523_v3 = vpop.f32.mrf.mxu1  ;;  %v226_v26 = vpop.f32.mrf.mxu0 }
  0xff   :  { %1059 = vrcp.f32 %v688_v62  ;;  %v524_v7 = vadd.f32 %v523_v3, %v222_v1  ;;  %v227_v29 = vadd.f32 %v1357_v40, %v226_v26  ;;  %v626_v39 = vpop.f32.mrf.mxu3 }
 0x100   :  { %735 = vst.msk [vmem:[%s1444_s5 + $0x40] sm:$0xff] %vm459_vm1, %v719_v0  ;;  %v619_v4 = vadd.f32 %v618_v53, %v570_v2 }
 0x102   :  { %v642_v6 = vsub.f32 0.0, %v619_v4 }
 0x104   :  { %v1058_v9 = vpop.eup %1057  ;;  %v669_v10 = vmul.f32 1.442695, %v642_v6 }
 0x105   :  { %v1060_v11 = vpop.eup %1059  ;;  %v689_v12 = vadd.f32 1.0, %v1058_v9  ;;  %v572_v13 = vpop.f32.mrf.mxu2 }
 0x106   :  { %v720_v14 = vmul.f32 %v1060_v11, %v614_v42  ;;  %1061 = vpow2.f32 %v669_v10  ;;  %v573_v15 = vadd.f32 %v572_v13, %v524_v7  ;;  %v525_v16 = vpop.f32.mrf.mxu1  ;;  %v228_v44 = vpop.f32.mrf.mxu0 }
 0x107   :  { %1063 = vrcp.f32 %v689_v12  ;;  %v526_v23 = vadd.f32 %v525_v16, %v224_v18  ;;  %v229_v47 = vadd.f32 %v1357_v40, %v228_v44  ;;  %v628_v57 = vpop.f32.mrf.mxu3 }
 0x108   :  { %736 = vst.msk [vmem:[%s1444_s5 + $0x48] sm:$0xff] %vm459_vm1, %v720_v14  ;;  %v622_v17 = vadd.f32 %v621_v5, %v573_v15 }
 0x10a   :  { %v643_v19 = vsub.f32 0.0, %v622_v17 }
 0x10c   :  { %v1062_v21 = vpop.eup %1061  ;;  %v671_v22 = vmul.f32 1.442695, %v643_v19 }
 0x10d   :  { %v1064_v24 = vpop.eup %1063  ;;  %v690_v25 = vadd.f32 1.0, %v1062_v21  ;;  %v574_v27 = vpop.f32.mrf.mxu2 }
 0x10e   :  { %v721_v28 = vmul.f32 %v1064_v24, %v617_v54  ;;  %1065 = vpow2.f32 %v671_v22  ;;  %v575_v30 = vadd.f32 %v574_v27, %v526_v23  ;;  %v528_v31 = vpop.f32.mrf.mxu1 }
 0x10f   :  { %1067 = vrcp.f32 %v690_v25  ;;  %v529_v34 = vadd.f32 %v528_v31, %v227_v29 }
 0x110   :  { %737 = vst.msk [vmem:[%s1444_s5 + $0x50] sm:$0xff] %vm459_vm1, %v721_v28  ;;  %v624_v32 = vadd.f32 %v623_v20, %v575_v30 }
 0x112   :  { %v644_v33 = vsub.f32 0.0, %v624_v32 }
 0x114   :  { %v1066_v35 = vpop.eup %1065  ;;  %v673_v36 = vmul.f32 1.442695, %v644_v33 }
 0x115   :  { %v1068_v37 = vpop.eup %1067  ;;  %v691_v38 = vadd.f32 1.0, %v1066_v35  ;;  %v577_v41 = vpop.f32.mrf.mxu2 }
 0x116   :  { %v722_v42 = vmul.f32 %v1068_v37, %v619_v4  ;;  %1069 = vpow2.f32 %v673_v36  ;;  %v578_v43 = vadd.f32 %v577_v41, %v529_v34  ;;  %v530_v46 = vpop.f32.mrf.mxu1 }
 0x117   :  { %1071 = vrcp.f32 %v691_v38  ;;  %v531_v51 = vadd.f32 %v530_v46, %v229_v47 }
 0x118   :  { %738 = vst.msk [vmem:[%s1444_s5 + $0x58] sm:$0xff] %vm459_vm1, %v722_v42  ;;  %v627_v45 = vadd.f32 %v626_v39, %v578_v43 }
 0x11a   :  { %v645_v48 = vsub.f32 0.0, %v627_v45 }
 0x11c   :  { %v1070_v49 = vpop.eup %1069  ;;  %v675_v50 = vmul.f32 1.442695, %v645_v48 }
 0x11d   :  { %v1072_v52 = vpop.eup %1071  ;;  %v692_v53 = vadd.f32 1.0, %v1070_v49  ;;  %v579_v54 = vpop.f32.mrf.mxu2 }
 0x11e   :  { %v723_v55 = vmul.f32 %v1072_v52, %v622_v17  ;;  %1073 = vpow2.f32 %v675_v50  ;;  %v580_v56 = vadd.f32 %v579_v54, %v531_v51 }
 0x11f   :  { %1075 = vrcp.f32 %v692_v53 }
 0x120   :  { %739 = vst.msk [vmem:[%s1444_s5 + $0x60] sm:$0xff] %vm459_vm1, %v723_v55  ;;  %v629_v58 = vadd.f32 %v628_v57, %v580_v56 }
 0x122   :  { %v646_v59 = vsub.f32 0.0, %v629_v58 }
 0x124   :  { %v1074_v40 = vpop.eup %1073  ;;  %v677_v60 = vmul.f32 1.442695, %v646_v59 }
 0x125   :  { %v1076_v61 = vpop.eup %1075  ;;  %v693_v62 = vadd.f32 1.0, %v1074_v40 }
 0x126   :  { %v724_v63 = vmul.f32 %v1076_v61, %v624_v32  ;;  %1077 = vpow2.f32 %v677_v60 }
 0x127   :  { %1079 = vrcp.f32 %v693_v62 }
 0x128   :  { %740 = vst.msk [vmem:[%s1444_s5 + $0x68] sm:$0xff] %vm459_vm1, %v724_v63 }
 0x12c   :  { %v1078_v0 = vpop.eup %1077 }
 0x12d   :  { %v1080_v1 = vpop.eup %1079  ;;  %v694_v2 = vadd.f32 1.0, %v1078_v0 }
 0x12e   :  { %v725_v3 = vmul.f32 %v1080_v1, %v627_v45 }
 0x12f   :  { %1081 = vrcp.f32 %v694_v2 }
 0x130   :  { %741 = vst.msk [vmem:[%s1444_s5 + $0x70] sm:$0xff] %vm459_vm1, %v725_v3 }
 0x135   :  { %v1082_v4 = vpop.eup %1081 }
 0x136   :  { %v726_v5 = vmul.f32 %v1082_v4, %v629_v58 }
 0x138   :  { %742 = vst.msk [vmem:[%s1444_s5 + $0x78] sm:$0xff] %vm459_vm1, %v726_v5 }

// kernel: forward.33
= control target key start
LH: loop header
LB: loop body
LE: loop exit
PB: predicated region body
PF: predicated region fallthrough
CT: control target
= control target key end

     0   :  { %vm194_vm0 = vcmask 261120   ;;  %vm282_vm1 = vcmask 523264   ;;  %s560_s1 = inlined_call_operand.vmem [shape: bf16[288,64], index: 1, kind: input, shape index: {}]   ;;  %s561_s0 = inlined_call_operand.vmem [shape: bf16[32,288], index: 0, kind: input, shape index: {}]   ;;  %s562_s2 = inlined_call_operand.vmem [shape: f32[32,64], index: 2, kind: output, shape index: {}]  }
   0x1   :  { %v402_v0 = vld [vmem:[%s560_s1 + $0x38] sm:$0xff]  ;;  %v401_v2 = vld [vmem:[%s560_s1 + $0x30] sm:$0xff]  ;;  %v412_v4 = vld [vmem:[%s560_s1 + $0x88] sm:$0xff] }
   0x2   :  { %v410_v1 = vld [vmem:[%s560_s1 + $0x78] sm:$0xff]  ;;  %201 = vmatpush.bf16.msra.mxu0 %v402_v0  ;;  %v409_v3 = vld [vmem:[%s560_s1 + $0x70] sm:$0xff]  ;;  %413 = vmatpush.bf16.msra.mxu3 %v402_v0  ;;  %v411_v5 = vld [vmem:[%s560_s1 + $0x80] sm:$0xff] }
   0x3   :  { %220 = vmatpush.bf16.msra.mxu1 %v410_v1  ;;  %245 = vmatpush.bf16.msra.mxu2 %v412_v4  ;;  %v301_v6 = vld [vmem:[%s561_s0 + $0x8] sm:$0xf]  ;;  %v391_v7 = vld [vmem:[%s561_s0 + $0x10] sm:$0xf0]  ;;  %v399_v11 = vld [vmem:[%s560_s1 + $0x20] sm:$0xff] }
   0x4   :  { %v400_v8 = vld [vmem:[%s560_s1 + $0x28] sm:$0xff]  ;;  %v302_v10 = vor.u32 %v391_v7, %v301_v6  ;;  %v407_v12 = vld [vmem:[%s560_s1 + $0x60] sm:$0xff]  ;;  %v398_v13 = vld [vmem:[%s560_s1 + $0x18] sm:$0xff] }
   0x5   :  { %v408_v9 = vld [vmem:[%s560_s1 + $0x68] sm:$0xff]  ;;  %v406_v14 = vld [vmem:[%s560_s1 + $0x58] sm:$0xff]  ;;  %v397_v15 = vld [vmem:[%s560_s1 + $0x10] sm:$0xff] }
   0x6   :  { %202 = vmatpush.bf16.msra.mxu0 %v401_v2  ;;  %414 = vmatpush.bf16.msra.mxu3 %v401_v2  ;;  %v405_v16 = vld [vmem:[%s560_s1 + $0x50] sm:$0xff]  ;;  %v313_v17 = vld [vmem:[%s561_s0 + $0x20] sm:$0xf]  ;;  %v394_v18 = vld [vmem:[%s561_s0 + $0x28] sm:$0xf0] }
   0x7   :  { %221 = vmatpush.bf16.msra.mxu1 %v409_v3  ;;  %246 = vmatpush.bf16.msra.mxu2 %v411_v5  ;;  %v396_v19 = vld [vmem:[%s560_s1 + $0x8] sm:$0xff]  ;;  %v314_v21 = vor.u32 %v394_v18, %v313_v17  ;;  %v395_v22 = vld [vmem:[%s560_s1] sm:$0xff]  ;;  %v295_v27 = vld [vmem:[%s561_s0 + $0xc] sm:$0xf0] }
   0x8   :  { %v404_v20 = vld [vmem:[%s560_s1 + $0x48] sm:$0xff]  ;;  %v403_v23 = vld [vmem:[%s560_s1 + $0x40] sm:$0xff]  ;;  %v305_v28 = vld [vmem:[%s561_s0 + $0x18] sm:$0xf] }
   0x9   :  { %v293_v24 = vld [vmem:[%s561_s0] sm:$0xf]  ;;  %v390_v25 = vld [vmem:[%s561_s0 + $0x8] sm:$0xf0]  ;;  %v389_v26 = vld [vmem:[%s561_s0 + $0x4] sm:$0xf] }
   0xa   :  { %203 = vmatpush.bf16.msra.mxu0 %v400_v8  ;;  %415 = vmatpush.bf16.msra.mxu3 %v400_v8  ;;  %v393_v29 = vld [vmem:[%s561_s0 + $0x20] sm:$0xf0]  ;;  %v294_v30 = vor.u32 %v390_v25, %v293_v24  ;;  %v298_v31 = vor.u32 %v389_v26, %v295_v27  ;;  %v392_v33 = vld [vmem:[%s561_s0 + $0x1c] sm:$0xf]  ;;  %v307_v34 = vld [vmem:[%s561_s0 + $0x24] sm:$0xf0] }
   0xb   :  { %222 = vmatpush.bf16.msra.mxu1 %v408_v9  ;;  %387 = vmatmul.msk.bf16.vlgmr.msra.gmra.mxu2 %vm194_vm0, %v302_v10  ;;  %v306_v32 = vor.u32 %v393_v29, %v305_v28  ;;  %v310_v35 = vor.u32 %v392_v33, %v307_v34 }
   0xe   :  { %204 = vmatpush.bf16.msra.mxu0 %v399_v11  ;;  %416 = vmatpush.bf16.msra.mxu3 %v399_v11 }
   0xf   :  { %223 = vmatpush.bf16.msra.mxu1 %v407_v12 }
  0x12   :  { %205 = vmatpush.bf16.msra.mxu0 %v398_v13  ;;  %417 = vmatpush.bf16.msra.mxu3 %v398_v13 }
  0x13   :  { %224 = vmatpush.bf16.msra.mxu1 %v406_v14 }
  0x16   :  { %206 = vmatpush.bf16.msra.mxu0 %v397_v15  ;;  %418 = vmatpush.bf16.msra.mxu3 %v397_v15 }
  0x17   :  { %225 = vmatpush.bf16.msra.mxu1 %v405_v16 }
  0x1a   :  { %207 = vmatpush.bf16.msra.mxu0 %v396_v19  ;;  %419 = vmatpush.bf16.msra.mxu3 %v396_v19 }
  0x1b   :  { %226 = vmatpush.bf16.msra.mxu1 %v404_v20  ;;  %388 = vmatmul.msk.bf16.gmra.mxu2 %vm194_vm0, %v314_v21 }
  0x1e   :  { %208 = vmatpush.bf16.msra.mxu0 %v395_v22  ;;  %420 = vmatpush.bf16.msra.mxu3 %v395_v22 }
  0x1f   :  { %227 = vmatpush.bf16.msra.mxu1 %v403_v23 }
  0x21   :  { %209 = vmatmul.bf16.vlgmr.msra.gmra.mxu0 %v294_v30  ;;  %214 = vmatmul.bf16.vlgmr.msra.gmra.mxu3 %v306_v32 }
  0x22   :  { %228 = vmatmul.bf16.vlgmr.msra.gmra.mxu1 %v298_v31 }
  0x32   :  { %233 = vmatmul.bf16.gmra.mxu1 %v310_v35 }
  0x8e   :  { %v248_v36 = vpop.f32.mrf.mxu2 }
  0x96   :  { %v250_v42 = vpop.f32.mrf.mxu2 }
  0x9e   :  { %v210_v37 = vpop.f32.mrf.mxu0  ;;  %v253_v53 = vpop.f32.mrf.mxu2 }
  0x9f   :  { %v229_v38 = vpop.f32.mrf.mxu1 }
  0xa0   :  { %v230_v39 = vadd.f32 %v229_v38, %v210_v37 }
  0xa2   :  { %v249_v40 = vadd.f32 %v248_v36, %v230_v39 }
  0xa4   :  { %v258_v41 = vsub.f32 0.0, %v249_v40  ;;  %v215_v49 = vpop.f32.mrf.mxu3 }
  0xa6   :  { %v262_v43 = vmul.f32 1.442695, %v258_v41  ;;  %v212_v44 = vpop.f32.mrf.mxu0  ;;  %v255_v2 = vpop.f32.mrf.mxu2 }
  0xa7   :  { %v231_v45 = vpop.f32.mrf.mxu1 }
  0xa8   :  { %421 = vpow2.f32 %v262_v43  ;;  %v232_v46 = vadd.f32 %v231_v45, %v212_v44 }
  0xaa   :  { %v251_v47 = vadd.f32 %v250_v42, %v232_v46 }
  0xac   :  { %v259_v48 = vsub.f32 0.0, %v251_v47  ;;  %v217_v62 = vpop.f32.mrf.mxu3 }
  0xae   :  { %v422_v50 = vpop.eup %421  ;;  %v264_v51 = vmul.f32 1.442695, %v259_v48 }
  0xaf   :  { %v270_v52 = vadd.f32 1.0, %v422_v50  ;;  %v234_v54 = vpop.f32.mrf.mxu1 }
  0xb0   :  { %423 = vpow2.f32 %v264_v51  ;;  %v235_v55 = vadd.f32 %v234_v54, %v215_v49 }
  0xb1   :  { %425 = vrcp.f32 %v270_v52 }
  0xb2   :  { %v254_v56 = vadd.f32 %v253_v53, %v235_v55 }
  0xb4   :  { %v260_v57 = vsub.f32 0.0, %v254_v56 }
  0xb6   :  { %v424_v58 = vpop.eup %423  ;;  %v266_v59 = vmul.f32 1.442695, %v260_v57 }
  0xb7   :  { %v426_v60 = vpop.eup %425  ;;  %v271_v61 = vadd.f32 1.0, %v424_v58  ;;  %v236_v63 = vpop.f32.mrf.mxu1 }
  0xb8   :  { %v278_v0 = vmul.f32 %v426_v60, %v249_v40  ;;  %427 = vpow2.f32 %v266_v59  ;;  %v237_v1 = vadd.f32 %v236_v63, %v217_v62 }
  0xb9   :  { %429 = vrcp.f32 %v271_v61 }
  0xba   :  { %283 = vst.msk [vmem:[%s562_s2] sm:$0xff] %vm282_vm1, %v278_v0  ;;  %v256_v3 = vadd.f32 %v255_v2, %v237_v1 }
  0xbc   :  { %v261_v4 = vsub.f32 0.0, %v256_v3 }
  0xbe   :  { %v428_v5 = vpop.eup %427  ;;  %v268_v6 = vmul.f32 1.442695, %v261_v4 }
  0xbf   :  { %v430_v7 = vpop.eup %429  ;;  %v272_v8 = vadd.f32 1.0, %v428_v5 }
  0xc0   :  { %v279_v9 = vmul.f32 %v430_v7, %v251_v47  ;;  %431 = vpow2.f32 %v268_v6 }
  0xc1   :  { %433 = vrcp.f32 %v272_v8 }
  0xc2   :  { %284 = vst.msk [vmem:[%s562_s2 + $0x8] sm:$0xff] %vm282_vm1, %v279_v9 }
  0xc6   :  { %v432_v10 = vpop.eup %431 }
  0xc7   :  { %v434_v11 = vpop.eup %433  ;;  %v273_v12 = vadd.f32 1.0, %v432_v10 }
  0xc8   :  { %v280_v13 = vmul.f32 %v434_v11, %v254_v56 }
  0xc9   :  { %435 = vrcp.f32 %v273_v12 }
  0xca   :  { %285 = vst.msk [vmem:[%s562_s2 + $0x10] sm:$0xff] %vm282_vm1, %v280_v13 }
  0xcf   :  { %v436_v14 = vpop.eup %435 }
  0xd0   :  { %v281_v15 = vmul.f32 %v436_v14, %v256_v3 }
  0xd2   :  { %286 = vst.msk [vmem:[%s562_s2 + $0x18] sm:$0xff] %vm282_vm1, %v281_v15 }

// kernel: forward.34
= control target key start
LH: loop header
LB: loop body
LE: loop exit
PB: predicated region body
PF: predicated region fallthrough
CT: control target
= control target key end

     0   :  { %vm139_vm0 = vcmask 261120   ;;  %vm431_vm1 = vcmask 523264   ;;  %s1073_s1 = inlined_call_operand.vmem [shape: bf16[576,64], index: 1, kind: input, shape index: {}]   ;;  %s1074_s3 = inlined_call_operand.vmem [shape: bf16[32,64], index: 3, kind: input, shape index: {}]   ;;  %s1075_s2 = inlined_call_operand.vmem [shape: bf16[32,32], index: 2, kind: input, shape index: {}]   ;;  %s1076_s4 = inlined_call_operand.vmem [shape: f32[1,64], index: 4, kind: input, shape index: {}]   ;;  %s1077_s0 = inlined_call_operand.vmem [shape: bf16[32,576], index: 0, kind: input, shape index: {}]   ;;  %s1078_s5 = inlined_call_operand.vmem [shape: f32[32,64], index: 5, kind: output, shape index: {}]  }
   0x1   :  { %v786_v0 = vld [vmem:[%s1073_s1 + $0x38] sm:$0xff]  ;;  %v818_v2 = vld [vmem:[%s1074_s3 + $0x8] sm:$0xff]  ;;  %v785_v4 = vld [vmem:[%s1073_s1 + $0x30] sm:$0xff] }
   0x2   :  { %v794_v1 = vld [vmem:[%s1073_s1 + $0x78] sm:$0xff]  ;;  %438 = vmatpush.bf16.msra.mxu1 %v786_v0  ;;  %v793_v5 = vld [vmem:[%s1073_s1 + $0x70] sm:$0xff]  ;;  %152 = vmatpush.bf16.msra.mxu0 %v818_v2  ;;  %v817_v6 = vld [vmem:[%s1074_s3] sm:$0xff] }
   0x3   :  { %v802_v3 = vld [vmem:[%s1073_s1 + $0xb8] sm:$0xff]  ;;  %457 = vmatpush.bf16.msra.mxu2 %v794_v1  ;;  %v801_v7 = vld [vmem:[%s1073_s1 + $0xb0] sm:$0xff]  ;;  %v784_v9 = vld [vmem:[%s1073_s1 + $0x28] sm:$0xff] }
   0x4   :  { %476 = vmatpush.bf16.msra.mxu3 %v802_v3  ;;  %v810_v8 = vld [vmem:[%s1073_s1 + $0xf8] sm:$0xff]  ;;  %v792_v10 = vld [vmem:[%s1073_s1 + $0x68] sm:$0xff]  ;;  %v815_v11 = vld [vmem:[%s1075_s2] sm:$0xff] }
   0x5   :  { %v800_v12 = vld [vmem:[%s1073_s1 + $0xa8] sm:$0xff]  ;;  %v809_v13 = vld [vmem:[%s1073_s1 + $0xf0] sm:$0xff]  ;;  %v783_v14 = vld [vmem:[%s1073_s1 + $0x20] sm:$0xff] }
   0x6   :  { %439 = vmatpush.bf16.msra.mxu1 %v785_v4  ;;  %153 = vmatpush.bf16.msra.mxu0 %v817_v6  ;;  %v791_v15 = vld [vmem:[%s1073_s1 + $0x60] sm:$0xff]  ;;  %v808_v17 = vld [vmem:[%s1073_s1 + $0xe8] sm:$0xff]  ;;  %v782_v18 = vld [vmem:[%s1073_s1 + $0x18] sm:$0xff] }
   0x7   :  { %458 = vmatpush.bf16.msra.mxu2 %v793_v5  ;;  %v799_v16 = vld [vmem:[%s1073_s1 + $0xa0] sm:$0xff]  ;;  %v790_v19 = vld [vmem:[%s1073_s1 + $0x58] sm:$0xff]  ;;  %v781_v22 = vld [vmem:[%s1073_s1 + $0x10] sm:$0xff] }
   0x8   :  { %477 = vmatpush.bf16.msra.mxu3 %v801_v7  ;;  %v798_v20 = vld [vmem:[%s1073_s1 + $0x98] sm:$0xff]  ;;  %v807_v21 = vld [vmem:[%s1073_s1 + $0xe0] sm:$0xff]  ;;  %v789_v23 = vld [vmem:[%s1073_s1 + $0x50] sm:$0xff] }
   0x9   :  { %581 = vmatmul.msk.bf16.vlgmr.msra.gmra.mxu0 %vm139_vm0, %v815_v11  ;;  %v797_v24 = vld [vmem:[%s1073_s1 + $0x90] sm:$0xff]  ;;  %v806_v25 = vld [vmem:[%s1073_s1 + $0xd8] sm:$0xff]  ;;  %v780_v26 = vld [vmem:[%s1073_s1 + $0x8] sm:$0xff] }
   0xa   :  { %495 = vmatpush.bf16.msrb.mxu0 %v810_v8  ;;  %440 = vmatpush.bf16.msra.mxu1 %v784_v9  ;;  %v788_v27 = vld [vmem:[%s1073_s1 + $0x48] sm:$0xff]  ;;  %v779_v30 = vld [vmem:[%s1073_s1] sm:$0xff]  ;;  %v805_v31 = vld [vmem:[%s1073_s1 + $0xd0] sm:$0xff] }
   0xb   :  { %459 = vmatpush.bf16.msra.mxu2 %v792_v10  ;;  %v816_v28 = vld [vmem:[%s1075_s2 + $0x8] sm:$0xff]  ;;  %v787_v32 = vld [vmem:[%s1073_s1 + $0x40] sm:$0xff]  ;;  %v771_v35 = vld [vmem:[%s1077_s0 + $0x10] sm:$0xf0] }
   0xc   :  { %478 = vmatpush.bf16.msra.mxu3 %v800_v12  ;;  %v796_v29 = vld [vmem:[%s1073_s1 + $0x88] sm:$0xff]  ;;  %v795_v33 = vld [vmem:[%s1073_s1 + $0x80] sm:$0xff]  ;;  %v587_v37 = vld [vmem:[%s1077_s0 + $0x14] sm:$0xf0] }
   0xd   :  { %v585_v34 = vld [vmem:[%s1077_s0] sm:$0xf]  ;;  %v769_v36 = vld [vmem:[%s1077_s0 + $0x4] sm:$0xf]  ;;  %v814_v38 = vld [vmem:[%s1073_s1 + $0x118] sm:$0xff] }
   0xe   :  { %496 = vmatpush.bf16.msrb.mxu0 %v809_v13  ;;  %441 = vmatpush.bf16.msra.mxu1 %v783_v14  ;;  %v593_v39 = vld [vmem:[%s1077_s0 + $0x8] sm:$0xf]  ;;  %v772_v40 = vld [vmem:[%s1077_s0 + $0x18] sm:$0xf0]  ;;  %v586_v42 = vor.u32 %v771_v35, %v585_v34  ;;  %v590_v43 = vor.u32 %v769_v36, %v587_v37  ;;  %v813_v45 = vld [vmem:[%s1073_s1 + $0x110] sm:$0xff] }
   0xf   :  { %460 = vmatpush.bf16.msra.mxu2 %v791_v15  ;;  %v804_v41 = vld [vmem:[%s1073_s1 + $0xc8] sm:$0xff]  ;;  %v594_v44 = vor.u32 %v772_v40, %v593_v39  ;;  %v803_v46 = vld [vmem:[%s1073_s1 + $0xc0] sm:$0xff]  ;;  %v776_v53 = vld [vmem:[%s1077_s0 + $0x38] sm:$0xf0] }
  0x10   :  { %479 = vmatpush.bf16.msra.mxu3 %v799_v16  ;;  %v812_v47 = vld [vmem:[%s1073_s1 + $0x108] sm:$0xff]  ;;  %v595_v49 = vld [vmem:[%s1077_s0 + $0x1c] sm:$0xf0]  ;;  %v613_v56 = vld [vmem:[%s1077_s0 + $0x30] sm:$0xf] }
  0x11   :  { %v770_v48 = vld [vmem:[%s1077_s0 + $0xc] sm:$0xf]  ;;  %v811_v51 = vld [vmem:[%s1073_s1 + $0x100] sm:$0xff]  ;;  %v605_v52 = vld [vmem:[%s1077_s0 + $0x28] sm:$0xf] }
  0x12   :  { %497 = vmatpush.bf16.msrb.mxu0 %v808_v17  ;;  %442 = vmatpush.bf16.msra.mxu1 %v782_v18  ;;  %v598_v50 = vor.u32 %v770_v48, %v595_v49  ;;  %v774_v54 = vld [vmem:[%s1077_s0 + $0x2c] sm:$0xf]  ;;  %v607_v55 = vld [vmem:[%s1077_s0 + $0x3c] sm:$0xf0]  ;;  %v777_v57 = vld [vmem:[%s1077_s0 + $0x40] sm:$0xf0]  ;;  %v606_v58 = vor.u32 %v776_v53, %v605_v52 }
  0x13   :  { %461 = vmatpush.bf16.msra.mxu2 %v790_v19  ;;  %v610_v59 = vor.u32 %v774_v54, %v607_v55  ;;  %v614_v60 = vor.u32 %v777_v57, %v613_v56  ;;  %v775_v61 = vld [vmem:[%s1077_s0 + $0x34] sm:$0xf]  ;;  %v615_v62 = vld [vmem:[%s1077_s0 + $0x44] sm:$0xf0]  ;;  %v601_v0 = vld [vmem:[%s1077_s0 + $0x10] sm:$0xf] }
  0x14   :  { %480 = vmatpush.bf16.msra.mxu3 %v798_v20  ;;  %v618_v63 = vor.u32 %v775_v61, %v615_v62  ;;  %v773_v1 = vld [vmem:[%s1077_s0 + $0x20] sm:$0xf0]  ;;  %v621_v2 = vld [vmem:[%s1077_s0 + $0x38] sm:$0xf]  ;;  %v778_v3 = vld [vmem:[%s1077_s0 + $0x48] sm:$0xf0] }
  0x15   :  { %v602_v4 = vor.u32 %v773_v1, %v601_v0  ;;  %v622_v5 = vor.u32 %v778_v3, %v621_v2  ;;  %v823_v16 = vld [vmem:[%s1076_s4] ss:$0 sm:$0xff] }
  0x16   :  { %498 = vmatpush.bf16.msrb.mxu0 %v807_v21  ;;  %443 = vmatpush.bf16.msra.mxu1 %v781_v22 }
  0x17   :  { %462 = vmatpush.bf16.msra.mxu2 %v789_v23 }
  0x18   :  { %481 = vmatpush.bf16.msra.mxu3 %v797_v24 }
  0x19   :  { %582 = vmatmul.msk.bf16.gmra.mxu0 %vm139_vm0, %v816_v28 }
  0x1a   :  { %499 = vmatpush.bf16.msrb.mxu0 %v806_v25  ;;  %444 = vmatpush.bf16.msra.mxu1 %v780_v26 }
  0x1b   :  { %463 = vmatpush.bf16.msra.mxu2 %v788_v27 }
  0x1c   :  { %482 = vmatpush.bf16.msra.mxu3 %v796_v29 }
  0x1e   :  { %500 = vmatpush.bf16.msrb.mxu0 %v805_v31  ;;  %445 = vmatpush.bf16.msra.mxu1 %v779_v30 }
  0x1f   :  { %464 = vmatpush.bf16.msra.mxu2 %v787_v32 }
  0x20   :  { %483 = vmatpush.bf16.msra.mxu3 %v795_v33 }
  0x21   :  { %446 = vmatmul.bf16.vlgmr.msra.gmra.mxu1 %v586_v42 }
  0x22   :  { %501 = vmatpush.bf16.msrb.mxu0 %v804_v41  ;;  %518 = vmatpush.bf16.msrb.mxu1 %v814_v38 }
  0x23   :  { %819 = vmatpush.bf16.msrb.mxu2 %v814_v38  ;;  %484 = vmatmul.bf16.vlgmr.msra.gmra.mxu3 %v594_v44 }
  0x24   :  { %465 = vmatmul.bf16.vlgmr.msra.gmra.mxu2 %v590_v43 }
  0x26   :  { %502 = vmatpush.bf16.msrb.mxu0 %v803_v46  ;;  %519 = vmatpush.bf16.msrb.mxu1 %v813_v45 }
  0x27   :  { %820 = vmatpush.bf16.msrb.mxu2 %v813_v45 }
  0x29   :  { %503 = vmatmul.bf16.vlgmr.msrb.gmra.mxu0 %v598_v50 }
  0x2a   :  { %520 = vmatpush.bf16.msrb.mxu1 %v812_v47 }
  0x2b   :  { %821 = vmatpush.bf16.msrb.mxu2 %v812_v47 }
  0x2e   :  { %521 = vmatpush.bf16.msrb.mxu1 %v811_v51 }
  0x2f   :  { %822 = vmatpush.bf16.msrb.mxu2 %v811_v51 }
  0x31   :  { %451 = vmatmul.bf16.gmra.mxu1 %v606_v58 }
  0x33   :  { %489 = vmatmul.bf16.gmra.mxu3 %v614_v60 }
  0x34   :  { %470 = vmatmul.bf16.gmra.mxu2 %v610_v59 }
  0x39   :  { %508 = vmatmul.bf16.gmra.mxu0 %v618_v63 }
  0x41   :  { %767 = vmatmul.msk.bf16.vlgmr.msrb.gmra.mxu1 %vm431_vm1, %v602_v4 }
  0x44   :  { %768 = vmatmul.msk.bf16.vlgmr.msrb.gmra.mxu2 %vm431_vm1, %v622_v5 }
  0x86   :  { %v155_v6 = vpop.f32.mrf.mxu0 }
  0x87   :  { %v156_v19 = vadd.f32 %v823_v16, %v155_v6 }
  0x8e   :  { %v157_v7 = vpop.f32.mrf.mxu0 }
  0x8f   :  { %v158_v26 = vadd.f32 %v823_v16, %v157_v7 }
  0x96   :  { %v160_v8 = vpop.f32.mrf.mxu0 }
  0x97   :  { %v161_v25 = vadd.f32 %v823_v16, %v160_v8 }
  0x9e   :  { %v447_v9 = vpop.f32.mrf.mxu1  ;;  %v162_v10 = vpop.f32.mrf.mxu0 }
  0x9f   :  { %v448_v20 = vadd.f32 %v447_v9, %v156_v19  ;;  %v163_v37 = vadd.f32 %v823_v16, %v162_v10 }
  0xa6   :  { %v449_v12 = vpop.f32.mrf.mxu1  ;;  %v485_v13 = vpop.f32.mrf.mxu3 }
  0xa7   :  { %v466_v11 = vpop.f32.mrf.mxu2  ;;  %v504_v14 = vpop.f32.mrf.mxu0  ;;  %v450_v30 = vadd.f32 %v449_v12, %v158_v26 }
  0xa8   :  { %v467_v23 = vadd.f32 %v466_v11, %v448_v20 }
  0xaa   :  { %v486_v27 = vadd.f32 %v485_v13, %v467_v23 }
  0xac   :  { %v505_v33 = vadd.f32 %v504_v14, %v486_v27 }
  0xae   :  { %v452_v17 = vpop.f32.mrf.mxu1  ;;  %v487_v18 = vpop.f32.mrf.mxu3 }
  0xaf   :  { %v468_v15 = vpop.f32.mrf.mxu2  ;;  %v506_v21 = vpop.f32.mrf.mxu0  ;;  %v453_v28 = vadd.f32 %v452_v17, %v161_v25 }
  0xb0   :  { %v469_v34 = vadd.f32 %v468_v15, %v450_v30 }
  0xb2   :  { %v488_v40 = vadd.f32 %v487_v18, %v469_v34 }
  0xb4   :  { %v507_v48 = vadd.f32 %v506_v21, %v488_v40 }
  0xb6   :  { %v454_v24 = vpop.f32.mrf.mxu1  ;;  %v490_v29 = vpop.f32.mrf.mxu3 }
  0xb7   :  { %v471_v22 = vpop.f32.mrf.mxu2  ;;  %v509_v35 = vpop.f32.mrf.mxu0  ;;  %v455_v41 = vadd.f32 %v454_v24, %v163_v37 }
  0xb8   :  { %v472_v31 = vadd.f32 %v471_v22, %v453_v28 }
  0xba   :  { %v491_v38 = vadd.f32 %v490_v29, %v472_v31 }
  0xbc   :  { %v510_v43 = vadd.f32 %v509_v35, %v491_v38 }
  0xbe   :  { %v523_v36 = vpop.f32.mrf.mxu1  ;;  %v492_v46 = vpop.f32.mrf.mxu3 }
  0xbf   :  { %v473_v32 = vpop.f32.mrf.mxu2  ;;  %v524_v39 = vadd.f32 %v523_v36, %v505_v33  ;;  %v511_v54 = vpop.f32.mrf.mxu0 }
  0xc0   :  { %v474_v44 = vadd.f32 %v473_v32, %v455_v41 }
  0xc1   :  { %v533_v42 = vsub.f32 0.0, %v524_v39 }
  0xc2   :  { %v493_v51 = vadd.f32 %v492_v46, %v474_v44 }
  0xc3   :  { %v537_v45 = vmul.f32 1.442695, %v533_v42 }
  0xc4   :  { %v512_v58 = vadd.f32 %v511_v54, %v493_v51 }
  0xc5   :  { %824 = vpow2.f32 %v537_v45 }
  0xc6   :  { %v525_v50 = vpop.f32.mrf.mxu1 }
  0xc7   :  { %v528_v47 = vpop.f32.mrf.mxu2  ;;  %v526_v53 = vadd.f32 %v525_v50, %v507_v48 }
  0xc8   :  { %v529_v49 = vadd.f32 %v528_v47, %v510_v43 }
  0xc9   :  { %v534_v56 = vsub.f32 0.0, %v526_v53 }
  0xca   :  { %v535_v52 = vsub.f32 0.0, %v529_v49 }
  0xcb   :  { %v825_v57 = vpop.eup %824  ;;  %v539_v59 = vmul.f32 1.442695, %v534_v56 }
  0xcc   :  { %v541_v55 = vmul.f32 1.442695, %v535_v52  ;;  %v545_v60 = vadd.f32 1.0, %v825_v57 }
  0xce   :  { %826 = vpow2.f32 %v541_v55 }
  0xcf   :  { %v530_v61 = vpop.f32.mrf.mxu2  ;;  %828 = vpow2.f32 %v539_v59 }
  0xd0   :  { %v531_v62 = vadd.f32 %v530_v61, %v512_v58  ;;  %830 = vrcp.f32 %v545_v60 }
  0xd2   :  { %v536_v63 = vsub.f32 0.0, %v531_v62 }
  0xd4   :  { %v827_v0 = vpop.eup %826  ;;  %v543_v1 = vmul.f32 1.442695, %v536_v63 }
  0xd5   :  { %v547_v2 = vadd.f32 1.0, %v827_v0  ;;  %v829_v3 = vpop.eup %828 }
  0xd6   :  { %832 = vpow2.f32 %v543_v1  ;;  %v831_v4 = vpop.eup %830  ;;  %v546_v5 = vadd.f32 1.0, %v829_v3 }
  0xd7   :  { %834 = vrcp.f32 %v547_v2  ;;  %v553_v6 = vmul.f32 %v831_v4, %v524_v39 }
  0xd8   :  { %836 = vrcp.f32 %v546_v5 }
  0xd9   :  { %557 = vst.msk [vmem:[%s1078_s5] sm:$0xff] %vm431_vm1, %v553_v6 }
  0xdc   :  { %v833_v7 = vpop.eup %832 }
  0xdd   :  { %v835_v8 = vpop.eup %834  ;;  %v548_v9 = vadd.f32 1.0, %v833_v7 }
  0xde   :  { %v555_v10 = vmul.f32 %v835_v8, %v529_v49  ;;  %v837_v11 = vpop.eup %836 }
  0xdf   :  { %838 = vrcp.f32 %v548_v9  ;;  %v554_v12 = vmul.f32 %v837_v11, %v526_v53 }
  0xe0   :  { %559 = vst.msk [vmem:[%s1078_s5 + $0x10] sm:$0xff] %vm431_vm1, %v555_v10 }
  0xe1   :  { %558 = vst.msk [vmem:[%s1078_s5 + $0x8] sm:$0xff] %vm431_vm1, %v554_v12 }
  0xe5   :  { %v839_v13 = vpop.eup %838 }
  0xe6   :  { %v556_v14 = vmul.f32 %v839_v13, %v531_v62 }
  0xe8   :  { %560 = vst.msk [vmem:[%s1078_s5 + $0x18] sm:$0xff] %vm431_vm1, %v556_v14 }

// kernel: forward.35
= control target key start
LH: loop header
LB: loop body
LE: loop exit
PB: predicated region body
PF: predicated region fallthrough
CT: control target
= control target key end

     0   :  { %vm362_vm0 = vcmask 523264   ;;  %s949_s1 = inlined_call_operand.vmem [shape: bf16[576,64], index: 1, kind: input, shape index: {}]   ;;  %s950_s0 = inlined_call_operand.vmem [shape: bf16[32,576], index: 0, kind: input, shape index: {}]   ;;  %s951_s2 = inlined_call_operand.vmem [shape: f32[32,64], index: 2, kind: output, shape index: {}]  }
   0x1   :  { %v699_v0 = vld [vmem:[%s949_s1 + $0x38] sm:$0xff]  ;;  %v698_v4 = vld [vmem:[%s949_s1 + $0x30] sm:$0xff]  ;;  %v697_v8 = vld [vmem:[%s949_s1 + $0x28] sm:$0xff] }
   0x2   :  { %v707_v1 = vld [vmem:[%s949_s1 + $0x78] sm:$0xff]  ;;  %369 = vmatpush.bf16.msra.mxu0 %v699_v0  ;;  %v706_v5 = vld [vmem:[%s949_s1 + $0x70] sm:$0xff]  ;;  %v705_v9 = vld [vmem:[%s949_s1 + $0x68] sm:$0xff] }
   0x3   :  { %v715_v2 = vld [vmem:[%s949_s1 + $0xb8] sm:$0xff]  ;;  %388 = vmatpush.bf16.msra.mxu1 %v707_v1  ;;  %v714_v6 = vld [vmem:[%s949_s1 + $0xb0] sm:$0xff]  ;;  %v713_v10 = vld [vmem:[%s949_s1 + $0xa8] sm:$0xff] }
   0x4   :  { %v723_v3 = vld [vmem:[%s949_s1 + $0xf8] sm:$0xff]  ;;  %407 = vmatpush.bf16.msra.mxu2 %v715_v2  ;;  %v722_v7 = vld [vmem:[%s949_s1 + $0xf0] sm:$0xff]  ;;  %v721_v11 = vld [vmem:[%s949_s1 + $0xe8] sm:$0xff] }
   0x5   :  { %426 = vmatpush.bf16.msra.mxu3 %v723_v3  ;;  %v696_v12 = vld [vmem:[%s949_s1 + $0x20] sm:$0xff]  ;;  %v695_v16 = vld [vmem:[%s949_s1 + $0x18] sm:$0xff]  ;;  %v694_v20 = vld [vmem:[%s949_s1 + $0x10] sm:$0xff] }
   0x6   :  { %370 = vmatpush.bf16.msra.mxu0 %v698_v4  ;;  %v704_v13 = vld [vmem:[%s949_s1 + $0x60] sm:$0xff]  ;;  %v703_v17 = vld [vmem:[%s949_s1 + $0x58] sm:$0xff]  ;;  %v702_v21 = vld [vmem:[%s949_s1 + $0x50] sm:$0xff] }
   0x7   :  { %389 = vmatpush.bf16.msra.mxu1 %v706_v5  ;;  %v712_v14 = vld [vmem:[%s949_s1 + $0xa0] sm:$0xff]  ;;  %v711_v18 = vld [vmem:[%s949_s1 + $0x98] sm:$0xff]  ;;  %v710_v22 = vld [vmem:[%s949_s1 + $0x90] sm:$0xff] }
   0x8   :  { %408 = vmatpush.bf16.msra.mxu2 %v714_v6  ;;  %v720_v15 = vld [vmem:[%s949_s1 + $0xe0] sm:$0xff]  ;;  %v719_v19 = vld [vmem:[%s949_s1 + $0xd8] sm:$0xff]  ;;  %v718_v23 = vld [vmem:[%s949_s1 + $0xd0] sm:$0xff] }
   0x9   :  { %427 = vmatpush.bf16.msra.mxu3 %v722_v7  ;;  %v693_v24 = vld [vmem:[%s949_s1 + $0x8] sm:$0xff]  ;;  %v692_v28 = vld [vmem:[%s949_s1] sm:$0xff]  ;;  %v684_v33 = vld [vmem:[%s950_s0 + $0x10] sm:$0xf0] }
   0xa   :  { %371 = vmatpush.bf16.msra.mxu0 %v697_v8  ;;  %v701_v25 = vld [vmem:[%s949_s1 + $0x48] sm:$0xff]  ;;  %v700_v29 = vld [vmem:[%s949_s1 + $0x40] sm:$0xff]  ;;  %v500_v35 = vld [vmem:[%s950_s0 + $0x14] sm:$0xf0] }
   0xb   :  { %390 = vmatpush.bf16.msra.mxu1 %v705_v9  ;;  %v709_v26 = vld [vmem:[%s949_s1 + $0x88] sm:$0xff]  ;;  %v708_v30 = vld [vmem:[%s949_s1 + $0x80] sm:$0xff]  ;;  %v685_v37 = vld [vmem:[%s950_s0 + $0x18] sm:$0xf0] }
   0xc   :  { %409 = vmatpush.bf16.msra.mxu2 %v713_v10  ;;  %v717_v27 = vld [vmem:[%s949_s1 + $0xc8] sm:$0xff]  ;;  %v716_v31 = vld [vmem:[%s949_s1 + $0xc0] sm:$0xff]  ;;  %v727_v40 = vld [vmem:[%s949_s1 + $0x118] sm:$0xff] }
   0xd   :  { %428 = vmatpush.bf16.msra.mxu3 %v721_v11  ;;  %v498_v32 = vld [vmem:[%s950_s0] sm:$0xf]  ;;  %v682_v34 = vld [vmem:[%s950_s0 + $0x4] sm:$0xf]  ;;  %v506_v36 = vld [vmem:[%s950_s0 + $0x8] sm:$0xf] }
   0xe   :  { %372 = vmatpush.bf16.msra.mxu0 %v696_v12  ;;  %v683_v38 = vld [vmem:[%s950_s0 + $0xc] sm:$0xf]  ;;  %v508_v39 = vld [vmem:[%s950_s0 + $0x1c] sm:$0xf0]  ;;  %v499_v41 = vor.u32 %v684_v33, %v498_v32  ;;  %v503_v42 = vor.u32 %v682_v34, %v500_v35  ;;  %v507_v43 = vor.u32 %v685_v37, %v506_v36  ;;  %v726_v45 = vld [vmem:[%s949_s1 + $0x110] sm:$0xff] }
   0xf   :  { %391 = vmatpush.bf16.msra.mxu1 %v704_v13  ;;  %v511_v44 = vor.u32 %v683_v38, %v508_v39  ;;  %v725_v46 = vld [vmem:[%s949_s1 + $0x108] sm:$0xff]  ;;  %v724_v47 = vld [vmem:[%s949_s1 + $0x100] sm:$0xff]  ;;  %v689_v49 = vld [vmem:[%s950_s0 + $0x38] sm:$0xf0] }
  0x10   :  { %410 = vmatpush.bf16.msra.mxu2 %v712_v14  ;;  %v518_v48 = vld [vmem:[%s950_s0 + $0x28] sm:$0xf]  ;;  %v687_v50 = vld [vmem:[%s950_s0 + $0x2c] sm:$0xf]  ;;  %v520_v51 = vld [vmem:[%s950_s0 + $0x3c] sm:$0xf0] }
  0x11   :  { %429 = vmatpush.bf16.msra.mxu3 %v720_v15  ;;  %v526_v52 = vld [vmem:[%s950_s0 + $0x30] sm:$0xf]  ;;  %v690_v53 = vld [vmem:[%s950_s0 + $0x40] sm:$0xf0]  ;;  %v688_v54 = vld [vmem:[%s950_s0 + $0x34] sm:$0xf]  ;;  %v519_v56 = vor.u32 %v689_v49, %v518_v48  ;;  %v523_v57 = vor.u32 %v687_v50, %v520_v51 }
  0x12   :  { %373 = vmatpush.bf16.msra.mxu0 %v695_v16  ;;  %v528_v55 = vld [vmem:[%s950_s0 + $0x44] sm:$0xf0]  ;;  %v527_v58 = vor.u32 %v690_v53, %v526_v52  ;;  %v514_v60 = vld [vmem:[%s950_s0 + $0x10] sm:$0xf]  ;;  %v686_v61 = vld [vmem:[%s950_s0 + $0x20] sm:$0xf0] }
  0x13   :  { %392 = vmatpush.bf16.msra.mxu1 %v703_v17  ;;  %v531_v59 = vor.u32 %v688_v54, %v528_v55  ;;  %v534_v62 = vld [vmem:[%s950_s0 + $0x38] sm:$0xf]  ;;  %v691_v63 = vld [vmem:[%s950_s0 + $0x48] sm:$0xf0]  ;;  %v515_v0 = vor.u32 %v686_v61, %v514_v60 }
  0x14   :  { %411 = vmatpush.bf16.msra.mxu2 %v711_v18  ;;  %v535_v1 = vor.u32 %v691_v63, %v534_v62 }
  0x15   :  { %430 = vmatpush.bf16.msra.mxu3 %v719_v19 }
  0x16   :  { %374 = vmatpush.bf16.msra.mxu0 %v694_v20 }
  0x17   :  { %393 = vmatpush.bf16.msra.mxu1 %v702_v21 }
  0x18   :  { %412 = vmatpush.bf16.msra.mxu2 %v710_v22 }
  0x19   :  { %431 = vmatpush.bf16.msra.mxu3 %v718_v23 }
  0x1a   :  { %375 = vmatpush.bf16.msra.mxu0 %v693_v24 }
  0x1b   :  { %394 = vmatpush.bf16.msra.mxu1 %v701_v25 }
  0x1c   :  { %413 = vmatpush.bf16.msra.mxu2 %v709_v26 }
  0x1d   :  { %432 = vmatpush.bf16.msra.mxu3 %v717_v27 }
  0x1e   :  { %376 = vmatpush.bf16.msra.mxu0 %v692_v28 }
  0x1f   :  { %395 = vmatpush.bf16.msra.mxu1 %v700_v29 }
  0x20   :  { %414 = vmatpush.bf16.msra.mxu2 %v708_v30 }
  0x21   :  { %433 = vmatpush.bf16.msra.mxu3 %v716_v31  ;;  %377 = vmatmul.bf16.vlgmr.msra.gmra.mxu0 %v499_v41 }
  0x22   :  { %449 = vmatpush.bf16.msrb.mxu0 %v727_v40  ;;  %396 = vmatmul.bf16.vlgmr.msra.gmra.mxu1 %v503_v42 }
  0x23   :  { %728 = vmatpush.bf16.msrb.mxu1 %v727_v40  ;;  %415 = vmatmul.bf16.vlgmr.msra.gmra.mxu2 %v507_v43 }
  0x24   :  { %434 = vmatmul.bf16.vlgmr.msra.gmra.mxu3 %v511_v44 }
  0x26   :  { %450 = vmatpush.bf16.msrb.mxu0 %v726_v45 }
  0x27   :  { %729 = vmatpush.bf16.msrb.mxu1 %v726_v45 }
  0x2a   :  { %451 = vmatpush.bf16.msrb.mxu0 %v725_v46 }
  0x2b   :  { %730 = vmatpush.bf16.msrb.mxu1 %v725_v46 }
  0x2e   :  { %452 = vmatpush.bf16.msrb.mxu0 %v724_v47 }
  0x2f   :  { %731 = vmatpush.bf16.msrb.mxu1 %v724_v47 }
  0x31   :  { %382 = vmatmul.bf16.gmra.mxu0 %v519_v56 }
  0x32   :  { %401 = vmatmul.bf16.gmra.mxu1 %v523_v57 }
  0x33   :  { %420 = vmatmul.bf16.gmra.mxu2 %v527_v58 }
  0x34   :  { %439 = vmatmul.bf16.gmra.mxu3 %v531_v59 }
  0x41   :  { %680 = vmatmul.msk.bf16.vlgmr.msrb.gmra.mxu0 %vm362_vm0, %v515_v0 }
  0x42   :  { %681 = vmatmul.msk.bf16.vlgmr.msrb.gmra.mxu1 %vm362_vm0, %v535_v1 }
  0x9e   :  { %v378_v2 = vpop.f32.mrf.mxu0 }
  0x9f   :  { %v397_v3 = vpop.f32.mrf.mxu1 }
  0xa0   :  { %v398_v15 = vadd.f32 %v397_v3, %v378_v2 }
  0xa6   :  { %v416_v4 = vpop.f32.mrf.mxu2  ;;  %v380_v6 = vpop.f32.mrf.mxu0 }
  0xa7   :  { %v435_v5 = vpop.f32.mrf.mxu3  ;;  %v399_v7 = vpop.f32.mrf.mxu1  ;;  %v417_v17 = vadd.f32 %v416_v4, %v398_v15 }
  0xa8   :  { %v400_v25 = vadd.f32 %v399_v7, %v380_v6 }
  0xa9   :  { %v436_v20 = vadd.f32 %v435_v5, %v417_v17 }
  0xae   :  { %v418_v8 = vpop.f32.mrf.mxu2  ;;  %v383_v9 = vpop.f32.mrf.mxu0 }
  0xaf   :  { %v402_v10 = vpop.f32.mrf.mxu1  ;;  %v437_v11 = vpop.f32.mrf.mxu3  ;;  %v419_v29 = vadd.f32 %v418_v8, %v400_v25 }
  0xb0   :  { %v403_v16 = vadd.f32 %v402_v10, %v383_v9 }
  0xb1   :  { %v438_v36 = vadd.f32 %v437_v11, %v419_v29 }
  0xb6   :  { %v421_v12 = vpop.f32.mrf.mxu2  ;;  %v385_v13 = vpop.f32.mrf.mxu0 }
  0xb7   :  { %v404_v14 = vpop.f32.mrf.mxu1  ;;  %v422_v18 = vadd.f32 %v421_v12, %v403_v16  ;;  %v440_v19 = vpop.f32.mrf.mxu3 }
  0xb8   :  { %v405_v26 = vadd.f32 %v404_v14, %v385_v13 }
  0xb9   :  { %v441_v21 = vadd.f32 %v440_v19, %v422_v18 }
  0xbe   :  { %v423_v22 = vpop.f32.mrf.mxu2  ;;  %v454_v23 = vpop.f32.mrf.mxu0 }
  0xbf   :  { %v459_v24 = vpop.f32.mrf.mxu1  ;;  %v455_v27 = vadd.f32 %v454_v23, %v436_v20  ;;  %v424_v30 = vadd.f32 %v423_v22, %v405_v26  ;;  %v442_v35 = vpop.f32.mrf.mxu3 }
  0xc0   :  { %v460_v28 = vadd.f32 %v459_v24, %v441_v21 }
  0xc1   :  { %v464_v31 = vsub.f32 0.0, %v455_v27  ;;  %v443_v37 = vadd.f32 %v442_v35, %v424_v30 }
  0xc2   :  { %v466_v32 = vsub.f32 0.0, %v460_v28 }
  0xc3   :  { %v468_v33 = vmul.f32 1.442695, %v464_v31 }
  0xc4   :  { %v472_v34 = vmul.f32 1.442695, %v466_v32 }
  0xc5   :  { %732 = vpow2.f32 %v468_v33 }
  0xc6   :  { %734 = vpow2.f32 %v472_v34  ;;  %v456_v38 = vpop.f32.mrf.mxu0 }
  0xc7   :  { %v461_v39 = vpop.f32.mrf.mxu1  ;;  %v457_v40 = vadd.f32 %v456_v38, %v438_v36 }
  0xc8   :  { %v462_v41 = vadd.f32 %v461_v39, %v443_v37 }
  0xc9   :  { %v465_v42 = vsub.f32 0.0, %v457_v40 }
  0xca   :  { %v467_v43 = vsub.f32 0.0, %v462_v41 }
  0xcb   :  { %v733_v44 = vpop.eup %732  ;;  %v470_v45 = vmul.f32 1.442695, %v465_v42 }
  0xcc   :  { %v735_v46 = vpop.eup %734  ;;  %v476_v47 = vadd.f32 1.0, %v733_v44  ;;  %v474_v48 = vmul.f32 1.442695, %v467_v43 }
  0xcd   :  { %v478_v49 = vadd.f32 1.0, %v735_v46  ;;  %736 = vpow2.f32 %v470_v45 }
  0xce   :  { %738 = vrcp.f32 %v476_v47 }
  0xcf   :  { %740 = vrcp.f32 %v478_v49 }
  0xd0   :  { %742 = vpow2.f32 %v474_v48 }
  0xd3   :  { %v737_v50 = vpop.eup %736 }
  0xd4   :  { %v739_v51 = vpop.eup %738  ;;  %v477_v52 = vadd.f32 1.0, %v737_v50 }
  0xd5   :  { %v741_v53 = vpop.eup %740  ;;  %v484_v54 = vmul.f32 %v739_v51, %v455_v27 }
  0xd6   :  { %v743_v55 = vpop.eup %742  ;;  %v486_v56 = vmul.f32 %v741_v53, %v460_v28  ;;  %744 = vrcp.f32 %v477_v52 }
  0xd7   :  { %488 = vst.msk [vmem:[%s951_s2] sm:$0xff] %vm362_vm0, %v484_v54  ;;  %v479_v57 = vadd.f32 1.0, %v743_v55 }
  0xd8   :  { %490 = vst.msk [vmem:[%s951_s2 + $0x10] sm:$0xff] %vm362_vm0, %v486_v56 }
  0xd9   :  { %746 = vrcp.f32 %v479_v57 }
  0xdc   :  { %v745_v58 = vpop.eup %744 }
  0xdd   :  { %v485_v59 = vmul.f32 %v745_v58, %v457_v40 }
  0xdf   :  { %v747_v60 = vpop.eup %746  ;;  %489 = vst.msk [vmem:[%s951_s2 + $0x8] sm:$0xff] %vm362_vm0, %v485_v59 }
  0xe0   :  { %v487_v61 = vmul.f32 %v747_v60, %v462_v41 }
  0xe2   :  { %491 = vst.msk [vmem:[%s951_s2 + $0x18] sm:$0xff] %vm362_vm0, %v487_v61 }

// kernel: forward.39
= control target key start
LH: loop header
LB: loop body
LE: loop exit
PB: predicated region body
PF: predicated region fallthrough
CT: control target
= control target key end

     0   :  { %vm19_vm0 = vcmask 523264   ;;  %v135_v2 = vmov 16.0   ;;  %s204_s0 = inlined_call_operand.vmem [shape: f32[2,16,64], index: 0, kind: input, shape index: {}]   ;;  %s205_s1 = inlined_call_operand.vmem [shape: f32[64,10], index: 1, kind: input, shape index: {}]   ;;  %s206_s2 = inlined_call_operand.vmem [shape: f32[1,10], index: 2, kind: input, shape index: {}]   ;;  %s207_s3 = inlined_call_operand.hbm [shape: f32[2,10], index: 3, kind: output, shape index: {}]  }
   0x1   :  { %v54_v0 = vld [vmem:[%s205_s1 + $0x38] sm:$0xff]  ;;  %v53_v1 = vld [vmem:[%s205_s1 + $0x30] sm:$0xff]  ;;  %107 = vrcp.f32 %v135_v2  ;;  %v52_v3 = vld [vmem:[%s205_s1 + $0x28] sm:$0xff] }
   0x2   :  { %73 = vmatpush.msra.mxu0 %v54_v0  ;;  %v15_v4 = vld [vmem:[%s204_s0] sm:$0xff]  ;;  %v16_v5 = vld [vmem:[%s204_s0 + $0x8] sm:$0xff]  ;;  %v17_v6 = vld [vmem:[%s204_s0 + $0x10] sm:$0xff] }
   0x3   :  { %v18_v7 = vld [vmem:[%s204_s0 + $0x18] sm:$0xff]  ;;  %v20_v8 = vsel %vm19_vm0, %v15_v4, 0.0  ;;  %v51_v9 = vld [vmem:[%s205_s1 + $0x20] sm:$0xff]  ;;  %v21_v10 = vsel %vm19_vm0, %v16_v5, 0.0  ;;  %v29_v11 = vsel %vm19_vm0, %v17_v6, 0.0 }
   0x4   :  { %74 = vmatpush.msra.mxu0 %v53_v1  ;;  %v30_v12 = vsel %vm19_vm0, %v18_v7, 0.0  ;;  %v22_v13 = vadd.f32 %v21_v10, %v20_v8 }
   0x5   :  { %v31_v14 = vadd.f32 %v30_v12, %v29_v11 }
   0x6   :  { %75 = vmatpush.msra.mxu0 %v52_v3 }
   0x7   :  { %8 = vsyncpa [#allocation3], 0  ;;  %v50_v15 = vld [vmem:[%s205_s1 + $0x18] sm:$0xff]  ;;  %v108_v16 = vpop.eup %107  ;;  %v23_v17 = vrot.slane %v22_v13, 4  ;;  %v32_v18 = vrot.slane %v31_v14, 4  ;;  %v49_v19 = vld [vmem:[%s205_s1 + $0x10] sm:$0xff] }
   0x8   :  { %76 = vmatpush.msra.mxu0 %v51_v9  ;;  %v39_v20 = vmul.f32 16.0, %v108_v16  ;;  %v48_v23 = vld [vmem:[%s205_s1 + $0x8] sm:$0xff]  ;;  %v47_v27 = vld [vmem:[%s205_s1] sm:$0xff]  ;;  %vm43_vm1 = vweird.f32 %v108_v16  ;;  %vm61_vm2 = vcmask 1041409   ;;  %s136_s9 = smov [#allocation2]   ;;  %s94_s13 = sshll.u32 %s207_s3, 4  ;;  %s95_s13 = int_to_ptr.hbm [resolvable:$true] %s94_s13 }
   0x9   :  { %v24_v21 = vadd.f32 %v23_v17, %v22_v13  ;;  %v33_v22 = vadd.f32 %v32_v18, %v31_v14  ;;  %v106_v40 = vld [vmem:[%s206_s2] ss:$0 sm:$0xff]  ;;  %s92_s10 = sshll.u32 %s136_s9, 4  ;;  %vm85_vm3 = vcmask 74752   ;;  %s93_s10 = int_to_ptr.vmem [resolvable:$true] %s92_s10 }
   0xa   :  { %77 = vmatpush.msra.mxu0 %v50_v15  ;;  %v40_v24 = vsub.f32 1.0, %v39_v20 }
   0xb   :  { %v25_v25 = vrot.slane %v24_v21, 2  ;;  %v34_v26 = vrot.slane %v33_v22, 2 }
   0xc   :  { %78 = vmatpush.msra.mxu0 %v49_v19  ;;  %v41_v28 = vmul.f32 %v108_v16, %v40_v24 }
   0xd   :  { %v26_v29 = vadd.f32 %v25_v25, %v24_v21  ;;  %v35_v30 = vadd.f32 %v34_v26, %v33_v22 }
   0xe   :  { %79 = vmatpush.msra.mxu0 %v48_v23  ;;  %v42_v31 = vadd.f32 %v108_v16, %v41_v28 }
   0xf   :  { %v27_v32 = vrot.slane %v26_v29, 1  ;;  %v36_v33 = vrot.slane %v35_v30, 1 }
  0x10   :  { %80 = vmatpush.msra.mxu0 %v47_v27  ;;  %v44_v34 = vsel %vm43_vm1, %v108_v16, %v42_v31 }
  0x11   :  { %v28_v35 = vadd.f32 %v27_v32, %v26_v29  ;;  %v37_v36 = vadd.f32 %v36_v33, %v35_v30 }
  0x13   :  { %v45_v37 = vmul.f32 %v44_v34, %v28_v35  ;;  %v46_v38 = vmul.f32 %v44_v34, %v37_v36 }
  0x15   :  { %v62_v39 = vsel %vm61_vm2, %v46_v38, %v45_v37 }
  0x16   :  { %103 = vmatmul.msk.f32.vlgmr.msra.gmra.mxu0 %vm19_vm0, %v62_v39 }
  0x93   :  { %v82_v41 = vpop.f32.mrf.mxu0 }
  0x94   :  { %v83_v42 = vadd.f32 %v106_v40, %v82_v41 }
  0x96   :  { %86 = vst.msk [vmem:[#allocation2] sm:$0x3] %vm85_vm3, %v83_v42 }
  0x97   :  { %97 = dma.vmem_to_hbm [thread:$0]  %s93_s10, 32, %s95_s13, [#allocation3]  }
  0x98   :  { %133 = dma.done.wait [#allocation3], 32  }
  0x99   :  { %134 = vsyncadd [#allocation3], 4294967264 }
  0x9a   :  { %102 = vsyncpa [#allocation3], 1 }

// kernel: forward.36
= control target key start
LH: loop header
LB: loop body
LE: loop exit
PB: predicated region body
PF: predicated region fallthrough
CT: control target
= control target key end

     0   :  { %vm369_vm0 = vcmask 523264   ;;  %s973_s1 = inlined_call_operand.vmem [shape: bf16[576,64], index: 1, kind: input, shape index: {}]   ;;  %s974_s0 = inlined_call_operand.vmem [shape: bf16[32,576], index: 0, kind: input, shape index: {}]   ;;  %s975_s2 = inlined_call_operand.vmem [shape: f32[32,64], index: 2, kind: input, shape index: {}]   ;;  %s976_s3 = inlined_call_operand.vmem [shape: f32[32,64], index: 3, kind: output, shape index: {}]  }
   0x1   :  { %v706_v0 = vld [vmem:[%s973_s1 + $0x38] sm:$0xff]  ;;  %v705_v4 = vld [vmem:[%s973_s1 + $0x30] sm:$0xff]  ;;  %v704_v8 = vld [vmem:[%s973_s1 + $0x28] sm:$0xff] }
   0x2   :  { %v714_v1 = vld [vmem:[%s973_s1 + $0x78] sm:$0xff]  ;;  %376 = vmatpush.bf16.msra.mxu0 %v706_v0  ;;  %v713_v5 = vld [vmem:[%s973_s1 + $0x70] sm:$0xff]  ;;  %v712_v9 = vld [vmem:[%s973_s1 + $0x68] sm:$0xff] }
   0x3   :  { %v722_v2 = vld [vmem:[%s973_s1 + $0xb8] sm:$0xff]  ;;  %395 = vmatpush.bf16.msra.mxu1 %v714_v1  ;;  %v721_v6 = vld [vmem:[%s973_s1 + $0xb0] sm:$0xff]  ;;  %v720_v10 = vld [vmem:[%s973_s1 + $0xa8] sm:$0xff] }
   0x4   :  { %v730_v3 = vld [vmem:[%s973_s1 + $0xf8] sm:$0xff]  ;;  %414 = vmatpush.bf16.msra.mxu2 %v722_v2  ;;  %v729_v7 = vld [vmem:[%s973_s1 + $0xf0] sm:$0xff]  ;;  %v728_v11 = vld [vmem:[%s973_s1 + $0xe8] sm:$0xff] }
   0x5   :  { %433 = vmatpush.bf16.msra.mxu3 %v730_v3  ;;  %v703_v12 = vld [vmem:[%s973_s1 + $0x20] sm:$0xff]  ;;  %v702_v16 = vld [vmem:[%s973_s1 + $0x18] sm:$0xff]  ;;  %v701_v20 = vld [vmem:[%s973_s1 + $0x10] sm:$0xff] }
   0x6   :  { %377 = vmatpush.bf16.msra.mxu0 %v705_v4  ;;  %v711_v13 = vld [vmem:[%s973_s1 + $0x60] sm:$0xff]  ;;  %v710_v17 = vld [vmem:[%s973_s1 + $0x58] sm:$0xff]  ;;  %v709_v21 = vld [vmem:[%s973_s1 + $0x50] sm:$0xff] }
   0x7   :  { %396 = vmatpush.bf16.msra.mxu1 %v713_v5  ;;  %v719_v14 = vld [vmem:[%s973_s1 + $0xa0] sm:$0xff]  ;;  %v718_v18 = vld [vmem:[%s973_s1 + $0x98] sm:$0xff]  ;;  %v717_v22 = vld [vmem:[%s973_s1 + $0x90] sm:$0xff] }
   0x8   :  { %415 = vmatpush.bf16.msra.mxu2 %v721_v6  ;;  %v727_v15 = vld [vmem:[%s973_s1 + $0xe0] sm:$0xff]  ;;  %v726_v19 = vld [vmem:[%s973_s1 + $0xd8] sm:$0xff]  ;;  %v725_v23 = vld [vmem:[%s973_s1 + $0xd0] sm:$0xff] }
   0x9   :  { %434 = vmatpush.bf16.msra.mxu3 %v729_v7  ;;  %v700_v24 = vld [vmem:[%s973_s1 + $0x8] sm:$0xff]  ;;  %v699_v28 = vld [vmem:[%s973_s1] sm:$0xff]  ;;  %v691_v33 = vld [vmem:[%s974_s0 + $0x10] sm:$0xf0] }
   0xa   :  { %378 = vmatpush.bf16.msra.mxu0 %v704_v8  ;;  %v708_v25 = vld [vmem:[%s973_s1 + $0x48] sm:$0xff]  ;;  %v707_v29 = vld [vmem:[%s973_s1 + $0x40] sm:$0xff]  ;;  %v507_v35 = vld [vmem:[%s974_s0 + $0x14] sm:$0xf0] }
   0xb   :  { %397 = vmatpush.bf16.msra.mxu1 %v712_v9  ;;  %v716_v26 = vld [vmem:[%s973_s1 + $0x88] sm:$0xff]  ;;  %v715_v30 = vld [vmem:[%s973_s1 + $0x80] sm:$0xff]  ;;  %v692_v37 = vld [vmem:[%s974_s0 + $0x18] sm:$0xf0] }
   0xc   :  { %416 = vmatpush.bf16.msra.mxu2 %v720_v10  ;;  %v724_v27 = vld [vmem:[%s973_s1 + $0xc8] sm:$0xff]  ;;  %v723_v31 = vld [vmem:[%s973_s1 + $0xc0] sm:$0xff]  ;;  %v734_v40 = vld [vmem:[%s973_s1 + $0x118] sm:$0xff] }
   0xd   :  { %435 = vmatpush.bf16.msra.mxu3 %v728_v11  ;;  %v505_v32 = vld [vmem:[%s974_s0] sm:$0xf]  ;;  %v689_v34 = vld [vmem:[%s974_s0 + $0x4] sm:$0xf]  ;;  %v513_v36 = vld [vmem:[%s974_s0 + $0x8] sm:$0xf] }
   0xe   :  { %379 = vmatpush.bf16.msra.mxu0 %v703_v12  ;;  %v690_v38 = vld [vmem:[%s974_s0 + $0xc] sm:$0xf]  ;;  %v515_v39 = vld [vmem:[%s974_s0 + $0x1c] sm:$0xf0]  ;;  %v506_v41 = vor.u32 %v691_v33, %v505_v32  ;;  %v510_v42 = vor.u32 %v689_v34, %v507_v35  ;;  %v514_v43 = vor.u32 %v692_v37, %v513_v36  ;;  %v733_v45 = vld [vmem:[%s973_s1 + $0x110] sm:$0xff] }
   0xf   :  { %398 = vmatpush.bf16.msra.mxu1 %v711_v13  ;;  %v518_v44 = vor.u32 %v690_v38, %v515_v39  ;;  %v732_v46 = vld [vmem:[%s973_s1 + $0x108] sm:$0xff]  ;;  %v731_v47 = vld [vmem:[%s973_s1 + $0x100] sm:$0xff]  ;;  %v696_v49 = vld [vmem:[%s974_s0 + $0x38] sm:$0xf0] }
  0x10   :  { %417 = vmatpush.bf16.msra.mxu2 %v719_v14  ;;  %v525_v48 = vld [vmem:[%s974_s0 + $0x28] sm:$0xf]  ;;  %v694_v50 = vld [vmem:[%s974_s0 + $0x2c] sm:$0xf]  ;;  %v527_v51 = vld [vmem:[%s974_s0 + $0x3c] sm:$0xf0] }
  0x11   :  { %436 = vmatpush.bf16.msra.mxu3 %v727_v15  ;;  %v533_v52 = vld [vmem:[%s974_s0 + $0x30] sm:$0xf]  ;;  %v697_v53 = vld [vmem:[%s974_s0 + $0x40] sm:$0xf0]  ;;  %v695_v54 = vld [vmem:[%s974_s0 + $0x34] sm:$0xf]  ;;  %v526_v56 = vor.u32 %v696_v49, %v525_v48  ;;  %v530_v57 = vor.u32 %v694_v50, %v527_v51 }
  0x12   :  { %380 = vmatpush.bf16.msra.mxu0 %v702_v16  ;;  %v535_v55 = vld [vmem:[%s974_s0 + $0x44] sm:$0xf0]  ;;  %v534_v58 = vor.u32 %v697_v53, %v533_v52  ;;  %v521_v60 = vld [vmem:[%s974_s0 + $0x10] sm:$0xf]  ;;  %v693_v61 = vld [vmem:[%s974_s0 + $0x20] sm:$0xf0] }
  0x13   :  { %399 = vmatpush.bf16.msra.mxu1 %v710_v17  ;;  %v538_v59 = vor.u32 %v695_v54, %v535_v55  ;;  %v541_v62 = vld [vmem:[%s974_s0 + $0x38] sm:$0xf]  ;;  %v698_v63 = vld [vmem:[%s974_s0 + $0x48] sm:$0xf0]  ;;  %v522_v0 = vor.u32 %v693_v61, %v521_v60  ;;  %v99_v11 = vld [vmem:[%s975_s2] sm:$0xff] }
  0x14   :  { %418 = vmatpush.bf16.msra.mxu2 %v718_v18  ;;  %v542_v1 = vor.u32 %v698_v63, %v541_v62  ;;  %v101_v13 = vld [vmem:[%s975_s2 + $0x10] sm:$0xff] }
  0x15   :  { %437 = vmatpush.bf16.msra.mxu3 %v726_v19 }
  0x16   :  { %381 = vmatpush.bf16.msra.mxu0 %v701_v20 }
  0x17   :  { %400 = vmatpush.bf16.msra.mxu1 %v709_v21  ;;  %v100_v21 = vld [vmem:[%s975_s2 + $0x8] sm:$0xff] }
  0x18   :  { %419 = vmatpush.bf16.msra.mxu2 %v717_v22  ;;  %v102_v22 = vld [vmem:[%s975_s2 + $0x18] sm:$0xff] }
  0x19   :  { %438 = vmatpush.bf16.msra.mxu3 %v725_v23 }
  0x1a   :  { %382 = vmatpush.bf16.msra.mxu0 %v700_v24 }
  0x1b   :  { %401 = vmatpush.bf16.msra.mxu1 %v708_v25 }
  0x1c   :  { %420 = vmatpush.bf16.msra.mxu2 %v716_v26 }
  0x1d   :  { %439 = vmatpush.bf16.msra.mxu3 %v724_v27 }
  0x1e   :  { %383 = vmatpush.bf16.msra.mxu0 %v699_v28 }
  0x1f   :  { %402 = vmatpush.bf16.msra.mxu1 %v707_v29 }
  0x20   :  { %421 = vmatpush.bf16.msra.mxu2 %v715_v30 }
  0x21   :  { %440 = vmatpush.bf16.msra.mxu3 %v723_v31  ;;  %384 = vmatmul.bf16.vlgmr.msra.gmra.mxu0 %v506_v41 }
  0x22   :  { %456 = vmatpush.bf16.msrb.mxu0 %v734_v40  ;;  %403 = vmatmul.bf16.vlgmr.msra.gmra.mxu1 %v510_v42 }
  0x23   :  { %735 = vmatpush.bf16.msrb.mxu1 %v734_v40  ;;  %422 = vmatmul.bf16.vlgmr.msra.gmra.mxu2 %v514_v43 }
  0x24   :  { %441 = vmatmul.bf16.vlgmr.msra.gmra.mxu3 %v518_v44 }
  0x26   :  { %457 = vmatpush.bf16.msrb.mxu0 %v733_v45 }
  0x27   :  { %736 = vmatpush.bf16.msrb.mxu1 %v733_v45 }
  0x2a   :  { %458 = vmatpush.bf16.msrb.mxu0 %v732_v46 }
  0x2b   :  { %737 = vmatpush.bf16.msrb.mxu1 %v732_v46 }
  0x2e   :  { %459 = vmatpush.bf16.msrb.mxu0 %v731_v47 }
  0x2f   :  { %738 = vmatpush.bf16.msrb.mxu1 %v731_v47 }
  0x31   :  { %389 = vmatmul.bf16.gmra.mxu0 %v526_v56 }
  0x32   :  { %408 = vmatmul.bf16.gmra.mxu1 %v530_v57 }
  0x33   :  { %427 = vmatmul.bf16.gmra.mxu2 %v534_v58 }
  0x34   :  { %446 = vmatmul.bf16.gmra.mxu3 %v538_v59 }
  0x41   :  { %687 = vmatmul.msk.bf16.vlgmr.msrb.gmra.mxu0 %vm369_vm0, %v522_v0 }
  0x42   :  { %688 = vmatmul.msk.bf16.vlgmr.msrb.gmra.mxu1 %vm369_vm0, %v542_v1 }
  0x9e   :  { %v385_v2 = vpop.f32.mrf.mxu0 }
  0x9f   :  { %v404_v3 = vpop.f32.mrf.mxu1  ;;  %v386_v14 = vadd.f32 %v385_v2, %v99_v11 }
  0xa1   :  { %v405_v19 = vadd.f32 %v404_v3, %v386_v14 }
  0xa6   :  { %v423_v4 = vpop.f32.mrf.mxu2  ;;  %v387_v6 = vpop.f32.mrf.mxu0 }
  0xa7   :  { %v442_v5 = vpop.f32.mrf.mxu3  ;;  %v406_v7 = vpop.f32.mrf.mxu1  ;;  %v424_v23 = vadd.f32 %v423_v4, %v405_v19  ;;  %v388_v26 = vadd.f32 %v387_v6, %v100_v21 }
  0xa9   :  { %v443_v28 = vadd.f32 %v442_v5, %v424_v23  ;;  %v407_v33 = vadd.f32 %v406_v7, %v388_v26 }
  0xae   :  { %v425_v8 = vpop.f32.mrf.mxu2  ;;  %v390_v9 = vpop.f32.mrf.mxu0 }
  0xaf   :  { %v409_v10 = vpop.f32.mrf.mxu1  ;;  %v444_v12 = vpop.f32.mrf.mxu3  ;;  %v391_v15 = vadd.f32 %v390_v9, %v101_v13  ;;  %v426_v37 = vadd.f32 %v425_v8, %v407_v33 }
  0xb1   :  { %v410_v20 = vadd.f32 %v409_v10, %v391_v15  ;;  %v445_v44 = vadd.f32 %v444_v12, %v426_v37 }
  0xb6   :  { %v428_v16 = vpop.f32.mrf.mxu2  ;;  %v392_v17 = vpop.f32.mrf.mxu0 }
  0xb7   :  { %v411_v18 = vpop.f32.mrf.mxu1  ;;  %v429_v24 = vadd.f32 %v428_v16, %v410_v20  ;;  %v447_v25 = vpop.f32.mrf.mxu3  ;;  %v393_v27 = vadd.f32 %v392_v17, %v102_v22 }
  0xb9   :  { %v448_v29 = vadd.f32 %v447_v25, %v429_v24  ;;  %v412_v34 = vadd.f32 %v411_v18, %v393_v27 }
  0xbe   :  { %v430_v30 = vpop.f32.mrf.mxu2  ;;  %v461_v31 = vpop.f32.mrf.mxu0 }
  0xbf   :  { %v466_v32 = vpop.f32.mrf.mxu1  ;;  %v462_v35 = vadd.f32 %v461_v31, %v443_v28  ;;  %v431_v38 = vadd.f32 %v430_v30, %v412_v34  ;;  %v449_v43 = vpop.f32.mrf.mxu3 }
  0xc0   :  { %v467_v36 = vadd.f32 %v466_v32, %v448_v29 }
  0xc1   :  { %v471_v39 = vsub.f32 0.0, %v462_v35  ;;  %v450_v45 = vadd.f32 %v449_v43, %v431_v38 }
  0xc2   :  { %v473_v40 = vsub.f32 0.0, %v467_v36 }
  0xc3   :  { %v475_v41 = vmul.f32 1.442695, %v471_v39 }
  0xc4   :  { %v479_v42 = vmul.f32 1.442695, %v473_v40 }
  0xc5   :  { %739 = vpow2.f32 %v475_v41 }
  0xc6   :  { %741 = vpow2.f32 %v479_v42  ;;  %v463_v46 = vpop.f32.mrf.mxu0 }
  0xc7   :  { %v468_v47 = vpop.f32.mrf.mxu1  ;;  %v464_v48 = vadd.f32 %v463_v46, %v445_v44 }
  0xc8   :  { %v469_v49 = vadd.f32 %v468_v47, %v450_v45 }
  0xc9   :  { %v472_v50 = vsub.f32 0.0, %v464_v48 }
  0xca   :  { %v474_v51 = vsub.f32 0.0, %v469_v49 }
  0xcb   :  { %v740_v52 = vpop.eup %739  ;;  %v477_v53 = vmul.f32 1.442695, %v472_v50 }
  0xcc   :  { %v742_v54 = vpop.eup %741  ;;  %v483_v55 = vadd.f32 1.0, %v740_v52  ;;  %v481_v56 = vmul.f32 1.442695, %v474_v51 }
  0xcd   :  { %v485_v57 = vadd.f32 1.0, %v742_v54  ;;  %743 = vpow2.f32 %v477_v53 }
  0xce   :  { %745 = vrcp.f32 %v483_v55 }
  0xcf   :  { %747 = vrcp.f32 %v485_v57 }
  0xd0   :  { %749 = vpow2.f32 %v481_v56 }
  0xd3   :  { %v744_v58 = vpop.eup %743 }
  0xd4   :  { %v746_v59 = vpop.eup %745  ;;  %v484_v60 = vadd.f32 1.0, %v744_v58 }
  0xd5   :  { %v748_v61 = vpop.eup %747  ;;  %v491_v62 = vmul.f32 %v746_v59, %v462_v35 }
  0xd6   :  { %v750_v63 = vpop.eup %749  ;;  %v493_v0 = vmul.f32 %v748_v61, %v467_v36  ;;  %751 = vrcp.f32 %v484_v60 }
  0xd7   :  { %495 = vst.msk [vmem:[%s976_s3] sm:$0xff] %vm369_vm0, %v491_v62  ;;  %v486_v1 = vadd.f32 1.0, %v750_v63 }
  0xd8   :  { %497 = vst.msk [vmem:[%s976_s3 + $0x10] sm:$0xff] %vm369_vm0, %v493_v0 }
  0xd9   :  { %753 = vrcp.f32 %v486_v1 }
  0xdc   :  { %v752_v2 = vpop.eup %751 }
  0xdd   :  { %v492_v3 = vmul.f32 %v752_v2, %v464_v48 }
  0xdf   :  { %v754_v4 = vpop.eup %753  ;;  %496 = vst.msk [vmem:[%s976_s3 + $0x8] sm:$0xff] %vm369_vm0, %v492_v3 }
  0xe0   :  { %v494_v5 = vmul.f32 %v754_v4, %v469_v49 }
  0xe2   :  { %498 = vst.msk [vmem:[%s976_s3 + $0x18] sm:$0xff] %vm369_vm0, %v494_v5 }

</bundles_post_ra>
